<compile_context>
chip_gen: v7x
topology: tpu7x:2x2x1
jax: 0.10.0
libtpu: 0.0.40
codegen_flags: <defaults>
</compile_context>

<pallas_src>
import numpy as np
import jax
import jax.numpy as jnp
from jax import lax
from jax.experimental import pallas as pl
from jax.experimental.pallas import tpu as pltpu

HIDDEN = 128
NF_PAD = 8     # node features 6 -> 8 (aligned encoder K-dim)
EF_PAD = 8     # edge features 4 -> 8


# ------------------------------ fused kernel -------------------------------- #

def fused_gnn_kernel(
        # per-graph data (one graph per grid step)
        x_ref, ea_ref, mb_ref, gsrc_ref, gdst_ref,
        # node encoder (Linear -> ReLU -> LayerNorm)
        ne_w_ref, ne_b_ref, ln_g_ref, ln_b_ref,
        # 3x GATConv (heads = 4, 4, 2; concat=False)
        g1_w_ref, g1_as_ref, g1_ad_ref, g1_b_ref,
        g2_w_ref, g2_as_ref, g2_ad_ref, g2_b_ref,
        g3_w_ref, g3_as_ref, g3_ad_ref, g3_b_ref,
        # edge encoder
        ee_w_ref, ee_b_ref,
        # edge scorer (first Linear split into src/dst/edge parts)
        s1s_ref, s1d_ref, s1e_ref, s1b_ref,
        s2w_ref, s2b_ref, s3wt_ref, s3b_ref,
        # output: lane-dense (1, E_pad)
        o_ref):
    f32 = jnp.float32
    bf16 = jnp.bfloat16
    dn = (((1,), (1,)), ((), ()))            # contract last dims: A[M,K] x B[N,K] -> [M,N]

    # ----------------- node encoder: Linear -> ReLU -> LayerNorm -------------
    h = jnp.dot(x_ref[...], ne_w_ref[...], preferred_element_type=f32) + ne_b_ref[...]
    h = jnp.maximum(h, 0.0)
    mean = jnp.mean(h, axis=-1, keepdims=True)
    var = jnp.mean(jnp.square(h - mean), axis=-1, keepdims=True)
    h = (h - mean) * lax.rsqrt(var + 1e-5) * ln_g_ref[...] + ln_b_ref[...]

    n, d = h.shape
    mbf = mb_ref[...].astype(f32)            # [N, N] additive mask bias (0 / -1e30)

    # ------------------------------- GATConv ---------------------------------
    def gat_layer(h_in, w_ref_, as_ref_, ad_ref_, b_ref_, relu):
        heads = as_ref_.shape[0]
        # one wide bf16 matmul for all heads, f32 accumulation
        xh = jnp.dot(h_in.astype(bf16), w_ref_[...], preferred_element_type=f32)    # [N, H*D]
        xh_b = xh.astype(bf16)
        # all attention logits from two bf16 matmuls (block-embedded a vectors)
        srcr = lax.dot_general(as_ref_[...], xh_b, dn, preferred_element_type=f32)  # [H, N]
        dstc = lax.dot_general(ad_ref_[...], xh_b, dn, preferred_element_type=f32)  # [H, N]
        # logits for all heads via broadcast (no slicing / concatenates):
        # s[h, i, j] = dstc[h, i] + srcr[h, j]
        s = dstc[:, :, None] + srcr[:, None, :]                                     # [H, N, N]
        s = jnp.where(s > 0.0, s, 0.2 * s)                                          # LeakyReLU(0.2)
        s = s + mbf[None, :, :]                                                     # mask non-edges
        s = s - jnp.max(s, axis=-1, keepdims=True)
        p = jnp.exp(s)                                                              # masked -> exactly 0
        attn = p / jnp.sum(p, axis=-1, keepdims=True)                               # [H, N, N]
        # Per-head aggregation: attn[h] is a clean leading-dim view, xh head slices are
        # 128-lane aligned.
        # TODO(synk): fold into a single [N, H*N] @ [H*N, D] matmul once the required
        # sublane->lane merge relayout is verified on-target; negligible at N=16.
        acc = jnp.zeros((n, d), f32)
        for hd in range(heads):
            acc = acc + jnp.dot(attn[hd], xh[:, hd * d:(hd + 1) * d],
                                preferred_element_type=f32)
        out = acc * (1.0 / heads) + b_ref_[...]                                     # mean over heads
        return jnp.maximum(out, 0.0) if relu else out

    # F.dropout(p=0.1, training=False) between layers is identity.
    h = gat_layer(h, g1_w_ref, g1_as_ref, g1_ad_ref, g1_b_ref, True)
    h = gat_layer(h, g2_w_ref, g2_as_ref, g2_ad_ref, g2_b_ref, True)
    h = gat_layer(h, g3_w_ref, g3_as_ref, g3_ad_ref, g3_b_ref, False)

    # ------------------------------ edge encoder -----------------------------
    ef = jnp.maximum(
        jnp.dot(ea_ref[...], ee_w_ref[...], preferred_element_type=f32)
        + ee_b_ref[...], 0.0)                                                       # [E_pad, 64]

    # -------------- edge scorer (split first layer + MXU one-hot gather) ------
    hb = h.astype(bf16)
    p_src = jnp.dot(hb, s1s_ref[...], preferred_element_type=f32).astype(bf16)      # [N, 256]
    p_dst = jnp.dot(hb, s1d_ref[...], preferred_element_type=f32).astype(bf16)      # [N, 256]
    gath = (jnp.dot(gsrc_ref[...], p_src, preferred_element_type=f32)
            + jnp.dot(gdst_ref[...], p_dst, preferred_element_type=f32))            # [E_pad, 256]
    h1 = jnp.maximum(
        gath + jnp.dot(ef.astype(bf16), s1e_ref[...], preferred_element_type=f32)
        + s1b_ref[...], 0.0)
    h2 = jnp.maximum(
        jnp.dot(h1.astype(bf16), s2w_ref[...], preferred_element_type=f32)
        + s2b_ref[...], 0.0)                                                        # [E_pad, 128]
    # lane-dense output: scores laid out as (1, E_pad)
    o_ref[...] = lax.dot_general(s3wt_ref[...], h2, dn,
                                 preferred_element_type=f32) + s3b_ref[...]


# ------------------------------ parameter init ------------------------------- #

def init_params(key):
    ks = iter(jax.random.split(key, 64))
    bf16 = jnp.bfloat16
    f32 = jnp.float32

    def lin(din, dout):
        w = jax.random.normal(next(ks), (din, dout), f32) / np.sqrt(din)
        b = 0.01 * jax.random.normal(next(ks), (1, dout), f32)
        return w, b

    def embed_heads(a):                       # [H, D] -> block rows [H, H*D]
        heads, dd = a.shape
        a_np = np.asarray(a)
        m = np.zeros((heads, heads * dd), np.float32)
        for hh in range(heads):
            m[hh, hh * dd:(hh + 1) * dd] = a_np[hh]
        return jnp.asarray(m)

    p = {}
    w, p['ne_b'] = lin(NF_PAD, HIDDEN)
    p['ne_w'] = w.astype(bf16)
    p['ln_g'] = jnp.ones((1, HIDDEN), f32)
    p['ln_b'] = jnp.zeros((1, HIDDEN), f32)
    for name, heads in (("gat1", 4), ("gat2", 4), ("gat3", 2)):
        w, _ = lin(HIDDEN, heads * HIDDEN)          # GATConv linear has no bias
        p[name + '_w'] = w.astype(bf16)             # bf16 weights, f32 accumulate
        asrc = 0.1 * jax.random.normal(next(ks), (heads, HIDDEN), f32)
        adst = 0.1 * jax.random.normal(next(ks), (heads, HIDDEN), f32)
        p[name + '_asrc'] = embed_heads(asrc).astype(bf16)   # [H, H*hidden]
        p[name + '_adst'] = embed_heads(adst).astype(bf16)
        p[name + '_b'] = 0.01 * jax.random.normal(next(ks), (1, HIDDEN), f32)
    w, p['ee_b'] = lin(EF_PAD, HIDDEN // 2)
    p['ee_w'] = w.astype(bf16)
    w1s, p['s1_b'] = lin(HIDDEN, 256)               # first scorer Linear, split
    w1d, _ = lin(HIDDEN, 256)
    w1e, _ = lin(HIDDEN // 2, 256)
    p['s1_src'] = w1s.astype(bf16)
    p['s1_dst'] = w1d.astype(bf16)
    p['s1_edge'] = w1e.astype(bf16)
    w2, p['s2_b'] = lin(256, 128)
    p['s2_w'] = w2.astype(bf16)
    w3, p['s3_b'] = lin(128, 1)
    p['s3_wt'] = w3.T                               # [1, 128] f32 (lane-dense score matmul)
    return p


# --------------------------- topology precompute ------------------------------ #

def edge_bucket(E):
    """Fixed power-of-two bucket (>=128) so edge-count changes don't recompile."""
    return max(128, 1 << (max(int(E), 1) - 1).bit_length())


def build_topology(edge_index, num_nodes, e_pad):
    """Build mask bias + one-hot gather matrices ONCE per topology (numpy, no XLA scatters)."""
    ei = np.asarray(edge_index)
    src, dst = ei[0], ei[1]
    E = src.shape[0]
    mask = np.zeros((num_nodes, num_nodes), np.float32)
    mask[dst, src] = 1.0
    mask[np.arange(num_nodes), np.arange(num_nodes)] = 1.0      # self loops
    mask_bias = np.where(mask > 0, 0.0, -1e30).astype(np.float32)
    g_src = np.zeros((e_pad, num_nodes), np.float32)
    g_src[np.arange(E), src] = 1.0
    g_dst = np.zeros((e_pad, num_nodes), np.float32)
    g_dst[np.arange(E), dst] = 1.0
    return (jnp.asarray(mask_bias, jnp.bfloat16),
            jnp.asarray(g_src, jnp.bfloat16),
            jnp.asarray(g_dst, jnp.bfloat16))


# -------------------------------- forward pass -------------------------------- #

def graph_policy_forward(params, x, edge_attr, mask_bias, g_src, g_dst):
    """x: [B,N,F_node] f32; edge_attr: [B,E,F_edge] f32;
    mask_bias: [B,N,N] bf16, g_src/g_dst: [B,E_pad,N] bf16 (precomputed per topology)."""
    B, N, nf = x.shape
    E = edge_attr.shape[1]
    e_pad = g_src.shape[1]

    # cheap per-call padding / casting (pads only, no scatters)
    x_p = jnp.pad(x, ((0, 0), (0, 0), (0, NF_PAD - nf))).astype(jnp.bfloat16)
    ea_p = jnp.pad(edge_attr,
                   ((0, 0), (0, e_pad - E), (0, EF_PAD - edge_attr.shape[2]))
                   ).astype(jnp.bfloat16)

    data = (x_p, ea_p, mask_bias, g_src, g_dst)
    weights = (params['ne_w'], params['ne_b'], params['ln_g'], params['ln_b'],
               params['gat1_w'], params['gat1_asrc'], params['gat1_adst'], params['gat1_b'],
               params['gat2_w'], params['gat2_asrc'], params['gat2_adst'], params['gat2_b'],
               params['gat3_w'], params['gat3_asrc'], params['gat3_adst'], params['gat3_b'],
               params['ee_w'], params['ee_b'],
               params['s1_src'], params['s1_dst'], params['s1_edge'], params['s1_b'],
               params['s2_w'], params['s2_b'], params['s3_wt'], params['s3_b'])

    # per-graph data: leading (graph) axis squeezed, one graph per grid step
    data_specs = [pl.BlockSpec((None,) + a.shape[1:], lambda b: (b, 0, 0)) for a in data]

    # weights: constant block index -> DMA'd once, VMEM-resident across all grid steps
    def const_spec(a):
        nd = a.ndim
        return pl.BlockSpec(a.shape, lambda b, _n=nd: (0,) * _n)
    weight_specs = [const_spec(w) for w in weights]

    out = pl.pallas_call(
        fused_gnn_kernel,
        out_shape=jax.ShapeDtypeStruct((B, 1, e_pad), jnp.float32),
        grid=(B,),
        in_specs=data_specs + weight_specs,
        out_specs=pl.BlockSpec((None, 1, e_pad), lambda b: (b, 0, 0)),
        compiler_params=pltpu.CompilerParams(dimension_semantics=("parallel",)),
    )(*data, *weights)
    return out[:, 0, :E]                              # [B, E], per-graph edge scores


# ----------------------------------- main -------------------------------------- #

if __name__ == "__main__":
    key = jax.random.PRNGKey(0)
    N, node_features, edge_features = 16, 6, 4
    B = 8                                             # graphs per call (amortizes weight DMA)

    # Deterministic topology: ring + skip-2 edges (32 directed edges, no self loops).
    src_np = np.concatenate([np.arange(N), np.arange(N)])
    dst_np = np.concatenate([(np.arange(N) + 1) % N, (np.arange(N) + 2) % N])
    edge_index = np.stack([src_np, dst_np]).astype(np.int32)   # [2, E]
    E = edge_index.shape[1]
    e_pad = edge_bucket(E)                            # fixed 128-bucket

    # topology-dependent glue built once and reused every call
    mb, gs, gd = build_topology(edge_index, N, e_pad)
    mask_bias = jnp.tile(mb[None], (B, 1, 1))
    g_src = jnp.tile(gs[None], (B, 1, 1))
    g_dst = jnp.tile(gd[None], (B, 1, 1))

    k_x, k_e, k_p = jax.random.split(key, 3)
    x = jax.random.normal(k_x, (B, N, node_features), jnp.float32)
    edge_attr = jax.random.normal(k_e, (B, E, edge_features), jnp.float32)

    params = init_params(k_p)

    fwd = jax.jit(graph_policy_forward)
    scores = jax.block_until_ready(fwd(params, x, edge_attr, mask_bias, g_src, g_dst))
    assert scores.shape == (B, E) and scores.dtype == jnp.float32
    assert bool(jnp.all(jnp.isfinite(scores)))
    print("KERNEL_OK")
</pallas_src>

<mosaic_0001>
module attributes {stable_mosaic.version = 11 : i64} {
  func.func @fused_gnn_kernel(%arg0: i32, %arg1: memref<1x16x8xbf16, #tpu.memory_space<vmem>>, %arg2: memref<1x128x8xbf16, #tpu.memory_space<vmem>>, %arg3: memref<1x16x16xbf16, #tpu.memory_space<vmem>>, %arg4: memref<1x128x16xbf16, #tpu.memory_space<vmem>>, %arg5: memref<1x128x16xbf16, #tpu.memory_space<vmem>>, %arg6: memref<8x128xbf16, #tpu.memory_space<vmem>>, %arg7: memref<1x128xf32, #tpu.memory_space<vmem>>, %arg8: memref<1x128xf32, #tpu.memory_space<vmem>>, %arg9: memref<1x128xf32, #tpu.memory_space<vmem>>, %arg10: memref<128x512xbf16, #tpu.memory_space<vmem>>, %arg11: memref<4x512xbf16, #tpu.memory_space<vmem>>, %arg12: memref<4x512xbf16, #tpu.memory_space<vmem>>, %arg13: memref<1x128xf32, #tpu.memory_space<vmem>>, %arg14: memref<128x512xbf16, #tpu.memory_space<vmem>>, %arg15: memref<4x512xbf16, #tpu.memory_space<vmem>>, %arg16: memref<4x512xbf16, #tpu.memory_space<vmem>>, %arg17: memref<1x128xf32, #tpu.memory_space<vmem>>, %arg18: memref<128x256xbf16, #tpu.memory_space<vmem>>, %arg19: memref<2x256xbf16, #tpu.memory_space<vmem>>, %arg20: memref<2x256xbf16, #tpu.memory_space<vmem>>, %arg21: memref<1x128xf32, #tpu.memory_space<vmem>>, %arg22: memref<8x64xbf16, #tpu.memory_space<vmem>>, %arg23: memref<1x64xf32, #tpu.memory_space<vmem>>, %arg24: memref<128x256xbf16, #tpu.memory_space<vmem>>, %arg25: memref<128x256xbf16, #tpu.memory_space<vmem>>, %arg26: memref<64x256xbf16, #tpu.memory_space<vmem>>, %arg27: memref<1x256xf32, #tpu.memory_space<vmem>>, %arg28: memref<256x128xbf16, #tpu.memory_space<vmem>>, %arg29: memref<1x128xf32, #tpu.memory_space<vmem>>, %arg30: memref<1x128xf32, #tpu.memory_space<vmem>>, %arg31: memref<1x1xf32, #tpu.memory_space<vmem>>, %arg32: memref<1x1x128xf32, #tpu.memory_space<vmem>>) attributes {dimension_semantics = [#tpu.dimension_semantics<parallel>], iteration_bounds = array<i64: 8>, scalar_prefetch = 0 : i64, scratch_operands = 0 : i64, tpu.core_type = #tpu.core_type<tc>, window_params = [{transform_indices = @transform_0, window_bounds = array<i64: 1, 16, 8>}, {transform_indices = @transform_1, window_bounds = array<i64: 1, 128, 8>}, {transform_indices = @transform_2, window_bounds = array<i64: 1, 16, 16>}, {transform_indices = @transform_3, window_bounds = array<i64: 1, 128, 16>}, {transform_indices = @transform_4, window_bounds = array<i64: 1, 128, 16>}, {pipeline_mode = #tpu.pipeline_mode<synchronous>, transform_indices = @transform_5, window_bounds = array<i64: 8, 128>}, {pipeline_mode = #tpu.pipeline_mode<synchronous>, transform_indices = @transform_6, window_bounds = array<i64: 1, 128>}, {pipeline_mode = #tpu.pipeline_mode<synchronous>, transform_indices = @transform_7, window_bounds = array<i64: 1, 128>}, {pipeline_mode = #tpu.pipeline_mode<synchronous>, transform_indices = @transform_8, window_bounds = array<i64: 1, 128>}, {pipeline_mode = #tpu.pipeline_mode<synchronous>, transform_indices = @transform_9, window_bounds = array<i64: 128, 512>}, {pipeline_mode = #tpu.pipeline_mode<synchronous>, transform_indices = @transform_10, window_bounds = array<i64: 4, 512>}, {pipeline_mode = #tpu.pipeline_mode<synchronous>, transform_indices = @transform_11, window_bounds = array<i64: 4, 512>}, {pipeline_mode = #tpu.pipeline_mode<synchronous>, transform_indices = @transform_12, window_bounds = array<i64: 1, 128>}, {pipeline_mode = #tpu.pipeline_mode<synchronous>, transform_indices = @transform_13, window_bounds = array<i64: 128, 512>}, {pipeline_mode = #tpu.pipeline_mode<synchronous>, transform_indices = @transform_14, window_bounds = array<i64: 4, 512>}, {pipeline_mode = #tpu.pipeline_mode<synchronous>, transform_indices = @transform_15, window_bounds = array<i64: 4, 512>}, {pipeline_mode = #tpu.pipeline_mode<synchronous>, transform_indices = @transform_16, window_bounds = array<i64: 1, 128>}, {pipeline_mode = #tpu.pipeline_mode<synchronous>, transform_indices = @transform_17, window_bounds = array<i64: 128, 256>}, {pipeline_mode = #tpu.pipeline_mode<synchronous>, transform_indices = @transform_18, window_bounds = array<i64: 2, 256>}, {pipeline_mode = #tpu.pipeline_mode<synchronous>, transform_indices = @transform_19, window_bounds = array<i64: 2, 256>}, {pipeline_mode = #tpu.pipeline_mode<synchronous>, transform_indices = @transform_20, window_bounds = array<i64: 1, 128>}, {pipeline_mode = #tpu.pipeline_mode<synchronous>, transform_indices = @transform_21, window_bounds = array<i64: 8, 64>}, {pipeline_mode = #tpu.pipeline_mode<synchronous>, transform_indices = @transform_22, window_bounds = array<i64: 1, 64>}, {pipeline_mode = #tpu.pipeline_mode<synchronous>, transform_indices = @transform_23, window_bounds = array<i64: 128, 256>}, {pipeline_mode = #tpu.pipeline_mode<synchronous>, transform_indices = @transform_24, window_bounds = array<i64: 128, 256>}, {pipeline_mode = #tpu.pipeline_mode<synchronous>, transform_indices = @transform_25, window_bounds = array<i64: 64, 256>}, {pipeline_mode = #tpu.pipeline_mode<synchronous>, transform_indices = @transform_26, window_bounds = array<i64: 1, 256>}, {pipeline_mode = #tpu.pipeline_mode<synchronous>, transform_indices = @transform_27, window_bounds = array<i64: 256, 128>}, {pipeline_mode = #tpu.pipeline_mode<synchronous>, transform_indices = @transform_28, window_bounds = array<i64: 1, 128>}, {pipeline_mode = #tpu.pipeline_mode<synchronous>, transform_indices = @transform_29, window_bounds = array<i64: 1, 128>}, {pipeline_mode = #tpu.pipeline_mode<synchronous>, transform_indices = @transform_30, window_bounds = array<i64: 1, 1>}, {transform_indices = @transform_31, window_bounds = array<i64: 1, 1, 128>}]} {
    %c0 = arith.constant 0 : index
    %c0_0 = arith.constant 0 : index
    %c0_1 = arith.constant 0 : index
    %0 = vector.load %arg1[%c0, %c0_0, %c0_1] : memref<1x16x8xbf16, #tpu.memory_space<vmem>>, vector<1x16x8xbf16>
    %1 = vector.shape_cast %0 : vector<1x16x8xbf16> to vector<16x8xbf16>
    %c0_2 = arith.constant 0 : index
    %c0_3 = arith.constant 0 : index
    %2 = vector.load %arg6[%c0_2, %c0_3] : memref<8x128xbf16, #tpu.memory_space<vmem>>, vector<8x128xbf16>
    %cst = arith.constant dense<0.000000e+00> : vector<16x128xf32>
    %3 = tpu.matmul %1, %2, %cst {dimension_numbers = #tpu.dot_dimension_numbers<[1], [0], [0], [1], [0, 0, 1, 1], [], []>} : vector<16x8xbf16>, vector<8x128xbf16>, vector<16x128xf32> -> vector<16x128xf32>
    %c0_4 = arith.constant 0 : index
    %c0_5 = arith.constant 0 : index
    %4 = vector.load %arg7[%c0_4, %c0_5] : memref<1x128xf32, #tpu.memory_space<vmem>>, vector<1x128xf32>
    %5 = vector.broadcast %4 : vector<1x128xf32> to vector<16x128xf32>
    %6 = arith.addf %3, %5 : vector<16x128xf32>
    %cst_6 = arith.constant 0.000000e+00 : f32
    %7 = vector.broadcast %cst_6 : f32 to vector<16x128xf32>
    %8 = arith.maximumf %6, %7 : vector<16x128xf32>
    %cst_7 = arith.constant dense<0.000000e+00> : vector<16xf32>
    %9 = vector.multi_reduction <add>, %8, %cst_7 [1] : vector<16x128xf32> to vector<16xf32>
    %10 = vector.shape_cast %9 : vector<16xf32> to vector<16x1xf32>
    %cst_8 = arith.constant 1.280000e+02 : f32
    %11 = vector.broadcast %cst_8 : f32 to vector<16x1xf32>
    %12 = arith.divf %10, %11 : vector<16x1xf32>
    %13 = vector.broadcast %12 : vector<16x1xf32> to vector<16x128xf32>
    %14 = arith.subf %8, %13 : vector<16x128xf32>
    %15 = arith.mulf %14, %14 : vector<16x128xf32>
    %cst_9 = arith.constant dense<0.000000e+00> : vector<16xf32>
    %16 = vector.multi_reduction <add>, %15, %cst_9 [1] : vector<16x128xf32> to vector<16xf32>
    %17 = vector.shape_cast %16 : vector<16xf32> to vector<16x1xf32>
    %cst_10 = arith.constant 1.280000e+02 : f32
    %18 = vector.broadcast %cst_10 : f32 to vector<16x1xf32>
    %19 = arith.divf %17, %18 : vector<16x1xf32>
    %20 = vector.broadcast %12 : vector<16x1xf32> to vector<16x128xf32>
    %21 = arith.subf %8, %20 : vector<16x128xf32>
    %cst_11 = arith.constant 9.99999974E-6 : f32
    %22 = vector.broadcast %cst_11 : f32 to vector<16x1xf32>
    %23 = arith.addf %19, %22 : vector<16x1xf32>
    %24 = math.rsqrt %23 : vector<16x1xf32>
    %25 = vector.broadcast %24 : vector<16x1xf32> to vector<16x128xf32>
    %26 = arith.mulf %21, %25 : vector<16x128xf32>
    %c0_12 = arith.constant 0 : index
    %c0_13 = arith.constant 0 : index
    %27 = vector.load %arg8[%c0_12, %c0_13] : memref<1x128xf32, #tpu.memory_space<vmem>>, vector<1x128xf32>
    %28 = vector.broadcast %27 : vector<1x128xf32> to vector<16x128xf32>
    %29 = arith.mulf %26, %28 : vector<16x128xf32>
    %c0_14 = arith.constant 0 : index
    %c0_15 = arith.constant 0 : index
    %30 = vector.load %arg9[%c0_14, %c0_15] : memref<1x128xf32, #tpu.memory_space<vmem>>, vector<1x128xf32>
    %31 = vector.broadcast %30 : vector<1x128xf32> to vector<16x128xf32>
    %32 = arith.addf %29, %31 : vector<16x128xf32>
    %c0_16 = arith.constant 0 : index
    %c0_17 = arith.constant 0 : index
    %c0_18 = arith.constant 0 : index
    %33 = vector.load %arg3[%c0_16, %c0_17, %c0_18] : memref<1x16x16xbf16, #tpu.memory_space<vmem>>, vector<1x16x16xbf16>
    %34 = vector.shape_cast %33 : vector<1x16x16xbf16> to vector<16x16xbf16>
    %35 = arith.extf %34 : vector<16x16xbf16> to vector<16x16xf32>
    %36 = arith.truncf %32 : vector<16x128xf32> to vector<16x128xbf16>
    %c0_19 = arith.constant 0 : index
    %c0_20 = arith.constant 0 : index
    %37 = vector.load %arg10[%c0_19, %c0_20] : memref<128x512xbf16, #tpu.memory_space<vmem>>, vector<128x512xbf16>
    %cst_21 = arith.constant dense<0.000000e+00> : vector<16x512xf32>
    %38 = tpu.matmul %36, %37, %cst_21 {dimension_numbers = #tpu.dot_dimension_numbers<[1], [0], [0], [1], [0, 0, 1, 1], [], []>} : vector<16x128xbf16>, vector<128x512xbf16>, vector<16x512xf32> -> vector<16x512xf32>
    %39 = arith.truncf %38 : vector<16x512xf32> to vector<16x512xbf16>
    %c0_22 = arith.constant 0 : index
    %c0_23 = arith.constant 0 : index
    %40 = vector.load %arg11[%c0_22, %c0_23] : memref<4x512xbf16, #tpu.memory_space<vmem>>, vector<4x512xbf16>
    %cst_24 = arith.constant dense<0.000000e+00> : vector<4x16xf32>
    %41 = tpu.matmul %40, %39, %cst_24 {dimension_numbers = #tpu.dot_dimension_numbers<[1], [1], [0], [0], [0, 0, 1, 0], [], []>} : vector<4x512xbf16>, vector<16x512xbf16>, vector<4x16xf32> -> vector<4x16xf32>
    %c0_25 = arith.constant 0 : index
    %c0_26 = arith.constant 0 : index
    %42 = vector.load %arg12[%c0_25, %c0_26] : memref<4x512xbf16, #tpu.memory_space<vmem>>, vector<4x512xbf16>
    %cst_27 = arith.constant dense<0.000000e+00> : vector<4x16xf32>
    %43 = tpu.matmul %42, %39, %cst_27 {dimension_numbers = #tpu.dot_dimension_numbers<[1], [1], [0], [0], [0, 0, 1, 0], [], []>} : vector<4x512xbf16>, vector<16x512xbf16>, vector<4x16xf32> -> vector<4x16xf32>
    %44 = vector.shape_cast %43 : vector<4x16xf32> to vector<4x16x1xf32>
    %45 = vector.shape_cast %41 : vector<4x16xf32> to vector<4x1x16xf32>
    %46 = vector.broadcast %44 : vector<4x16x1xf32> to vector<4x16x16xf32>
    %47 = vector.broadcast %45 : vector<4x1x16xf32> to vector<4x16x16xf32>
    %48 = arith.addf %46, %47 : vector<4x16x16xf32>
    %cst_28 = arith.constant 0.000000e+00 : f32
    %49 = vector.broadcast %cst_28 : f32 to vector<4x16x16xf32>
    %50 = arith.cmpf ogt, %48, %49 : vector<4x16x16xf32>
    %cst_29 = arith.constant 2.000000e-01 : f32
    %51 = vector.broadcast %cst_29 : f32 to vector<4x16x16xf32>
    %52 = arith.mulf %51, %48 : vector<4x16x16xf32>
    %53 = arith.select %50, %48, %52 : vector<4x16x16xi1>, vector<4x16x16xf32>
    %54 = vector.shape_cast %35 : vector<16x16xf32> to vector<1x16x16xf32>
    %55 = vector.broadcast %54 : vector<1x16x16xf32> to vector<4x16x16xf32>
    %56 = arith.addf %53, %55 : vector<4x16x16xf32>
    %cst_30 = arith.constant dense<0xFF800000> : vector<4x16xf32>
    %57 = vector.multi_reduction <maximumf>, %56, %cst_30 [2] : vector<4x16x16xf32> to vector<4x16xf32>
    %58 = vector.shape_cast %57 : vector<4x16xf32> to vector<4x16x1xf32>
    %59 = vector.broadcast %58 : vector<4x16x1xf32> to vector<4x16x16xf32>
    %60 = arith.subf %56, %59 : vector<4x16x16xf32>
    %61 = math.exp %60 : vector<4x16x16xf32>
    %cst_31 = arith.constant dense<0.000000e+00> : vector<4x16xf32>
    %62 = vector.multi_reduction <add>, %61, %cst_31 [2] : vector<4x16x16xf32> to vector<4x16xf32>
    %63 = vector.shape_cast %62 : vector<4x16xf32> to vector<4x16x1xf32>
    %64 = vector.broadcast %63 : vector<4x16x1xf32> to vector<4x16x16xf32>
    %65 = arith.divf %61, %64 : vector<4x16x16xf32>
    %cst_32 = arith.constant 0.000000e+00 : f32
    %66 = vector.broadcast %cst_32 : f32 to vector<16x128xf32>
    %67 = vector.extract_strided_slice %65 {offsets = [0, 0, 0], sizes = [1, 16, 16], strides = [1, 1, 1]} : vector<4x16x16xf32> to vector<1x16x16xf32>
    %68 = vector.shape_cast %67 : vector<1x16x16xf32> to vector<16x16xf32>
    %69 = vector.extract_strided_slice %38 {offsets = [0, 0], sizes = [16, 128], strides = [1, 1]} : vector<16x512xf32> to vector<16x128xf32>
    %cst_33 = arith.constant dense<0.000000e+00> : vector<16x128xf32>
    %70 = tpu.matmul %68, %69, %cst_33 {dimension_numbers = #tpu.dot_dimension_numbers<[1], [0], [0], [1], [0, 0, 1, 1], [], []>} : vector<16x16xf32>, vector<16x128xf32>, vector<16x128xf32> -> vector<16x128xf32>
    %71 = arith.addf %66, %70 : vector<16x128xf32>
    %72 = vector.extract_strided_slice %65 {offsets = [1, 0, 0], sizes = [1, 16, 16], strides = [1, 1, 1]} : vector<4x16x16xf32> to vector<1x16x16xf32>
    %73 = vector.shape_cast %72 : vector<1x16x16xf32> to vector<16x16xf32>
    %74 = vector.extract_strided_slice %38 {offsets = [0, 128], sizes = [16, 128], strides = [1, 1]} : vector<16x512xf32> to vector<16x128xf32>
    %cst_34 = arith.constant dense<0.000000e+00> : vector<16x128xf32>
    %75 = tpu.matmul %73, %74, %cst_34 {dimension_numbers = #tpu.dot_dimension_numbers<[1], [0], [0], [1], [0, 0, 1, 1], [], []>} : vector<16x16xf32>, vector<16x128xf32>, vector<16x128xf32> -> vector<16x128xf32>
    %76 = arith.addf %71, %75 : vector<16x128xf32>
    %77 = vector.extract_strided_slice %65 {offsets = [2, 0, 0], sizes = [1, 16, 16], strides = [1, 1, 1]} : vector<4x16x16xf32> to vector<1x16x16xf32>
    %78 = vector.shape_cast %77 : vector<1x16x16xf32> to vector<16x16xf32>
    %79 = vector.extract_strided_slice %38 {offsets = [0, 256], sizes = [16, 128], strides = [1, 1]} : vector<16x512xf32> to vector<16x128xf32>
    %cst_35 = arith.constant dense<0.000000e+00> : vector<16x128xf32>
    %80 = tpu.matmul %78, %79, %cst_35 {dimension_numbers = #tpu.dot_dimension_numbers<[1], [0], [0], [1], [0, 0, 1, 1], [], []>} : vector<16x16xf32>, vector<16x128xf32>, vector<16x128xf32> -> vector<16x128xf32>
    %81 = arith.addf %76, %80 : vector<16x128xf32>
    %82 = vector.extract_strided_slice %65 {offsets = [3, 0, 0], sizes = [1, 16, 16], strides = [1, 1, 1]} : vector<4x16x16xf32> to vector<1x16x16xf32>
    %83 = vector.shape_cast %82 : vector<1x16x16xf32> to vector<16x16xf32>
    %84 = vector.extract_strided_slice %38 {offsets = [0, 384], sizes = [16, 128], strides = [1, 1]} : vector<16x512xf32> to vector<16x128xf32>
    %cst_36 = arith.constant dense<0.000000e+00> : vector<16x128xf32>
    %85 = tpu.matmul %83, %84, %cst_36 {dimension_numbers = #tpu.dot_dimension_numbers<[1], [0], [0], [1], [0, 0, 1, 1], [], []>} : vector<16x16xf32>, vector<16x128xf32>, vector<16x128xf32> -> vector<16x128xf32>
    %86 = arith.addf %81, %85 : vector<16x128xf32>
    %cst_37 = arith.constant 2.500000e-01 : f32
    %87 = vector.broadcast %cst_37 : f32 to vector<16x128xf32>
    %88 = arith.mulf %86, %87 : vector<16x128xf32>
    %c0_38 = arith.constant 0 : index
    %c0_39 = arith.constant 0 : index
    %89 = vector.load %arg13[%c0_38, %c0_39] : memref<1x128xf32, #tpu.memory_space<vmem>>, vector<1x128xf32>
    %90 = vector.broadcast %89 : vector<1x128xf32> to vector<16x128xf32>
    %91 = arith.addf %88, %90 : vector<16x128xf32>
    %cst_40 = arith.constant 0.000000e+00 : f32
    %92 = vector.broadcast %cst_40 : f32 to vector<16x128xf32>
    %93 = arith.maximumf %91, %92 : vector<16x128xf32>
    %94 = arith.truncf %93 : vector<16x128xf32> to vector<16x128xbf16>
    %c0_41 = arith.constant 0 : index
    %c0_42 = arith.constant 0 : index
    %95 = vector.load %arg14[%c0_41, %c0_42] : memref<128x512xbf16, #tpu.memory_space<vmem>>, vector<128x512xbf16>
    %cst_43 = arith.constant dense<0.000000e+00> : vector<16x512xf32>
    %96 = tpu.matmul %94, %95, %cst_43 {dimension_numbers = #tpu.dot_dimension_numbers<[1], [0], [0], [1], [0, 0, 1, 1], [], []>} : vector<16x128xbf16>, vector<128x512xbf16>, vector<16x512xf32> -> vector<16x512xf32>
    %97 = arith.truncf %96 : vector<16x512xf32> to vector<16x512xbf16>
    %c0_44 = arith.constant 0 : index
    %c0_45 = arith.constant 0 : index
    %98 = vector.load %arg15[%c0_44, %c0_45] : memref<4x512xbf16, #tpu.memory_space<vmem>>, vector<4x512xbf16>
    %cst_46 = arith.constant dense<0.000000e+00> : vector<4x16xf32>
    %99 = tpu.matmul %98, %97, %cst_46 {dimension_numbers = #tpu.dot_dimension_numbers<[1], [1], [0], [0], [0, 0, 1, 0], [], []>} : vector<4x512xbf16>, vector<16x512xbf16>, vector<4x16xf32> -> vector<4x16xf32>
    %c0_47 = arith.constant 0 : index
    %c0_48 = arith.constant 0 : index
    %100 = vector.load %arg16[%c0_47, %c0_48] : memref<4x512xbf16, #tpu.memory_space<vmem>>, vector<4x512xbf16>
    %cst_49 = arith.constant dense<0.000000e+00> : vector<4x16xf32>
    %101 = tpu.matmul %100, %97, %cst_49 {dimension_numbers = #tpu.dot_dimension_numbers<[1], [1], [0], [0], [0, 0, 1, 0], [], []>} : vector<4x512xbf16>, vector<16x512xbf16>, vector<4x16xf32> -> vector<4x16xf32>
    %102 = vector.shape_cast %101 : vector<4x16xf32> to vector<4x16x1xf32>
    %103 = vector.shape_cast %99 : vector<4x16xf32> to vector<4x1x16xf32>
    %104 = vector.broadcast %102 : vector<4x16x1xf32> to vector<4x16x16xf32>
    %105 = vector.broadcast %103 : vector<4x1x16xf32> to vector<4x16x16xf32>
    %106 = arith.addf %104, %105 : vector<4x16x16xf32>
    %cst_50 = arith.constant 0.000000e+00 : f32
    %107 = vector.broadcast %cst_50 : f32 to vector<4x16x16xf32>
    %108 = arith.cmpf ogt, %106, %107 : vector<4x16x16xf32>
    %cst_51 = arith.constant 2.000000e-01 : f32
    %109 = vector.broadcast %cst_51 : f32 to vector<4x16x16xf32>
    %110 = arith.mulf %109, %106 : vector<4x16x16xf32>
    %111 = arith.select %108, %106, %110 : vector<4x16x16xi1>, vector<4x16x16xf32>
    %112 = vector.shape_cast %35 : vector<16x16xf32> to vector<1x16x16xf32>
    %113 = vector.broadcast %112 : vector<1x16x16xf32> to vector<4x16x16xf32>
    %114 = arith.addf %111, %113 : vector<4x16x16xf32>
    %cst_52 = arith.constant dense<0xFF800000> : vector<4x16xf32>
    %115 = vector.multi_reduction <maximumf>, %114, %cst_52 [2] : vector<4x16x16xf32> to vector<4x16xf32>
    %116 = vector.shape_cast %115 : vector<4x16xf32> to vector<4x16x1xf32>
    %117 = vector.broadcast %116 : vector<4x16x1xf32> to vector<4x16x16xf32>
    %118 = arith.subf %114, %117 : vector<4x16x16xf32>
    %119 = math.exp %118 : vector<4x16x16xf32>
    %cst_53 = arith.constant dense<0.000000e+00> : vector<4x16xf32>
    %120 = vector.multi_reduction <add>, %119, %cst_53 [2] : vector<4x16x16xf32> to vector<4x16xf32>
    %121 = vector.shape_cast %120 : vector<4x16xf32> to vector<4x16x1xf32>
    %122 = vector.broadcast %121 : vector<4x16x1xf32> to vector<4x16x16xf32>
    %123 = arith.divf %119, %122 : vector<4x16x16xf32>
    %cst_54 = arith.constant 0.000000e+00 : f32
    %124 = vector.broadcast %cst_54 : f32 to vector<16x128xf32>
    %125 = vector.extract_strided_slice %123 {offsets = [0, 0, 0], sizes = [1, 16, 16], strides = [1, 1, 1]} : vector<4x16x16xf32> to vector<1x16x16xf32>
    %126 = vector.shape_cast %125 : vector<1x16x16xf32> to vector<16x16xf32>
    %127 = vector.extract_strided_slice %96 {offsets = [0, 0], sizes = [16, 128], strides = [1, 1]} : vector<16x512xf32> to vector<16x128xf32>
    %cst_55 = arith.constant dense<0.000000e+00> : vector<16x128xf32>
    %128 = tpu.matmul %126, %127, %cst_55 {dimension_numbers = #tpu.dot_dimension_numbers<[1], [0], [0], [1], [0, 0, 1, 1], [], []>} : vector<16x16xf32>, vector<16x128xf32>, vector<16x128xf32> -> vector<16x128xf32>
    %129 = arith.addf %124, %128 : vector<16x128xf32>
    %130 = vector.extract_strided_slice %123 {offsets = [1, 0, 0], sizes = [1, 16, 16], strides = [1, 1, 1]} : vector<4x16x16xf32> to vector<1x16x16xf32>
    %131 = vector.shape_cast %130 : vector<1x16x16xf32> to vector<16x16xf32>
    %132 = vector.extract_strided_slice %96 {offsets = [0, 128], sizes = [16, 128], strides = [1, 1]} : vector<16x512xf32> to vector<16x128xf32>
    %cst_56 = arith.constant dense<0.000000e+00> : vector<16x128xf32>
    %133 = tpu.matmul %131, %132, %cst_56 {dimension_numbers = #tpu.dot_dimension_numbers<[1], [0], [0], [1], [0, 0, 1, 1], [], []>} : vector<16x16xf32>, vector<16x128xf32>, vector<16x128xf32> -> vector<16x128xf32>
    %134 = arith.addf %129, %133 : vector<16x128xf32>
    %135 = vector.extract_strided_slice %123 {offsets = [2, 0, 0], sizes = [1, 16, 16], strides = [1, 1, 1]} : vector<4x16x16xf32> to vector<1x16x16xf32>
    %136 = vector.shape_cast %135 : vector<1x16x16xf32> to vector<16x16xf32>
    %137 = vector.extract_strided_slice %96 {offsets = [0, 256], sizes = [16, 128], strides = [1, 1]} : vector<16x512xf32> to vector<16x128xf32>
    %cst_57 = arith.constant dense<0.000000e+00> : vector<16x128xf32>
    %138 = tpu.matmul %136, %137, %cst_57 {dimension_numbers = #tpu.dot_dimension_numbers<[1], [0], [0], [1], [0, 0, 1, 1], [], []>} : vector<16x16xf32>, vector<16x128xf32>, vector<16x128xf32> -> vector<16x128xf32>
    %139 = arith.addf %134, %138 : vector<16x128xf32>
    %140 = vector.extract_strided_slice %123 {offsets = [3, 0, 0], sizes = [1, 16, 16], strides = [1, 1, 1]} : vector<4x16x16xf32> to vector<1x16x16xf32>
    %141 = vector.shape_cast %140 : vector<1x16x16xf32> to vector<16x16xf32>
    %142 = vector.extract_strided_slice %96 {offsets = [0, 384], sizes = [16, 128], strides = [1, 1]} : vector<16x512xf32> to vector<16x128xf32>
    %cst_58 = arith.constant dense<0.000000e+00> : vector<16x128xf32>
    %143 = tpu.matmul %141, %142, %cst_58 {dimension_numbers = #tpu.dot_dimension_numbers<[1], [0], [0], [1], [0, 0, 1, 1], [], []>} : vector<16x16xf32>, vector<16x128xf32>, vector<16x128xf32> -> vector<16x128xf32>
    %144 = arith.addf %139, %143 : vector<16x128xf32>
    %cst_59 = arith.constant 2.500000e-01 : f32
    %145 = vector.broadcast %cst_59 : f32 to vector<16x128xf32>
    %146 = arith.mulf %144, %145 : vector<16x128xf32>
    %c0_60 = arith.constant 0 : index
    %c0_61 = arith.constant 0 : index
    %147 = vector.load %arg17[%c0_60, %c0_61] : memref<1x128xf32, #tpu.memory_space<vmem>>, vector<1x128xf32>
    %148 = vector.broadcast %147 : vector<1x128xf32> to vector<16x128xf32>
    %149 = arith.addf %146, %148 : vector<16x128xf32>
    %cst_62 = arith.constant 0.000000e+00 : f32
    %150 = vector.broadcast %cst_62 : f32 to vector<16x128xf32>
    %151 = arith.maximumf %149, %150 : vector<16x128xf32>
    %152 = arith.truncf %151 : vector<16x128xf32> to vector<16x128xbf16>
    %c0_63 = arith.constant 0 : index
    %c0_64 = arith.constant 0 : index
    %153 = vector.load %arg18[%c0_63, %c0_64] : memref<128x256xbf16, #tpu.memory_space<vmem>>, vector<128x256xbf16>
    %cst_65 = arith.constant dense<0.000000e+00> : vector<16x256xf32>
    %154 = tpu.matmul %152, %153, %cst_65 {dimension_numbers = #tpu.dot_dimension_numbers<[1], [0], [0], [1], [0, 0, 1, 1], [], []>} : vector<16x128xbf16>, vector<128x256xbf16>, vector<16x256xf32> -> vector<16x256xf32>
    %155 = arith.truncf %154 : vector<16x256xf32> to vector<16x256xbf16>
    %c0_66 = arith.constant 0 : index
    %c0_67 = arith.constant 0 : index
    %156 = vector.load %arg19[%c0_66, %c0_67] : memref<2x256xbf16, #tpu.memory_space<vmem>>, vector<2x256xbf16>
    %cst_68 = arith.constant dense<0.000000e+00> : vector<2x16xf32>
    %157 = tpu.matmul %156, %155, %cst_68 {dimension_numbers = #tpu.dot_dimension_numbers<[1], [1], [0], [0], [0, 0, 1, 0], [], []>} : vector<2x256xbf16>, vector<16x256xbf16>, vector<2x16xf32> -> vector<2x16xf32>
    %c0_69 = arith.constant 0 : index
    %c0_70 = arith.constant 0 : index
    %158 = vector.load %arg20[%c0_69, %c0_70] : memref<2x256xbf16, #tpu.memory_space<vmem>>, vector<2x256xbf16>
    %cst_71 = arith.constant dense<0.000000e+00> : vector<2x16xf32>
    %159 = tpu.matmul %158, %155, %cst_71 {dimension_numbers = #tpu.dot_dimension_numbers<[1], [1], [0], [0], [0, 0, 1, 0], [], []>} : vector<2x256xbf16>, vector<16x256xbf16>, vector<2x16xf32> -> vector<2x16xf32>
    %160 = vector.shape_cast %159 : vector<2x16xf32> to vector<2x16x1xf32>
    %161 = vector.shape_cast %157 : vector<2x16xf32> to vector<2x1x16xf32>
    %162 = vector.broadcast %160 : vector<2x16x1xf32> to vector<2x16x16xf32>
    %163 = vector.broadcast %161 : vector<2x1x16xf32> to vector<2x16x16xf32>
    %164 = arith.addf %162, %163 : vector<2x16x16xf32>
    %cst_72 = arith.constant 0.000000e+00 : f32
    %165 = vector.broadcast %cst_72 : f32 to vector<2x16x16xf32>
    %166 = arith.cmpf ogt, %164, %165 : vector<2x16x16xf32>
    %cst_73 = arith.constant 2.000000e-01 : f32
    %167 = vector.broadcast %cst_73 : f32 to vector<2x16x16xf32>
    %168 = arith.mulf %167, %164 : vector<2x16x16xf32>
    %169 = arith.select %166, %164, %168 : vector<2x16x16xi1>, vector<2x16x16xf32>
    %170 = vector.shape_cast %35 : vector<16x16xf32> to vector<1x16x16xf32>
    %171 = vector.broadcast %170 : vector<1x16x16xf32> to vector<2x16x16xf32>
    %172 = arith.addf %169, %171 : vector<2x16x16xf32>
    %cst_74 = arith.constant dense<0xFF800000> : vector<2x16xf32>
    %173 = vector.multi_reduction <maximumf>, %172, %cst_74 [2] : vector<2x16x16xf32> to vector<2x16xf32>
    %174 = vector.shape_cast %173 : vector<2x16xf32> to vector<2x16x1xf32>
    %175 = vector.broadcast %174 : vector<2x16x1xf32> to vector<2x16x16xf32>
    %176 = arith.subf %172, %175 : vector<2x16x16xf32>
    %177 = math.exp %176 : vector<2x16x16xf32>
    %cst_75 = arith.constant dense<0.000000e+00> : vector<2x16xf32>
    %178 = vector.multi_reduction <add>, %177, %cst_75 [2] : vector<2x16x16xf32> to vector<2x16xf32>
    %179 = vector.shape_cast %178 : vector<2x16xf32> to vector<2x16x1xf32>
    %180 = vector.broadcast %179 : vector<2x16x1xf32> to vector<2x16x16xf32>
    %181 = arith.divf %177, %180 : vector<2x16x16xf32>
    %cst_76 = arith.constant 0.000000e+00 : f32
    %182 = vector.broadcast %cst_76 : f32 to vector<16x128xf32>
    %183 = vector.extract_strided_slice %181 {offsets = [0, 0, 0], sizes = [1, 16, 16], strides = [1, 1, 1]} : vector<2x16x16xf32> to vector<1x16x16xf32>
    %184 = vector.shape_cast %183 : vector<1x16x16xf32> to vector<16x16xf32>
    %185 = vector.extract_strided_slice %154 {offsets = [0, 0], sizes = [16, 128], strides = [1, 1]} : vector<16x256xf32> to vector<16x128xf32>
    %cst_77 = arith.constant dense<0.000000e+00> : vector<16x128xf32>
    %186 = tpu.matmul %184, %185, %cst_77 {dimension_numbers = #tpu.dot_dimension_numbers<[1], [0], [0], [1], [0, 0, 1, 1], [], []>} : vector<16x16xf32>, vector<16x128xf32>, vector<16x128xf32> -> vector<16x128xf32>
    %187 = arith.addf %182, %186 : vector<16x128xf32>
    %188 = vector.extract_strided_slice %181 {offsets = [1, 0, 0], sizes = [1, 16, 16], strides = [1, 1, 1]} : vector<2x16x16xf32> to vector<1x16x16xf32>
    %189 = vector.shape_cast %188 : vector<1x16x16xf32> to vector<16x16xf32>
    %190 = vector.extract_strided_slice %154 {offsets = [0, 128], sizes = [16, 128], strides = [1, 1]} : vector<16x256xf32> to vector<16x128xf32>
    %cst_78 = arith.constant dense<0.000000e+00> : vector<16x128xf32>
    %191 = tpu.matmul %189, %190, %cst_78 {dimension_numbers = #tpu.dot_dimension_numbers<[1], [0], [0], [1], [0, 0, 1, 1], [], []>} : vector<16x16xf32>, vector<16x128xf32>, vector<16x128xf32> -> vector<16x128xf32>
    %192 = arith.addf %187, %191 : vector<16x128xf32>
    %cst_79 = arith.constant 5.000000e-01 : f32
    %193 = vector.broadcast %cst_79 : f32 to vector<16x128xf32>
    %194 = arith.mulf %192, %193 : vector<16x128xf32>
    %c0_80 = arith.constant 0 : index
    %c0_81 = arith.constant 0 : index
    %195 = vector.load %arg21[%c0_80, %c0_81] : memref<1x128xf32, #tpu.memory_space<vmem>>, vector<1x128xf32>
    %196 = vector.broadcast %195 : vector<1x128xf32> to vector<16x128xf32>
    %197 = arith.addf %194, %196 : vector<16x128xf32>
    %c0_82 = arith.constant 0 : index
    %c0_83 = arith.constant 0 : index
    %c0_84 = arith.constant 0 : index
    %198 = vector.load %arg2[%c0_82, %c0_83, %c0_84] : memref<1x128x8xbf16, #tpu.memory_space<vmem>>, vector<1x128x8xbf16>
    %199 = vector.shape_cast %198 : vector<1x128x8xbf16> to vector<128x8xbf16>
    %c0_85 = arith.constant 0 : index
    %c0_86 = arith.constant 0 : index
    %200 = vector.load %arg22[%c0_85, %c0_86] : memref<8x64xbf16, #tpu.memory_space<vmem>>, vector<8x64xbf16>
    %cst_87 = arith.constant dense<0.000000e+00> : vector<128x64xf32>
    %201 = tpu.matmul %199, %200, %cst_87 {dimension_numbers = #tpu.dot_dimension_numbers<[1], [0], [0], [1], [0, 0, 1, 1], [], []>} : vector<128x8xbf16>, vector<8x64xbf16>, vector<128x64xf32> -> vector<128x64xf32>
    %c0_88 = arith.constant 0 : index
    %c0_89 = arith.constant 0 : index
    %202 = vector.load %arg23[%c0_88, %c0_89] : memref<1x64xf32, #tpu.memory_space<vmem>>, vector<1x64xf32>
    %203 = vector.broadcast %202 : vector<1x64xf32> to vector<128x64xf32>
    %204 = arith.addf %201, %203 : vector<128x64xf32>
    %cst_90 = arith.constant 0.000000e+00 : f32
    %205 = vector.broadcast %cst_90 : f32 to vector<128x64xf32>
    %206 = arith.maximumf %204, %205 : vector<128x64xf32>
    %207 = arith.truncf %197 : vector<16x128xf32> to vector<16x128xbf16>
    %c0_91 = arith.constant 0 : index
    %c0_92 = arith.constant 0 : index
    %208 = vector.load %arg24[%c0_91, %c0_92] : memref<128x256xbf16, #tpu.memory_space<vmem>>, vector<128x256xbf16>
    %cst_93 = arith.constant dense<0.000000e+00> : vector<16x256xf32>
    %209 = tpu.matmul %207, %208, %cst_93 {dimension_numbers = #tpu.dot_dimension_numbers<[1], [0], [0], [1], [0, 0, 1, 1], [], []>} : vector<16x128xbf16>, vector<128x256xbf16>, vector<16x256xf32> -> vector<16x256xf32>
    %210 = arith.truncf %209 : vector<16x256xf32> to vector<16x256xbf16>
    %c0_94 = arith.constant 0 : index
    %c0_95 = arith.constant 0 : index
    %211 = vector.load %arg25[%c0_94, %c0_95] : memref<128x256xbf16, #tpu.memory_space<vmem>>, vector<128x256xbf16>
    %cst_96 = arith.constant dense<0.000000e+00> : vector<16x256xf32>
    %212 = tpu.matmul %207, %211, %cst_96 {dimension_numbers = #tpu.dot_dimension_numbers<[1], [0], [0], [1], [0, 0, 1, 1], [], []>} : vector<16x128xbf16>, vector<128x256xbf16>, vector<16x256xf32> -> vector<16x256xf32>
    %213 = arith.truncf %212 : vector<16x256xf32> to vector<16x256xbf16>
    %c0_97 = arith.constant 0 : index
    %c0_98 = arith.constant 0 : index
    %c0_99 = arith.constant 0 : index
    %214 = vector.load %arg4[%c0_97, %c0_98, %c0_99] : memref<1x128x16xbf16, #tpu.memory_space<vmem>>, vector<1x128x16xbf16>
    %215 = vector.shape_cast %214 : vector<1x128x16xbf16> to vector<128x16xbf16>
    %cst_100 = arith.constant dense<0.000000e+00> : vector<128x256xf32>
    %216 = tpu.matmul %215, %210, %cst_100 {dimension_numbers = #tpu.dot_dimension_numbers<[1], [0], [0], [1], [0, 0, 1, 1], [], []>} : vector<128x16xbf16>, vector<16x256xbf16>, vector<128x256xf32> -> vector<128x256xf32>
    %c0_101 = arith.constant 0 : index
    %c0_102 = arith.constant 0 : index
    %c0_103 = arith.constant 0 : index
    %217 = vector.load %arg5[%c0_101, %c0_102, %c0_103] : memref<1x128x16xbf16, #tpu.memory_space<vmem>>, vector<1x128x16xbf16>
    %218 = vector.shape_cast %217 : vector<1x128x16xbf16> to vector<128x16xbf16>
    %cst_104 = arith.constant dense<0.000000e+00> : vector<128x256xf32>
    %219 = tpu.matmul %218, %213, %cst_104 {dimension_numbers = #tpu.dot_dimension_numbers<[1], [0], [0], [1], [0, 0, 1, 1], [], []>} : vector<128x16xbf16>, vector<16x256xbf16>, vector<128x256xf32> -> vector<128x256xf32>
    %220 = arith.addf %216, %219 : vector<128x256xf32>
    %221 = arith.truncf %206 : vector<128x64xf32> to vector<128x64xbf16>
    %c0_105 = arith.constant 0 : index
    %c0_106 = arith.constant 0 : index
    %222 = vector.load %arg26[%c0_105, %c0_106] : memref<64x256xbf16, #tpu.memory_space<vmem>>, vector<64x256xbf16>
    %cst_107 = arith.constant dense<0.000000e+00> : vector<128x256xf32>
    %223 = tpu.matmul %221, %222, %cst_107 {dimension_numbers = #tpu.dot_dimension_numbers<[1], [0], [0], [1], [0, 0, 1, 1], [], []>} : vector<128x64xbf16>, vector<64x256xbf16>, vector<128x256xf32> -> vector<128x256xf32>
    %224 = arith.addf %220, %223 : vector<128x256xf32>
    %c0_108 = arith.constant 0 : index
    %c0_109 = arith.constant 0 : index
    %225 = vector.load %arg27[%c0_108, %c0_109] : memref<1x256xf32, #tpu.memory_space<vmem>>, vector<1x256xf32>
    %226 = vector.broadcast %225 : vector<1x256xf32> to vector<128x256xf32>
    %227 = arith.addf %224, %226 : vector<128x256xf32>
    %cst_110 = arith.constant 0.000000e+00 : f32
    %228 = vector.broadcast %cst_110 : f32 to vector<128x256xf32>
    %229 = arith.maximumf %227, %228 : vector<128x256xf32>
    %230 = arith.truncf %229 : vector<128x256xf32> to vector<128x256xbf16>
    %c0_111 = arith.constant 0 : index
    %c0_112 = arith.constant 0 : index
    %231 = vector.load %arg28[%c0_111, %c0_112] : memref<256x128xbf16, #tpu.memory_space<vmem>>, vector<256x128xbf16>
    %cst_113 = arith.constant dense<0.000000e+00> : vector<128x128xf32>
    %232 = tpu.matmul %230, %231, %cst_113 {dimension_numbers = #tpu.dot_dimension_numbers<[1], [0], [0], [1], [0, 0, 1, 1], [], []>} : vector<128x256xbf16>, vector<256x128xbf16>, vector<128x128xf32> -> vector<128x128xf32>
    %c0_114 = arith.constant 0 : index
    %c0_115 = arith.constant 0 : index
    %233 = vector.load %arg29[%c0_114, %c0_115] : memref<1x128xf32, #tpu.memory_space<vmem>>, vector<1x128xf32>
    %234 = vector.broadcast %233 : vector<1x128xf32> to vector<128x128xf32>
    %235 = arith.addf %232, %234 : vector<128x128xf32>
    %cst_116 = arith.constant 0.000000e+00 : f32
    %236 = vector.broadcast %cst_116 : f32 to vector<128x128xf32>
    %237 = arith.maximumf %235, %236 : vector<128x128xf32>
    %c0_117 = arith.constant 0 : index
    %c0_118 = arith.constant 0 : index
    %238 = vector.load %arg30[%c0_117, %c0_118] : memref<1x128xf32, #tpu.memory_space<vmem>>, vector<1x128xf32>
    %cst_119 = arith.constant dense<0.000000e+00> : vector<1x128xf32>
    %239 = tpu.matmul %238, %237, %cst_119 {dimension_numbers = #tpu.dot_dimension_numbers<[1], [1], [0], [0], [0, 0, 1, 0], [], []>} : vector<1x128xf32>, vector<128x128xf32>, vector<1x128xf32> -> vector<1x128xf32>
    %c0_120 = arith.constant 0 : index
    %c0_121 = arith.constant 0 : index
    %240 = vector.load %arg31[%c0_120, %c0_121] : memref<1x1xf32, #tpu.memory_space<vmem>>, vector<1x1xf32>
    %241 = vector.broadcast %240 : vector<1x1xf32> to vector<1x128xf32>
    %242 = arith.addf %239, %241 : vector<1x128xf32>
    %c0_122 = arith.constant 0 : index
    %c0_123 = arith.constant 0 : index
    %c0_124 = arith.constant 0 : index
    %243 = vector.load %arg32[%c0_122, %c0_123, %c0_124] : memref<1x1x128xf32, #tpu.memory_space<vmem>>, vector<1x1x128xf32>
    %244 = vector.shape_cast %243 : vector<1x1x128xf32> to vector<1x128xf32>
    %245 = vector.shape_cast %242 : vector<1x128xf32> to vector<1x1x128xf32>
    tpu.vector_store %arg32[%c0_122, %c0_123, %c0_124], %245 {strides = array<i32>} : memref<1x1x128xf32, #tpu.memory_space<vmem>>, vector<1x1x128xf32>,
    return
  }
  func.func @transform_0(%arg0: i32) -> (i32, i32, i32) {
    %c0_i32 = arith.constant 0 : i32
    %c0_i32_0 = arith.constant 0 : i32
    %c0_i32_1 = arith.constant 0 : i32
    return %arg0, %c0_i32, %c0_i32_0 : i32, i32, i32
  }
  func.func @transform_1(%arg0: i32) -> (i32, i32, i32) {
    %c0_i32 = arith.constant 0 : i32
    %c0_i32_0 = arith.constant 0 : i32
    %c0_i32_1 = arith.constant 0 : i32
    return %arg0, %c0_i32, %c0_i32_0 : i32, i32, i32
  }
  func.func @transform_2(%arg0: i32) -> (i32, i32, i32) {
    %c0_i32 = arith.constant 0 : i32
    %c0_i32_0 = arith.constant 0 : i32
    %c0_i32_1 = arith.constant 0 : i32
    return %arg0, %c0_i32, %c0_i32_0 : i32, i32, i32
  }
  func.func @transform_3(%arg0: i32) -> (i32, i32, i32) {
    %c0_i32 = arith.constant 0 : i32
    %c0_i32_0 = arith.constant 0 : i32
    %c0_i32_1 = arith.constant 0 : i32
    return %arg0, %c0_i32, %c0_i32_0 : i32, i32, i32
  }
  func.func @transform_4(%arg0: i32) -> (i32, i32, i32) {
    %c0_i32 = arith.constant 0 : i32
    %c0_i32_0 = arith.constant 0 : i32
    %c0_i32_1 = arith.constant 0 : i32
    return %arg0, %c0_i32, %c0_i32_0 : i32, i32, i32
  }
  func.func @transform_5(%arg0: i32) -> (i32, i32) {
    %c0_i32 = arith.constant 0 : i32
    %c0_i32_0 = arith.constant 0 : i32
    %c0_i32_1 = arith.constant 0 : i32
    return %c0_i32, %c0_i32_0 : i32, i32
  }
  func.func @transform_6(%arg0: i32) -> (i32, i32) {
    %c0_i32 = arith.constant 0 : i32
    %c0_i32_0 = arith.constant 0 : i32
    %c0_i32_1 = arith.constant 0 : i32
    return %c0_i32, %c0_i32_0 : i32, i32
  }
  func.func @transform_7(%arg0: i32) -> (i32, i32) {
    %c0_i32 = arith.constant 0 : i32
    %c0_i32_0 = arith.constant 0 : i32
    %c0_i32_1 = arith.constant 0 : i32
    return %c0_i32, %c0_i32_0 : i32, i32
  }
  func.func @transform_8(%arg0: i32) -> (i32, i32) {
    %c0_i32 = arith.constant 0 : i32
    %c0_i32_0 = arith.constant 0 : i32
    %c0_i32_1 = arith.constant 0 : i32
    return %c0_i32, %c0_i32_0 : i32, i32
  }
  func.func @transform_9(%arg0: i32) -> (i32, i32) {
    %c0_i32 = arith.constant 0 : i32
    %c0_i32_0 = arith.constant 0 : i32
    %c0_i32_1 = arith.constant 0 : i32
    return %c0_i32, %c0_i32_0 : i32, i32
  }
  func.func @transform_10(%arg0: i32) -> (i32, i32) {
    %c0_i32 = arith.constant 0 : i32
    %c0_i32_0 = arith.constant 0 : i32
    %c0_i32_1 = arith.constant 0 : i32
    return %c0_i32, %c0_i32_0 : i32, i32
  }
  func.func @transform_11(%arg0: i32) -> (i32, i32) {
    %c0_i32 = arith.constant 0 : i32
    %c0_i32_0 = arith.constant 0 : i32
    %c0_i32_1 = arith.constant 0 : i32
    return %c0_i32, %c0_i32_0 : i32, i32
  }
  func.func @transform_12(%arg0: i32) -> (i32, i32) {
    %c0_i32 = arith.constant 0 : i32
    %c0_i32_0 = arith.constant 0 : i32
    %c0_i32_1 = arith.constant 0 : i32
    return %c0_i32, %c0_i32_0 : i32, i32
  }
  func.func @transform_13(%arg0: i32) -> (i32, i32) {
    %c0_i32 = arith.constant 0 : i32
    %c0_i32_0 = arith.constant 0 : i32
    %c0_i32_1 = arith.constant 0 : i32
    return %c0_i32, %c0_i32_0 : i32, i32
  }
  func.func @transform_14(%arg0: i32) -> (i32, i32) {
    %c0_i32 = arith.constant 0 : i32
    %c0_i32_0 = arith.constant 0 : i32
    %c0_i32_1 = arith.constant 0 : i32
    return %c0_i32, %c0_i32_0 : i32, i32
  }
  func.func @transform_15(%arg0: i32) -> (i32, i32) {
    %c0_i32 = arith.constant 0 : i32
    %c0_i32_0 = arith.constant 0 : i32
    %c0_i32_1 = arith.constant 0 : i32
    return %c0_i32, %c0_i32_0 : i32, i32
  }
  func.func @transform_16(%arg0: i32) -> (i32, i32) {
    %c0_i32 = arith.constant 0 : i32
    %c0_i32_0 = arith.constant 0 : i32
    %c0_i32_1 = arith.constant 0 : i32
    return %c0_i32, %c0_i32_0 : i32, i32
  }
  func.func @transform_17(%arg0: i32) -> (i32, i32) {
    %c0_i32 = arith.constant 0 : i32
    %c0_i32_0 = arith.constant 0 : i32
    %c0_i32_1 = arith.constant 0 : i32
    return %c0_i32, %c0_i32_0 : i32, i32
  }
  func.func @transform_18(%arg0: i32) -> (i32, i32) {
    %c0_i32 = arith.constant 0 : i32
    %c0_i32_0 = arith.constant 0 : i32
    %c0_i32_1 = arith.constant 0 : i32
    return %c0_i32, %c0_i32_0 : i32, i32
  }
  func.func @transform_19(%arg0: i32) -> (i32, i32) {
    %c0_i32 = arith.constant 0 : i32
    %c0_i32_0 = arith.constant 0 : i32
    %c0_i32_1 = arith.constant 0 : i32
    return %c0_i32, %c0_i32_0 : i32, i32
  }
  func.func @transform_20(%arg0: i32) -> (i32, i32) {
    %c0_i32 = arith.constant 0 : i32
    %c0_i32_0 = arith.constant 0 : i32
    %c0_i32_1 = arith.constant 0 : i32
    return %c0_i32, %c0_i32_0 : i32, i32
  }
  func.func @transform_21(%arg0: i32) -> (i32, i32) {
    %c0_i32 = arith.constant 0 : i32
    %c0_i32_0 = arith.constant 0 : i32
    %c0_i32_1 = arith.constant 0 : i32
    return %c0_i32, %c0_i32_0 : i32, i32
  }
  func.func @transform_22(%arg0: i32) -> (i32, i32) {
    %c0_i32 = arith.constant 0 : i32
    %c0_i32_0 = arith.constant 0 : i32
    %c0_i32_1 = arith.constant 0 : i32
    return %c0_i32, %c0_i32_0 : i32, i32
  }
  func.func @transform_23(%arg0: i32) -> (i32, i32) {
    %c0_i32 = arith.constant 0 : i32
    %c0_i32_0 = arith.constant 0 : i32
    %c0_i32_1 = arith.constant 0 : i32
    return %c0_i32, %c0_i32_0 : i32, i32
  }
  func.func @transform_24(%arg0: i32) -> (i32, i32) {
    %c0_i32 = arith.constant 0 : i32
    %c0_i32_0 = arith.constant 0 : i32
    %c0_i32_1 = arith.constant 0 : i32
    return %c0_i32, %c0_i32_0 : i32, i32
  }
  func.func @transform_25(%arg0: i32) -> (i32, i32) {
    %c0_i32 = arith.constant 0 : i32
    %c0_i32_0 = arith.constant 0 : i32
    %c0_i32_1 = arith.constant 0 : i32
    return %c0_i32, %c0_i32_0 : i32, i32
  }
  func.func @transform_26(%arg0: i32) -> (i32, i32) {
    %c0_i32 = arith.constant 0 : i32
    %c0_i32_0 = arith.constant 0 : i32
    %c0_i32_1 = arith.constant 0 : i32
    return %c0_i32, %c0_i32_0 : i32, i32
  }
  func.func @transform_27(%arg0: i32) -> (i32, i32) {
    %c0_i32 = arith.constant 0 : i32
    %c0_i32_0 = arith.constant 0 : i32
    %c0_i32_1 = arith.constant 0 : i32
    return %c0_i32, %c0_i32_0 : i32, i32
  }
  func.func @transform_28(%arg0: i32) -> (i32, i32) {
    %c0_i32 = arith.constant 0 : i32
    %c0_i32_0 = arith.constant 0 : i32
    %c0_i32_1 = arith.constant 0 : i32
    return %c0_i32, %c0_i32_0 : i32, i32
  }
  func.func @transform_29(%arg0: i32) -> (i32, i32) {
    %c0_i32 = arith.constant 0 : i32
    %c0_i32_0 = arith.constant 0 : i32
    %c0_i32_1 = arith.constant 0 : i32
    return %c0_i32, %c0_i32_0 : i32, i32
  }
  func.func @transform_30(%arg0: i32) -> (i32, i32) {
    %c0_i32 = arith.constant 0 : i32
    %c0_i32_0 = arith.constant 0 : i32
    %c0_i32_1 = arith.constant 0 : i32
    return %c0_i32, %c0_i32_0 : i32, i32
  }
  func.func @transform_31(%arg0: i32) -> (i32, i32, i32) {
    %c0_i32 = arith.constant 0 : i32
    %c0_i32_0 = arith.constant 0 : i32
    %c0_i32_1 = arith.constant 0 : i32
    return %arg0, %c0_i32, %c0_i32_0 : i32, i32, i32
  }
}

</mosaic_0001>

<bundles_post_ra>
// kernel: graph_policy_forward.1
= control target key start
LH: loop header
LB: loop body
LE: loop exit
PB: predicated region body
PF: predicated region fallthrough
CT: control target
= control target key end

     0   :  { %s6599_s6 = smov 1   ;;  %s6600_s10 = smov 2   ;;  %s7575_s0 = inlined_call_operand.smem [shape: u32[32], index: -1, kind: input, shape index: {}] }
   0x1   :  { %s6645_s5 = sld [smem:[%s7575_s0]]   ;;  %s6601_s14 = smov 3  }
   0x2   :  { %s6650_s9 = sld [smem:[%s7575_s0 + %s6599_s6]]   ;;  %s6602_s18 = smov 4  }
   0x3   :  { %s6655_s13 = sld [smem:[%s7575_s0 + %s6600_s10]]   ;;  %s6603_s22 = smov 5  }
   0x4   :  { %s6660_s17 = sld [smem:[%s7575_s0 + %s6601_s14]]   ;;  %s6604_s26 = smov 6  }
   0x5   :  { %s6665_s21 = sld [smem:[%s7575_s0 + %s6602_s18]]   ;;  %s6605_s30 = smov 7  }
   0x6   :  { %s6670_s25 = sld [smem:[%s7575_s0 + %s6603_s22]]   ;;  %s6606_s4 = smov 8  }
   0x7   :  { %7585 = sst [smem:[#allocation6_spill]] %s6645_s5  ;;  %s6607_s10 = smov 9  }
   0x8   :  { %s6675_s29 = sld [smem:[%s7575_s0 + %s6604_s26]]   ;;  %s6608_s15 = smov 10  }
   0x9   :  { %s6680_s3 = sld [smem:[%s7575_s0 + %s6605_s30]]   ;;  %s6609_s20 = smov 11  }
   0xa   :  { %s6685_s8 = sld [smem:[%s7575_s0 + %s6606_s4]]   ;;  %s6610_s26 = smov 12  }
   0xb   :  { %s6690_s14 = sld [smem:[%s7575_s0 + %s6607_s10]]   ;;  %s6611_s1 = smov 13  }
   0xc   :  { %7586 = sst [smem:[#allocation7_spill]] %s6670_s25  ;;  %s6612_s7 = smov 14  }
   0xd   :  { %s6695_s19 = sld [smem:[%s7575_s0 + %s6608_s15]]   ;;  %s6613_s15 = smov 15  }
   0xe   :  { %s6700_s24 = sld [smem:[%s7575_s0 + %s6609_s20]]   ;;  %s6614_s22 = smov 16  }
   0xf   :  { %7587 = sst [smem:[#allocation8_spill]] %s6680_s3  ;;  %s6615_s28 = smov 17  }
  0x10   :  { %s6705_s30 = sld [smem:[%s7575_s0 + %s6610_s26]]   ;;  %s6629_s16 = smov 31  }
  0x11   :  { %s6710_s6 = sld [smem:[%s7575_s0 + %s6611_s1]]  }
  0x12   :  { %s6715_s12 = sld [smem:[%s7575_s0 + %s6612_s7]]   ;;  %s6616_s7 = smov 18  }
  0x13   :  { %s6720_s20 = sld [smem:[%s7575_s0 + %s6613_s15]]   ;;  %s6617_s15 = smov 19  }
  0x14   :  { %s6725_s27 = sld [smem:[%s7575_s0 + %s6614_s22]]   ;;  %s6618_s22 = smov 20  }
  0x15   :  { %s6730_s4 = sld [smem:[%s7575_s0 + %s6615_s28]]   ;;  %s6619_s28 = smov 21  }
  0x17   :  { %7588 = sst [smem:[#allocation9_spill]] %s6710_s6 }
  0x18   :  { %7589 = sst [smem:[#allocation10_spill]] %s6715_s12 }
  0x19   :  { %7590 = sst [smem:[#allocation11_spill]] %s6720_s20 }
  0x1a   :  { %7591 = sst [smem:[#allocation12_spill]] %s6725_s27 }
  0x1b   :  { %7592 = sst [smem:[#allocation13_spill]] %s6730_s4 }
  0x1c   :  { %s6735_s12 = sld [smem:[%s7575_s0 + %s6616_s7]]   ;;  %s6620_s7 = smov 22  }
  0x1d   :  { %s6740_s20 = sld [smem:[%s7575_s0 + %s6617_s15]]   ;;  %s6621_s15 = smov 23  }
  0x1e   :  { %s6745_s27 = sld [smem:[%s7575_s0 + %s6618_s22]]   ;;  %s6622_s22 = smov 24  }
  0x1f   :  { %s6750_s4 = sld [smem:[%s7575_s0 + %s6619_s28]]   ;;  %s6623_s28 = smov 25  }
  0x22   :  { %7593 = sst [smem:[#allocation14_spill]] %s6735_s12 }
  0x23   :  { %7594 = sst [smem:[#allocation15_spill]] %s6740_s20 }
  0x24   :  { %7595 = sst [smem:[#allocation16_spill]] %s6745_s27 }
  0x25   :  { %7596 = sst [smem:[#allocation17_spill]] %s6750_s4 }
  0x26   :  { %s6755_s12 = sld [smem:[%s7575_s0 + %s6620_s7]]   ;;  %s6624_s7 = smov 26  }
  0x27   :  { %s6760_s20 = sld [smem:[%s7575_s0 + %s6621_s15]]   ;;  %s6625_s15 = smov 27  }
  0x28   :  { %s6765_s27 = sld [smem:[%s7575_s0 + %s6622_s22]]   ;;  %s6626_s22 = smov 28  }
  0x29   :  { %s6770_s4 = sld [smem:[%s7575_s0 + %s6623_s28]]   ;;  %s6627_s28 = smov 29  }
  0x2c   :  { %7597 = sst [smem:[#allocation18_spill]] %s6755_s12 }
  0x2d   :  { %7598 = sst [smem:[#allocation19_spill]] %s6760_s20 }
  0x2e   :  { %7599 = sst [smem:[#allocation20_spill]] %s6765_s27 }
  0x2f   :  { %7600 = sst [smem:[#allocation21_spill]] %s6770_s4 }
  0x30   :  { %s6775_s12 = sld [smem:[%s7575_s0 + %s6624_s7]]   ;;  %s6628_s7 = smov 30  }
  0x31   :  { %s6780_s20 = sld [smem:[%s7575_s0 + %s6625_s15]]  }
  0x32   :  { %s6785_s27 = sld [smem:[%s7575_s0 + %s6626_s22]]  }
  0x33   :  { %s6790_s4 = sld [smem:[%s7575_s0 + %s6627_s28]]  }
  0x36   :  { %7601 = sst [smem:[#allocation22_spill]] %s6775_s12 }
  0x37   :  { %7602 = sst [smem:[#allocation23_spill]] %s6780_s20 }
  0x38   :  { %s5476_s12 = sld [smem:[%s7575_s0 + %s6628_s7]]  }
  0x39   :  { %7603 = sst [smem:[#allocation24_spill]] %s6790_s4 }
  0x3a   :  { %s6798_s20 = sld [smem:[%s7575_s0 + %s6629_s16]]  }
  0x3e   :  { %v68_v0 = vstv %s5476_s12 }
  0x3f   :  { %69 = vst [vmem:[#allocation2] sm:$0x1] %v68_v0 }
  0x40   :  { %70 = vsyncpa [#allocation4], 0 }
  0x41   :  { %72 = vsyncpa [#allocation4 + $0x1], 0  ;;  %s6800_s22 = smov 0   ;;  %s6802_s23 = smov 0  }
  0x42   :  { %s6804_s26 = smov 0   ;;  %s6806_s28 = smov 0  }
  0x43 LB: > { %s7604_s6 = sld [smem:[#allocation9_spill]]  ;;  %s6821_s0 = sadd.s32 4294967295, %s6597_s28   ;;  %s6585_s22 = sphi %s6800_s22, %s7627_s22   ;;  %s6597_s28 = sphi %s6806_s28, %s7630_s28   ;;  %s6593_s26 = sphi %s6804_s26, %s7629_s26   ;;  %s6589_s23 = sphi %s6802_s23, %s7628_s23  }
  0x44   : > { %s5479_s12 = sadd.s32 4294967294, %s6597_s28   ;;  %s6825_s1 = sadd.s32 1, %s6597_s28  }
  0x45   : > { %s761_s2 = sadd.s32 1, %s6593_s26  ;;  %s758_s7 = ssub.s32 %s6597_s28, %s6825_s1 }
  0x46   : > { %p771_p0 = scmp.ne.s32.totalorder %s6593_s26, %s6589_s23  ;;  %p759_p1 = scmp.eq.s32.totalorder %s758_s7, 0 }
  0x47   : > { %p772_p2 = scmp.eq.s32.totalorder %s6821_s0, 7  ;;  %p777_p3 = scmp.ne.s32.totalorder %s6589_s23, %s6585_s22 }
  0x48   : > { %p778_p4 = scmp.eq.s32.totalorder %s5479_s12, 7  ;;  %p5482_p7 = scmp.ge.s32.totalorder %s6597_s28, 1 }
  0x49   : > { %s6836_s10 = scalar_select %p759_p1, %s6593_s26, %s761_s2  }
  0x4a   : > { %p6838_p5 = por %p772_p2, %p771_p0  ;;  %p6842_p6 = por %p778_p4, %p777_p3 }
  0x4b   : > { %7605 = sst [smem:[#allocation25_spill]] %s6836_s10  ;;  %p914_p8 = scmp.lt.s32.totalorder %s6597_s28, 9 }
  0x4d   : > { %p915_p9 = pnand %p5482_p7, %p914_p8 }
  0x4e   : > { %s7608_s25 = sld [smem:[#allocation7_spill]] (!%p915_p9)  ;;  %s7609_s5 = sld [smem:[#allocation6_spill]] (!%p915_p9)  ;;  %vm1058_vm0 = vcmask (!%p915_p9), 1043456   ;;  %v6630_v2 = vmov (!%p915_p9), 0.0   ;;  %vm6631_vm1 = vmmov (!%p915_p9), 0   ;;  %vm1054_vm2 = vcmask (!%p915_p9), 64512  }
  0x4f   : > { %918 = sbr.rel (%p915_p9) target bundleno = 5045 (0x13b5), region = 144  ;;  %p1013_p10 = scmp.lt.s32.totalorder (!%p915_p9), %s6821_s0, 7  ;;  %5861 = vmatprep.subr.bf16.mxu0 (!%p915_p9), %v6630_v2  ;;  %5863 = vmatprep.mubr.msk.bf16.mxu0 (!%p915_p9), %vm6631_vm1, %v6630_v2  ;;  %v5493_v5 = vld [vmem:[%s6675_s29] ss:$0 sm:$0xff] (!%p915_p9)  ;;  %v6227_v14 = vld [vmem:[%s6690_s14 + $0x4] ss:$16 sps:$4 sm:$0xff] (!%p915_p9)  }
  0x50   : > { %v6229_v15 = vld [vmem:[%s6690_s14 + $0x8] ss:$16 sps:$4 sm:$0xff] (!%p915_p9)   ;;  %v6231_v16 = vld [vmem:[%s6690_s14 + $0xc] ss:$16 sps:$4 sm:$0xff] (!%p915_p9)   ;;  %v6232_v17 = vld [vmem:[%s6690_s14] ss:$16 sps:$4 sm:$0xff] (!%p915_p9)   ;;  %1343 = vmatprep.subr.bf16.mxu1 (!%p915_p9), %v6227_v14 }
  0x51   : > { %v6233_v18 = vld [vmem:[%s6690_s14 + $0x24] ss:$16 sps:$4 sm:$0xff] (!%p915_p9)   ;;  %v6237_v19 = vld [vmem:[%s6690_s14 + $0x2c] ss:$16 sps:$4 sm:$0xff] (!%p915_p9)   ;;  %1344 = vmatpush1.bf16.msra.mxu1 (!%p915_p9), %v6232_v17  ;;  %v6235_v20 = vld [vmem:[%s6690_s14 + $0x28] ss:$16 sps:$4 sm:$0xff] (!%p915_p9)  }
  0x52   : > { %1345 = vmatprep.subr.bf16.mxu1 (!%p915_p9), %v6233_v18  ;;  %v6238_v29 = vld [vmem:[%s6690_s14 + $0x20] ss:$16 sps:$4 sm:$0xff] (!%p915_p9)   ;;  %v6239_v30 = vld [vmem:[%s6690_s14 + $0x44] ss:$16 sps:$4 sm:$0xff] (!%p915_p9)   ;;  %v6243_v31 = vld [vmem:[%s6690_s14 + $0x4c] ss:$16 sps:$4 sm:$0xff] (!%p915_p9)  }
  0x53   : > { %v6241_v32 = vld [vmem:[%s6690_s14 + $0x48] ss:$16 sps:$4 sm:$0xff] (!%p915_p9)   ;;  %v6244_v33 = vld [vmem:[%s6690_s14 + $0x40] ss:$16 sps:$4 sm:$0xff] (!%p915_p9)   ;;  %v6245_v34 = vld [vmem:[%s6690_s14 + $0x64] ss:$16 sps:$4 sm:$0xff] (!%p915_p9)  }
  0x54   : > { %v1041_v1 = vld [vmem:[%s7608_s25] sm:$0xf] (!%p915_p9)  ;;  %v6249_v35 = vld [vmem:[%s6690_s14 + $0x6c] ss:$16 sps:$4 sm:$0xff] (!%p915_p9)   ;;  %v6247_v36 = vld [vmem:[%s6690_s14 + $0x68] ss:$16 sps:$4 sm:$0xff] (!%p915_p9)  }
  0x55   : > { %v1060_v3 = vsel (!%p915_p9), %vm1058_vm0, %v1041_v1, 0  ;;  %1346 = vmatpush1.bf16.msra.mxu1 (!%p915_p9), %v6238_v29  ;;  %v6250_v37 = vld [vmem:[%s6690_s14 + $0x60] ss:$16 sps:$4 sm:$0xff] (!%p915_p9)   ;;  %v6251_v38 = vld [vmem:[%s6690_s14 + $0x84] ss:$16 sps:$4 sm:$0xff] (!%p915_p9)   ;;  %v6632_v48 = vmov (!%p915_p9), 0  }
  0x56   : > { %5862 = vmatpush3.bf16.msra.mxu0 %v1060_v3  ;;  %s6855_s15 = scalar_select %p1013_p10, %s6821_s0, 7  ;;  %1347 = vmatprep.subr.bf16.mxu1 %v6239_v30  ;;  %v6253_v39 = vld [vmem:[%s6690_s14 + $0x88] ss:$16 sps:$4 sm:$0xff]   ;;  %v6255_v40 = vld [vmem:[%s6690_s14 + $0x8c] ss:$16 sps:$4 sm:$0xff]   ;;  %vm1768_vm5 = vcmask 130048  }
  0x57   : > { %1386 = vmatprep.subr.bf16.mxu0 %v6231_v16  ;;  %v6256_v41 = vld [vmem:[%s6690_s14 + $0x80] ss:$16 sps:$4 sm:$0xff]   ;;  %v6257_v42 = vld [vmem:[%s6690_s14 + $0xa4] ss:$16 sps:$4 sm:$0xff]   ;;  %v6261_v43 = vld [vmem:[%s6690_s14 + $0xac] ss:$16 sps:$4 sm:$0xff]   ;;  %1375 = vmatprep.mubr.bf16.mxu1 %v6632_v48 }
  0x58   : > { %s5720_s18 = sshll.u32 %s6855_s15, 3  ;;  %s5721_s2 = sshll.u32 %s6855_s15, 6  ;;  %v6259_v44 = vld [vmem:[%s6690_s14 + $0xa8] ss:$16 sps:$4 sm:$0xff]   ;;  %v6262_v45 = vld [vmem:[%s6690_s14 + $0xa0] ss:$16 sps:$4 sm:$0xff]   ;;  %6225 = vset.pattern.permute.xlu0 %v6632_v48 }
  0x59   : > { %s1017_s12 = scalar_lea.vmem %s7609_s5, %s5720_s18  ;;  %s6864_s7 = scalar_lea.vmem %s6650_s9, %s5721_s2  ;;  %1348 = vmatpush1.bf16.msra.mxu1 %v6244_v33  ;;  %v6263_v46 = vld [vmem:[%s6690_s14 + $0xc4] ss:$16 sps:$4 sm:$0xff]   ;;  %v6267_v47 = vld [vmem:[%s6690_s14 + $0xcc] ss:$16 sps:$4 sm:$0xff]   ;;  %v6265_v49 = vld [vmem:[%s6690_s14 + $0xc8] ss:$16 sps:$4 sm:$0xff]  }
  0x5a   : > { %v6226_v4 = vld [vmem:[%s1017_s12] sm:$0xff]   ;;  %s6867_s25 = scalar_lea.vmem %s6660_s17, %s5721_s2  ;;  %s6870_s10 = scalar_lea.vmem %s6665_s21, %s5721_s2  ;;  %1349 = vmatprep.subr.bf16.mxu1 %v6245_v34  ;;  %v6273_v52 = vld [vmem:[%s6690_s14 + $0xec] ss:$16 sps:$4 sm:$0xff]   ;;  %v6271_v53 = vld [vmem:[%s6690_s14 + $0xe8] ss:$16 sps:$4 sm:$0xff]  }
  0x5b   : > { %5864 = vmatmul.mubr.msk.bf16.vlgmr.msra.gmra.mrb[0].mxu0 %vm1054_vm2, %v6226_v4  ;;  %v6268_v50 = vld [vmem:[%s6690_s14 + $0xc0] ss:$16 sps:$4 sm:$0xff]   ;;  %v6269_v51 = vld [vmem:[%s6690_s14 + $0xe4] ss:$16 sps:$4 sm:$0xff]   ;;  %s7610_s3 = sld [smem:[#allocation8_spill]]  ;;  %s1027_s12 = scalar_lea.vmem %s6655_s13, %s5720_s18 }
  0x5c   : > { %1387 = vmatpush1.bf16.msra.mxu0 %v6229_v15  ;;  %1418 = vmatprep.mubr.bf16.mxu0 %v6632_v48  ;;  %v6274_v54 = vld [vmem:[%s6690_s14 + $0xe0] ss:$16 sps:$4 sm:$0xff]   ;;  %s7611_s15 = sld [smem:[#allocation10_spill]]  ;;  %s7612_s18 = sld [smem:[#allocation11_spill]] }
  0x5d   : > { %1388 = vmatprep.subr.bf16.mxu0 %v6237_v19  ;;  %1350 = vmatpush1.bf16.msra.mxu1 %v6250_v37  ;;  %v5497_v4 = vld [vmem:[%s6685_s8] ss:$0 sm:$0xff]  ;;  %s7613_s2 = sld [smem:[#allocation13_spill]]  ;;  %s7625_s4 = sld [smem:[#allocation24_spill]] }
  0x5e   : > { %1351 = vmatprep.subr.bf16.mxu1 %v6251_v38  ;;  %v1433_v15 = vld [vmem:[%s6695_s19] sm:$0xff] }
  0x5f   : > { %v1536_v16 = vld [vmem:[%s6700_s24] sm:$0xff]  ;;  %v1435_v33 = vcombine.high %v1433_v15, %v1433_v15 }
  0x60   : > { %1389 = vmatpush1.bf16.msra.mxu0 %v6235_v20  ;;  %v1538_v34 = vcombine.high %v1536_v16, %v1536_v16 }
  0x61   : > { %1390 = vmatprep.subr.bf16.mxu0 %v6243_v31  ;;  %1352 = vmatpush1.bf16.msra.mxu1 %v6256_v41  ;;  %v5496_v63 = vld [vmem:[%s7610_s3] ss:$0 sm:$0xff] }
  0x62   : > { %1353 = vmatprep.subr.bf16.mxu1 %v6257_v42 }
  0x64   : > { %1391 = vmatpush1.bf16.msra.mxu0 %v6241_v32 }
  0x65   : > { %1392 = vmatprep.subr.bf16.mxu0 %v6249_v35  ;;  %1354 = vmatpush1.bf16.msra.mxu1 %v6262_v45 }
  0x66   : > { %1355 = vmatprep.subr.bf16.mxu1 %v6263_v46 }
  0x68   : > { %1393 = vmatpush1.bf16.msra.mxu0 %v6247_v36 }
  0x69   : > { %1394 = vmatprep.subr.bf16.mxu0 %v6255_v40  ;;  %1356 = vmatpush1.bf16.msra.mxu1 %v6268_v50 }
  0x6a   : > { %1357 = vmatprep.subr.bf16.mxu1 %v6269_v51 }
  0x6c   : > { %1395 = vmatpush1.bf16.msra.mxu0 %v6253_v39 }
  0x6d   : > { %1396 = vmatprep.subr.bf16.mxu0 %v6261_v43  ;;  %1358 = vmatpush1.bf16.msra.mxu1 %v6274_v54 }
  0x70   : > { %1397 = vmatpush1.bf16.msra.mxu0 %v6259_v44 }
  0x71   : > { %1398 = vmatprep.subr.bf16.mxu0 %v6267_v47 }
  0x74   : > { %1399 = vmatpush1.bf16.msra.mxu0 %v6265_v49 }
  0x75   : > { %1400 = vmatprep.subr.bf16.mxu0 %v6273_v52 }
  0x78   : > { %1401 = vmatpush1.bf16.msra.mxu0 %v6271_v53 }
 0x12e   : > { %v1096_v6 = vpop.f32.mrb[0].mxu0 }
 0x12f   : > { %v1097_v7 = vadd.f32 %v5493_v5, %v1096_v6  ;;  %v5865_v8 = vpop.f32.mrb[1].mxu0 }
 0x130   : > { %v1099_v9 = vpop.f32.mrb[2].mxu0 }
 0x131   : > { %v1103_v10 = vmax.f32 %v1097_v7, 0.0  ;;  %v1100_v11 = vadd.f32 %v5493_v5, %v1099_v9  ;;  %v5866_v12 = vpop.f32.mrb[3].mxu0  ;;  %v6633_v9 = vmov 1983009808  }
 0x133   : > { %1105 = vadd.xlane.f32.xlu0 %v1103_v10  ;;  %v1104_v13 = vmax.f32 %v1100_v11, 0.0  ;;  %v1439_v11 = vlaneseq }
 0x137   : > { %1107 = vadd.xlane.f32.xlu0 %v1104_v13 }
 0x1c0   : > { %v1106_v21 = vpop.xlane.xlu0 %1105 }
 0x1c1   : > { %v1110_v22 = vmul.f32 0.0078125, %v1106_v21 }
 0x1c3   : > { %v6880_v23 = vsub.f32 %v1103_v10, %v1110_v22  ;;  %v1437_v10 = vunpack.c.l.s4 %v6633_v9 }
 0x1c4   : > { %v1108_v24 = vpop.xlane.xlu0 %1107 }
 0x1c5   : > { %v1111_v25 = vmul.f32 0.0078125, %v1108_v24  ;;  %v1114_v26 = vmul.f32 %v6880_v23, %v6880_v23  ;;  %v1438_v12 = vunpack.c.0.s8 %v1437_v10 }
 0x1c7   : > { %v6884_v27 = vsub.f32 %v1104_v13, %v1111_v25  ;;  %1116 = vadd.xlane.f32.xlu1 %v1114_v26  ;;  %v6920_v13 = vshrl.u32 %v1439_v11, 7 }
 0x1c9   : > { %v1115_v28 = vmul.f32 %v6884_v27, %v6884_v27  ;;  %v6923_v14 = vsub.s32 %v1438_v12, %v6920_v13  ;;  %v6946_v39 = vsub.s32 1, %v6920_v13  ;;  %v6949_v42 = vsub.s32 0, %v6920_v13 }
 0x1ca   : > { %v1663_v45 = vsub.s32 2, %v6920_v13  ;;  %v1674_v54 = vsub.s32 3, %v6920_v13 }
 0x1cb   : > { %1118 = vadd.xlane.f32.xlu1 %v1115_v28  ;;  %v1442_v17 = vrot.slane %v1433_v15, %v6923_v14  ;;  %v1545_v18 = vrot.slane %v1536_v16, %v6923_v14  ;;  %v1449_v35 = vrot.slane %v1435_v33, %v6923_v14  ;;  %v1552_v36 = vrot.slane %v1538_v34, %v6923_v14 }
 0x1cd   : > { %v1450_v19 = vcombine.high %v1442_v17, %v1442_v17  ;;  %v1553_v20 = vcombine.high %v1545_v18, %v1545_v18  ;;  %v1451_v37 = vcombine.high %v1449_v35, %v1449_v35  ;;  %v1554_v38 = vcombine.high %v1552_v36, %v1552_v36 }
 0x254   : > { %v1117_v55 = vpop.xlane.xlu1 %1116 }
 0x255   : > { %v1120_v56 = vmul.f32 0.0078125, %v1117_v55 }
 0x257   : > { %v1122_v57 = vadd.f32 1e-05, %v1120_v56  ;;  %v6634_v56 = vmov 1966171168  }
 0x258   : > { %v1119_v58 = vpop.xlane.xlu1 %1118 }
 0x259   : > { %6451 = vrsqrt.f32 %v1122_v57  ;;  %v1121_v59 = vmul.f32 0.0078125, %v1119_v58  ;;  %v1685_v57 = vunpack.c.l.s4 %v6634_v56 }
 0x25b   : > { %v1123_v60 = vadd.f32 1e-05, %v1121_v59  ;;  %v1686_v58 = vunpack.c.0.s8 %v1685_v57 }
 0x25d   : > { %6453 = vrsqrt.f32 %v1123_v60  ;;  %v6960_v59 = vsub.s32 %v1686_v58, %v6920_v13 }
 0x263   : > { %v6452_v61 = vpop.eup %6451 }
 0x264   : > { %v1126_v62 = vmul.f32 %v6452_v61, %v6880_v23 }
 0x266   : > { %v1135_v3 = vmul.f32 %v5496_v63, %v1126_v62 }
 0x267   : > { %v6454_v0 = vpop.eup %6453 }
 0x268   : > { %v1127_v1 = vmul.f32 %v6454_v0, %v6884_v27  ;;  %v1144_v6 = vadd.f32 %v5497_v4, %v1135_v3  ;;  %v5726_v0 = vld [vmem:[%s1027_s12] sm:$0xff]   ;;  %s7614_s12 = sld [smem:[#allocation12_spill]] }
 0x269   : > { %v6971_v9 = vunpack.c.h.bf16 %v5726_v0 }
 0x26a   : > { %v1136_v5 = vmul.f32 %v5496_v63, %v1127_v1 }
 0x26c   : > { %v1145_v7 = vadd.f32 %v5497_v4, %v1136_v5 }
 0x26e   : > { %v1150_v8 = vpack.c.bf16 %v1145_v7, %v1144_v6  ;;  %v6969_v6 = vunpack.c.l.bf16 %v5726_v0 }
 0x270   : > { %1376 = vmatmul.mubr.bf16.vlgmr.msra.gmra.mrb[0].mxu1 %v1150_v8  ;;  %1419 = vmatmul.mubr.bf16.vlgmr.msra.gmra.mrb[4].mxu0 %v1150_v8 }
 0x271   : > { %1488 = vmatprep.mubr.bf16.mxu1 %v1450_v19  ;;  %1591 = vmatprep.mubr.bf16.mxu0 %v1553_v20 }
 0x343   : > { %v1377_v21 = vpop.f32.mrb[0].mxu1  ;;  %v1420_v22 = vpop.f32.mrb[4].mxu0 }
 0x344   : > { %v1379_v23 = vpop.f32.mrb[1].mxu1  ;;  %v1422_v24 = vpop.f32.mrb[5].mxu0 }
 0x345   : > { %v1381_v25 = vpop.f32.mrb[2].mxu1  ;;  %v1424_v26 = vpop.f32.mrb[6].mxu0 }
 0x346   : > { %v6929_v27 = vpack.c.bf16 %v1381_v25, %v1377_v21  ;;  %v6931_v28 = vpack.c.bf16 %v1424_v26, %v1420_v22  ;;  %v1383_v29 = vpop.f32.mrb[3].mxu1  ;;  %v1426_v30 = vpop.f32.mrb[7].mxu0 }
 0x347   : > { %v1430_v31 = vpack.c.bf16 %v1383_v29, %v1379_v23  ;;  %v6933_v32 = vpack.c.bf16 %v1426_v30, %v1422_v24 }
 0x349   : > { %1456 = vmatprep.subr.bf16.mxu1 %v1430_v31  ;;  %1559 = vmatprep.subr.bf16.mxu0 %v1430_v31 }
 0x34a   : > { %1457 = vmatpush1.bf16.xpose.msra.mxu1 %v6929_v27  ;;  %1560 = vmatpush1.bf16.xpose.msra.mxu0 %v6929_v27 }
 0x34b   : > { %1496 = vmatprep.subr.bf16.mxu1 %v6933_v32  ;;  %1599 = vmatprep.subr.bf16.mxu0 %v6933_v32 }
 0x351   : > { %1489 = vmatmul.mubr.bf16.vlgmr.msra.gmra.mrb[4].mxu1 %v1442_v17  ;;  %1592 = vmatmul.mubr.bf16.vlgmr.msra.gmra.mrb[8].mxu0 %v1545_v18 }
 0x352   : > { %1497 = vmatpush1.bf16.xpose.msra.mxu1 %v6931_v28  ;;  %1600 = vmatpush1.bf16.xpose.msra.mxu0 %v6931_v28 }
 0x353   : > { %5991 = vmatprep.subr.bf16.mxu1 %v1430_v31  ;;  %1528 = vmatprep.mubr.bf16.mxu1 %v1451_v37 }
 0x354   : > { %1631 = vmatprep.mubr.bf16.mxu0 %v1554_v38 }
 0x35d   : > { %1529 = vmatmul.mubr.bf16.vlgmr.msra.gmra.mrb[4].mxu1 %v1449_v35  ;;  %1632 = vmatmul.mubr.bf16.vlgmr.msra.gmra.mrb[8].mxu0 %v1552_v36 }
 0x35e   : > { %5993 = vmatpush3.bf16.msra.mxu1 %v1430_v31  ;;  %2423 = vmatprep.mubr.bf16.mxu0 %v6632_v48 }
 0x35f   : > { %5995 = vmatprep.subr.bf16.mxu1 %v6929_v27 }
 0x430   : > { %v1633_v40 = vpop.f32.mrb[8].mxu0  ;;  %v1530_v41 = vpop.f32.mrb[4].mxu1 }
 0x431   : > { %v1635_v43 = vpop.f32.mrb[9].mxu0  ;;  %v1653_v44 = vrot.slane %v1633_v40, %v6946_v39  ;;  %v1532_v46 = vpop.f32.mrb[5].mxu1  ;;  %v1664_v52 = vrot.slane %v1633_v40, %v1663_v45  ;;  %v1642_v53 = vrot.slane %v1633_v40, %v6949_v42  ;;  %v1675_v55 = vrot.slane %v1633_v40, %v1674_v54 }
 0x432   : > { %v1636_v47 = vpop.f32.mrb[10].mxu0  ;;  %v1533_v49 = vpop.f32.mrb[6].mxu1  ;;  %v1690_v60 = vrot.slane %v1530_v41, %v6960_v59 }
 0x433   : > { %1659 = vbcast.lane.b32.xlu1 %v1653_v44, 264  ;;  %1655 = vbcast.lane.b32.xlu0 %v1653_v44, 256  ;;  %v1637_v50 = vpop.f32.mrb[11].mxu0  ;;  %v1534_v51 = vpop.f32.mrb[7].mxu1 }
 0x434   : > { %v1691_v61 = vcombine.high %v1690_v60, %v1690_v60  ;;  %v1698_v62 = vrot.slane %v1690_v60, %v6960_v59 }
 0x436   : > { %v1705_v63 = vrot.slane %v1691_v61, %v6960_v59  ;;  %v1706_v1 = vcombine.high %v1698_v62, %v1698_v62  ;;  %v1711_v11 = vrot.slane %v1698_v62, %v6949_v42 }
 0x437   : > { %1666 = vbcast.lane.b32.xlu0 %v1664_v52, 256  ;;  %1644 = vbcast.lane.b32.xlu1 %v1642_v53, 256 }
 0x438   : > { %v1715_v3 = vrot.slane %v1705_v63, %v6949_v42  ;;  %v1719_v10 = vrot.slane %v1706_v1, %v6949_v42  ;;  %v1707_v12 = vcombine.high %v1705_v63, %v1705_v63 }
 0x43a   : > { %v1723_v26 = vrot.slane %v1707_v12, %v6949_v42 }
 0x43b   : > { %1677 = vbcast.lane.b32.xlu0 %v1675_v55, 256  ;;  %1648 = vbcast.lane.b32.xlu1 %v1642_v53, 264 }
 0x43f   : > { %1670 = vbcast.lane.b32.xlu1 %v1664_v52, 264 }
 0x443   : > { %1681 = vbcast.lane.b32.xlu1 %v1675_v55, 264 }
 0x4a5   : > { %v1660_v4 = vpop.permute.xlu1 %1659  ;;  %v1656_v5 = vpop.permute.xlu0 %1655 }
 0x4a6   : > { %v1731_v7 = vadd.f32 %v1715_v3, %v1660_v4  ;;  %v1730_v8 = vadd.f32 %v1715_v3, %v1656_v5 }
 0x4a8   : > { %vm1739_vm3 = vcmp.gt.f32.partialorder %v1731_v7, 0.0  ;;  %v1747_v15 = vmul.f32 0.2, %v1731_v7  ;;  %vm1738_vm4 = vcmp.gt.f32.partialorder %v1730_v8, 0.0  ;;  %v1746_v16 = vmul.f32 0.2, %v1730_v8 }
 0x4a9   : > { %v1667_v17 = vpop.permute.xlu0 %1666  ;;  %v1645_v18 = vpop.permute.xlu1 %1644 }
 0x4aa   : > { %v1732_v19 = vadd.f32 %v1719_v10, %v1667_v17  ;;  %v1728_v20 = vadd.f32 %v1711_v11, %v1645_v18  ;;  %v1755_v21 = vsel %vm1739_vm3, %v1731_v7, %v1747_v15  ;;  %v1754_v22 = vsel %vm1738_vm4, %v1730_v8, %v1746_v16 }
 0x4ab   : > { %v1763_v23 = vadd.f32 %v6971_v9, %v1755_v21  ;;  %v1762_v24 = vadd.f32 %v6969_v6, %v1754_v22 }
 0x4ac   : > { %vm1736_vm6 = vcmp.gt.f32.partialorder %v1728_v20, 0.0  ;;  %v1744_v25 = vmul.f32 0.2, %v1728_v20  ;;  %v1748_v34 = vmul.f32 0.2, %v1732_v19  ;;  %vm1740_vm7 = vcmp.gt.f32.partialorder %v1732_v19, 0.0 }
 0x4ad   : > { %v1678_v29 = vpop.permute.xlu0 %1677  ;;  %v1649_v30 = vpop.permute.xlu1 %1648  ;;  %v1778_v31 = vsel %vm1768_vm5, %v1763_v23, -inf  ;;  %v1775_v33 = vsel %vm1768_vm5, %v1762_v24, -inf }
 0x4ae   : > { %v1734_v35 = vadd.f32 %v1723_v26, %v1678_v29  ;;  %v1729_v36 = vadd.f32 %v1711_v11, %v1649_v30  ;;  %1779 = vmax.xlane.f32.xlu1 %v1778_v31  ;;  %1776 = vmax.xlane.f32.xlu0 %v1775_v33  ;;  %v1752_v37 = vsel %vm1736_vm6, %v1728_v20, %v1744_v25 }
 0x4af   : > { %v1760_v38 = vadd.f32 %v6969_v6, %v1752_v37  ;;  %v1756_v49 = vsel %vm1740_vm7, %v1732_v19, %v1748_v34 }
 0x4b0   : > { %vm1737_vm8 = vcmp.gt.f32.partialorder %v1729_v36, 0.0  ;;  %v1745_v40 = vmul.f32 0.2, %v1729_v36  ;;  %v1750_v44 = vmul.f32 0.2, %v1734_v35  ;;  %vm1742_vm9 = vcmp.gt.f32.partialorder %v1734_v35, 0.0 }
 0x4b1   : > { %v1671_v41 = vpop.permute.xlu1 %1670  ;;  %v1769_v43 = vsel %vm1768_vm5, %v1760_v38, -inf  ;;  %v1764_v55 = vadd.f32 %v6969_v6, %v1756_v49 }
 0x4b2   : > { %v1733_v46 = vadd.f32 %v1719_v10, %v1671_v41  ;;  %1770 = vmax.xlane.f32.xlu0 %v1769_v43  ;;  %v1753_v47 = vsel %vm1737_vm8, %v1729_v36, %v1745_v40  ;;  %v1758_v58 = vsel %vm1742_vm9, %v1734_v35, %v1750_v44 }
 0x4b3   : > { %v1761_v50 = vadd.f32 %v6971_v9, %v1753_v47  ;;  %v1781_v63 = vsel %vm1768_vm5, %v1764_v55, -inf  ;;  %v1766_v0 = vadd.f32 %v6969_v6, %v1758_v58  ;;  %v6277_v58 = vld [vmem:[%s7604_s6] ss:$16 sps:$4 sm:$0xff]  }
 0x4b4   : > { %vm1741_vm10 = vcmp.gt.f32.partialorder %v1733_v46, 0.0  ;;  %v1749_v51 = vmul.f32 0.2, %v1733_v46 }
 0x4b5   : > { %v1682_v52 = vpop.permute.xlu1 %1681  ;;  %v1772_v53 = vsel %vm1768_vm5, %v1761_v50, -inf  ;;  %v1787_v5 = vsel %vm1768_vm5, %v1766_v0, -inf }
 0x4b6   : > { %v1735_v56 = vadd.f32 %v1723_v26, %v1682_v52  ;;  %1773 = vmax.xlane.f32.xlu0 %v1772_v53  ;;  %v1757_v57 = vsel %vm1741_vm10, %v1733_v46, %v1749_v51 }
 0x4b7   : > { %v1765_v60 = vadd.f32 %v6971_v9, %v1757_v57 }
 0x4b8   : > { %vm1743_vm11 = vcmp.gt.f32.partialorder %v1735_v56, 0.0  ;;  %v1751_v61 = vmul.f32 0.2, %v1735_v56 }
 0x4b9   : > { %v1784_v62 = vsel %vm1768_vm5, %v1765_v60, -inf }
 0x4ba   : > { %1785 = vmax.xlane.f32.xlu1 %v1784_v62  ;;  %1782 = vmax.xlane.f32.xlu0 %v1781_v63  ;;  %v1759_v1 = vsel %vm1743_vm11, %v1735_v56, %v1751_v61  ;;  %v6285_v61 = vld [vmem:[%s7604_s6 + $0x24] ss:$16 sps:$4 sm:$0xff]   ;;  %v6283_v62 = vld [vmem:[%s7604_s6 + $0x20] ss:$16 sps:$4 sm:$0xff]  }
 0x4bb   : > { %v1767_v3 = vadd.f32 %v6971_v9, %v1759_v1  ;;  %v6291_v63 = vld [vmem:[%s7604_s6 + $0x44] ss:$16 sps:$4 sm:$0xff]  }
 0x4bc   : > { %v6297_v1 = vld [vmem:[%s7604_s6 + $0x64] ss:$16 sps:$4 sm:$0xff]  }
 0x4bd   : > { %v1790_v4 = vsel %vm1768_vm5, %v1767_v3, -inf }
 0x4be   : > { %1791 = vmax.xlane.f32.xlu1 %v1790_v4  ;;  %1788 = vmax.xlane.f32.xlu0 %v1787_v5  ;;  %v6303_v4 = vld [vmem:[%s7604_s6 + $0x84] ss:$16 sps:$4 sm:$0xff]   ;;  %v6301_v5 = vld [vmem:[%s7604_s6 + $0x80] ss:$16 sps:$4 sm:$0xff]  }
 0x53b   : > { %v1780_v7 = vpop.xlane.xlu1 %1779  ;;  %v1777_v8 = vpop.xlane.xlu0 %1776 }
 0x53c   : > { %v1796_v10 = vsub.f32 %v1763_v23, %v1780_v7  ;;  %v1795_v11 = vsub.f32 %v1762_v24, %v1777_v8  ;;  %v6309_v7 = vld [vmem:[%s7604_s6 + $0xa4] ss:$16 sps:$4 sm:$0xff]   ;;  %v6307_v8 = vld [vmem:[%s7604_s6 + $0xa0] ss:$16 sps:$4 sm:$0xff]  }
 0x53e   : > { %v1807_v12 = vmul.f32 1.442695, %v1796_v10  ;;  %v1805_v15 = vmul.f32 1.442695, %v1795_v11 }
 0x53f   : > { %v1771_v16 = vpop.xlane.xlu0 %1770 }
 0x540   : > { %6455 = vpow2.f32 %v1807_v12  ;;  %v1793_v17 = vsub.f32 %v1760_v38, %v1771_v16 }
 0x541   : > { %6457 = vpow2.f32 %v1805_v15 }
 0x542   : > { %v1801_v18 = vmul.f32 1.442695, %v1793_v17 }
 0x543   : > { %v1774_v19 = vpop.xlane.xlu0 %1773 }
 0x544   : > { %6459 = vpow2.f32 %v1801_v18  ;;  %v1794_v20 = vsub.f32 %v1761_v50, %v1774_v19 }
 0x546   : > { %v1803_v21 = vmul.f32 1.442695, %v1794_v20 }
 0x547   : > { %v1786_v22 = vpop.xlane.xlu1 %1785  ;;  %v1783_v25 = vpop.xlane.xlu0 %1782 }
 0x548   : > { %6461 = vpow2.f32 %v1803_v21  ;;  %v1798_v26 = vsub.f32 %v1765_v60, %v1786_v22  ;;  %v1797_v29 = vsub.f32 %v1764_v55, %v1783_v25  ;;  %v6279_v60 = vld [vmem:[%s7604_s6 + $0x4] ss:$16 sps:$4 sm:$0xff]  }
 0x549   : > { %2391 = vmatprep.subr.bf16.mxu0 %v6279_v60  ;;  %v6319_v60 = vld [vmem:[%s7604_s6 + $0xe0] ss:$16 sps:$4 sm:$0xff]  }
 0x54a   : > { %v6992_v30 = vpop.eup %6455  ;;  %v1811_v23 = vmul.f32 1.442695, %v1798_v26  ;;  %v1809_v24 = vmul.f32 1.442695, %v1797_v29  ;;  %2392 = vmatpush1.bf16.msra.mxu0 %v6277_v58  ;;  %v6324_v58 = vld [vmem:[%s7604_s6 + $0xec] ss:$16 sps:$4 sm:$0xff]  }
 0x54b   : > { %v6994_v31 = vpop.eup %6457  ;;  %v1792_v33 = vpop.xlane.xlu1 %1791  ;;  %v1826_v35 = vsel %vm1768_vm5, %v6992_v30, 0.0  ;;  %2393 = vmatprep.subr.bf16.mxu0 %v6285_v61  ;;  %v6322_v61 = vld [vmem:[%s7604_s6 + $0xe8] ss:$16 sps:$4 sm:$0xff]  }
 0x54c   : > { %v1789_v34 = vpop.xlane.xlu0 %1788  ;;  %6463 = vpow2.f32 %v1811_v23  ;;  %v1800_v36 = vsub.f32 %v1767_v3, %v1792_v33  ;;  %1827 = vadd.xlane.f32.xlu1 %v1826_v35  ;;  %v1823_v38 = vsel %vm1768_vm5, %v6994_v31, 0.0  ;;  %v6295_v3 = vld [vmem:[%s7604_s6 + $0x60] ss:$16 sps:$4 sm:$0xff]   ;;  %v6282_v35 = vld [vmem:[%s7604_s6 + $0xc] ss:$16 sps:$4 sm:$0xff]  }
 0x54d   : > { %v1799_v37 = vsub.f32 %v1766_v0, %v1789_v34  ;;  %6465 = vpow2.f32 %v1809_v24  ;;  %1824 = vadd.xlane.f32.xlu0 %v1823_v38  ;;  %v6289_v0 = vld [vmem:[%s7604_s6 + $0x40] ss:$16 sps:$4 sm:$0xff]  }
 0x54e   : > { %v7000_v40 = vpop.eup %6459  ;;  %v1815_v41 = vmul.f32 1.442695, %v1800_v36  ;;  %2394 = vmatpush1.bf16.msra.mxu0 %v6283_v62 }
 0x54f   : > { %v1813_v43 = vmul.f32 1.442695, %v1799_v37  ;;  %v1817_v44 = vsel %vm1768_vm5, %v7000_v40, 0.0  ;;  %2395 = vmatprep.subr.bf16.mxu0 %v6291_v63  ;;  %v6280_v37 = vld [vmem:[%s7604_s6 + $0x8] ss:$16 sps:$4 sm:$0xff]  }
 0x550   : > { %6467 = vpow2.f32 %v1815_v41  ;;  %v6286_v41 = vld [vmem:[%s7604_s6 + $0x28] ss:$16 sps:$4 sm:$0xff]   ;;  %v5538_v63 = vld [vmem:[%s6705_s30] ss:$0 sm:$0xff] }
 0x551   : > { %6469 = vpow2.f32 %v1813_v43  ;;  %1818 = vadd.xlane.f32.xlu0 %v1817_v44  ;;  %v6292_v43 = vld [vmem:[%s7604_s6 + $0x48] ss:$16 sps:$4 sm:$0xff]   ;;  %v6300_v44 = vld [vmem:[%s7604_s6 + $0x6c] ss:$16 sps:$4 sm:$0xff]  }
 0x552   : > { %v7004_v46 = vpop.eup %6461  ;;  %2396 = vmatpush1.bf16.msra.mxu0 %v6289_v0 }
 0x553   : > { %v1820_v47 = vsel %vm1768_vm5, %v7004_v46, 0.0  ;;  %2397 = vmatprep.subr.bf16.mxu0 %v6297_v1 }
 0x554   : > { %1821 = vadd.xlane.f32.xlu1 %v1820_v47  ;;  %v6306_v47 = vld [vmem:[%s7604_s6 + $0x8c] ss:$16 sps:$4 sm:$0xff]  }
 0x556   : > { %v7008_v49 = vpop.eup %6463  ;;  %2398 = vmatpush1.bf16.msra.mxu0 %v6295_v3 }
 0x557   : > { %v7010_v50 = vpop.eup %6465  ;;  %v1832_v51 = vsel %vm1768_vm5, %v7008_v49, 0.0  ;;  %2399 = vmatprep.subr.bf16.mxu0 %v6303_v4 }
 0x558   : > { %1833 = vadd.xlane.f32.xlu1 %v1832_v51  ;;  %v1829_v52 = vsel %vm1768_vm5, %v7010_v50, 0.0  ;;  %v6310_v51 = vld [vmem:[%s7604_s6 + $0xa8] ss:$16 sps:$4 sm:$0xff]  }
 0x559   : > { %1830 = vadd.xlane.f32.xlu0 %v1829_v52  ;;  %v6315_v52 = vld [vmem:[%s7604_s6 + $0xc4] ss:$16 sps:$4 sm:$0xff]  }
 0x55a   : > { %v7016_v53 = vpop.eup %6467  ;;  %2400 = vmatpush1.bf16.msra.mxu0 %v6301_v5 }
 0x55b   : > { %v7018_v55 = vpop.eup %6469  ;;  %v1838_v56 = vsel %vm1768_vm5, %v7016_v53, 0.0  ;;  %2401 = vmatprep.subr.bf16.mxu0 %v6309_v7 }
 0x55c   : > { %1839 = vadd.xlane.f32.xlu1 %v1838_v56  ;;  %v1835_v57 = vsel %vm1768_vm5, %v7018_v55, 0.0  ;;  %v6316_v56 = vld [vmem:[%s7604_s6 + $0xc8] ss:$16 sps:$4 sm:$0xff]  }
 0x55d   : > { %1836 = vadd.xlane.f32.xlu0 %v1835_v57  ;;  %v6321_v57 = vld [vmem:[%s7604_s6 + $0xe4] ss:$16 sps:$4 sm:$0xff]  }
 0x55e   : > { %2402 = vmatpush1.bf16.msra.mxu0 %v6307_v8 }
 0x55f   : > { %2403 = vmatprep.subr.bf16.mxu0 %v6315_v52 }
 0x5d9   : > { %v1828_v10 = vpop.xlane.xlu1 %1827 }
 0x5da   : > { %6471 = vrcp.f32 %v1828_v10  ;;  %v1825_v11 = vpop.xlane.xlu0 %1824 }
 0x5db   : > { %6473 = vrcp.f32 %v1825_v11  ;;  %v2481_v11 = vld [vmem:[%s7611_s15] sm:$0xff]  ;;  %s7615_s15 = sld [smem:[#allocation14_spill]] }
 0x5de   : > { %v1819_v12 = vpop.xlane.xlu0 %1818 }
 0x5df   : > { %6475 = vrcp.f32 %v1819_v12  ;;  %v2490_v12 = vrot.slane %v2481_v11, %v6923_v14 }
 0x5e1   : > { %v1822_v15 = vpop.xlane.xlu1 %1821 }
 0x5e2   : > { %6477 = vrcp.f32 %v1822_v15  ;;  %v2498_v15 = vcombine.high %v2490_v12, %v2490_v12 }
 0x5e4   : > { %v6472_v16 = vpop.eup %6471 }
 0x5e5   : > { %v6474_v17 = vpop.eup %6473  ;;  %v1848_v18 = vmul.f32 %v6472_v16, %v6992_v30  ;;  %v1834_v21 = vpop.xlane.xlu1 %1833 }
 0x5e6   : > { %v1831_v19 = vpop.xlane.xlu0 %1830  ;;  %v1846_v20 = vmul.f32 %v6474_v17, %v6994_v31 }
 0x5e7   : > { %6479 = vrcp.f32 %v1831_v19 }
 0x5e8   : > { %5871 = vmatprep.mubr.msk.f32.mxu1 %vm1768_vm5, %v1846_v20  ;;  %6481 = vrcp.f32 %v1834_v21 }
 0x5e9   : > { %v6476_v22 = vpop.eup %6475  ;;  %5872 = vmatmul.mubr.msk.f32.vlgmr.msra.gmra.mrb[8].mxu1 %vm1768_vm5, %v1848_v18  ;;  %v1840_v23 = vpop.xlane.xlu1 %1839 }
 0x5ea   : > { %5997 = vmatpush3.bf16.msra.mxu1 %v6929_v27  ;;  %v1837_v25 = vpop.xlane.xlu0 %1836  ;;  %v1842_v26 = vmul.f32 %v6476_v22, %v7000_v40  ;;  %v6288_v40 = vld [vmem:[%s7604_s6 + $0x2c] ss:$16 sps:$4 sm:$0xff]  }
 0x5eb   : > { %5999 = vmatprep.subr.bf16.mxu1 %v6931_v28  ;;  %6483 = vrcp.f32 %v1837_v25 }
 0x5ec   : > { %v6478_v29 = vpop.eup %6477  ;;  %5878 = vmatprep.mubr.msk.f32.mxu1 %vm1768_vm5, %v1842_v26  ;;  %6485 = vrcp.f32 %v1840_v23 }
 0x5ed   : > { %v1844_v30 = vmul.f32 %v6478_v29, %v7004_v46  ;;  %v6298_v46 = vld [vmem:[%s7604_s6 + $0x68] ss:$16 sps:$4 sm:$0xff]  }
 0x5f1   : > { %v6480_v24 = vpop.eup %6479  ;;  %5879 = vmatmul.mubr.msk.f32.vlgmr.msra.gmra.mrb[8].mxu1 %vm1768_vm5, %v1844_v30  ;;  %v2483_v30 = vcombine.high %v2481_v11, %v2481_v11 }
 0x5f2   : > { %6001 = vmatpush3.bf16.msra.mxu1 %v6931_v28  ;;  %v1850_v27 = vmul.f32 %v6480_v24, %v7010_v50  ;;  %v6482_v31 = vpop.eup %6481  ;;  %v6312_v50 = vld [vmem:[%s7604_s6 + $0xac] ss:$16 sps:$4 sm:$0xff]  }
 0x5f3   : > { %6003 = vmatprep.subr.bf16.mxu1 %v6933_v32  ;;  %v1852_v34 = vmul.f32 %v6482_v31, %v7008_v49  ;;  %v6304_v49 = vld [vmem:[%s7604_s6 + $0x88] ss:$16 sps:$4 sm:$0xff]  }
 0x5f4   : > { %5885 = vmatprep.mubr.msk.f32.mxu1 %vm1768_vm5, %v1850_v27  ;;  %v2497_v27 = vrot.slane %v2483_v30, %v6923_v14 }
 0x5f5   : > { %v6484_v33 = vpop.eup %6483 }
 0x5f6   : > { %v1854_v36 = vmul.f32 %v6484_v33, %v7018_v55  ;;  %v6486_v28 = vpop.eup %6485  ;;  %v6313_v55 = vld [vmem:[%s7604_s6 + $0xc0] ss:$16 sps:$4 sm:$0xff]   ;;  %v2499_v31 = vcombine.high %v2497_v27, %v2497_v27 }
 0x5f7   : > { %v1856_v38 = vmul.f32 %v6486_v28, %v7016_v53  ;;  %v6318_v53 = vld [vmem:[%s7604_s6 + $0xcc] ss:$16 sps:$4 sm:$0xff]   ;;  %2404 = vmatpush1.bf16.msra.mxu0 %v6313_v55  ;;  %v2584_v33 = vld [vmem:[%s7612_s18] sm:$0xff]  ;;  %s7616_s18 = sld [smem:[#allocation15_spill]] }
 0x5f8   : > { %2405 = vmatprep.subr.bf16.mxu0 %v6321_v57 }
 0x5f9   : > { %5886 = vmatmul.mubr.msk.f32.vlgmr.msra.gmra.mrb[8].mxu1 %vm1768_vm5, %v1852_v34  ;;  %v2593_v34 = vrot.slane %v2584_v33, %v6923_v14 }
 0x5fa   : > { %6005 = vmatpush3.bf16.msra.mxu1 %v6933_v32  ;;  %5892 = vmatprep.mubr.msk.f32.mxu1 %vm1768_vm5, %v1854_v36  ;;  %v6294_v32 = vld [vmem:[%s7604_s6 + $0x4c] ss:$16 sps:$4 sm:$0xff]   ;;  %v2586_v36 = vcombine.high %v2584_v33, %v2584_v33 }
 0x5fb   : > { %2434 = vmatprep.subr.bf16.mxu1 %v6282_v35  ;;  %2406 = vmatpush1.bf16.msra.mxu0 %v6319_v60  ;;  %v2601_v35 = vcombine.high %v2593_v34, %v2593_v34 }
 0x5fc   : > { %v2600_v28 = vrot.slane %v2586_v36, %v6923_v14 }
 0x601   : > { %5893 = vmatmul.mubr.msk.f32.vlgmr.msra.gmra.mrb[8].mxu1 %vm1768_vm5, %v1856_v38 }
 0x602   : > { %2435 = vmatpush1.bf16.msra.mxu1 %v6280_v37  ;;  %2466 = vmatprep.mubr.bf16.mxu1 %v6632_v48  ;;  %v2602_v37 = vcombine.high %v2600_v28, %v2600_v28 }
 0x603   : > { %2436 = vmatprep.subr.bf16.mxu1 %v6288_v40 }
 0x606   : > { %2437 = vmatpush1.bf16.msra.mxu1 %v6286_v41 }
 0x607   : > { %2438 = vmatprep.subr.bf16.mxu1 %v6294_v32 }
 0x60a   : > { %2439 = vmatpush1.bf16.msra.mxu1 %v6292_v43 }
 0x60b   : > { %2440 = vmatprep.subr.bf16.mxu1 %v6300_v44 }
 0x60e   : > { %2441 = vmatpush1.bf16.msra.mxu1 %v6298_v46 }
 0x60f   : > { %2442 = vmatprep.subr.bf16.mxu1 %v6306_v47 }
 0x612   : > { %2443 = vmatpush1.bf16.msra.mxu1 %v6304_v49 }
 0x613   : > { %2444 = vmatprep.subr.bf16.mxu1 %v6312_v50 }
 0x616   : > { %2445 = vmatpush1.bf16.msra.mxu1 %v6310_v51 }
 0x617   : > { %2446 = vmatprep.subr.bf16.mxu1 %v6318_v53 }
 0x61a   : > { %2447 = vmatpush1.bf16.msra.mxu1 %v6316_v56 }
 0x61b   : > { %2448 = vmatprep.subr.bf16.mxu1 %v6324_v58 }
 0x61e   : > { %2449 = vmatpush1.bf16.msra.mxu1 %v6322_v61 }
 0x6d4   : > { %v5894_v62 = vpop.f32.mrb[8].mxu1 }
 0x6d5   : > { %v2186_v0 = vmul.f32 0.25, %v5894_v62  ;;  %v2174_v1 = vpop.f32.mrb[9].mxu1 }
 0x6d6   : > { %v2185_v3 = vmul.f32 0.25, %v2174_v1 }
 0x6d7   : > { %v2195_v4 = vadd.f32 %v5538_v63, %v2186_v0 }
 0x6d8   : > { %v2194_v5 = vadd.f32 %v5538_v63, %v2185_v3 }
 0x6d9   : > { %v2197_v7 = vmax.f32 %v2195_v4, 0.0 }
 0x6da   : > { %v2196_v8 = vmax.f32 %v2194_v5, 0.0 }
 0x6dc   : > { %v2198_v10 = vpack.c.bf16 %v2197_v7, %v2196_v8 }
 0x6de   : > { %2424 = vmatmul.mubr.bf16.vlgmr.msra.gmra.mrb[12].mxu0 %v2198_v10  ;;  %2467 = vmatmul.mubr.bf16.vlgmr.msra.gmra.mrb[12].mxu1 %v2198_v10 }
 0x6df   : > { %2536 = vmatprep.mubr.bf16.mxu0 %v2498_v15 }
 0x7b1   : > { %v2425_v16 = vpop.f32.mrb[12].mxu0  ;;  %v2468_v17 = vpop.f32.mrb[12].mxu1 }
 0x7b2   : > { %v2427_v18 = vpop.f32.mrb[13].mxu0  ;;  %v2470_v19 = vpop.f32.mrb[13].mxu1 }
 0x7b3   : > { %v2429_v20 = vpop.f32.mrb[14].mxu0  ;;  %v2472_v21 = vpop.f32.mrb[14].mxu1 }
 0x7b4   : > { %v7081_v22 = vpack.c.bf16 %v2429_v20, %v2425_v16  ;;  %v7083_v25 = vpack.c.bf16 %v2472_v21, %v2468_v17  ;;  %v2431_v26 = vpop.f32.mrb[15].mxu0  ;;  %v2474_v29 = vpop.f32.mrb[15].mxu1 }
 0x7b5   : > { %v2478_v23 = vpack.c.bf16 %v2431_v26, %v2427_v18  ;;  %v7085_v24 = vpack.c.bf16 %v2474_v29, %v2470_v19 }
 0x7b7   : > { %2504 = vmatprep.subr.bf16.mxu0 %v2478_v23  ;;  %6007 = vmatprep.subr.bf16.mxu1 %v2478_v23 }
 0x7b8   : > { %2505 = vmatpush1.bf16.xpose.msra.mxu0 %v7081_v22  ;;  %6009 = vmatpush3.bf16.msra.mxu1 %v2478_v23 }
 0x7b9   : > { %2544 = vmatprep.subr.bf16.mxu0 %v7085_v24  ;;  %6011 = vmatprep.subr.bf16.mxu1 %v7081_v22 }
 0x7bf   : > { %2537 = vmatmul.mubr.bf16.vlgmr.msra.gmra.mrb[16].mxu0 %v2490_v12 }
 0x7c0   : > { %2545 = vmatpush1.bf16.xpose.msra.mxu0 %v7083_v25  ;;  %2576 = vmatprep.mubr.bf16.mxu0 %v2499_v31 }
 0x7c1   : > { %2607 = vmatprep.subr.bf16.mxu0 %v2478_v23 }
 0x7cb   : > { %2577 = vmatmul.mubr.bf16.vlgmr.msra.gmra.mrb[16].mxu0 %v2497_v27 }
 0x7cc   : > { %2608 = vmatpush1.bf16.xpose.msra.mxu0 %v7081_v22  ;;  %2639 = vmatprep.mubr.bf16.mxu0 %v2601_v35 }
 0x7cd   : > { %2647 = vmatprep.subr.bf16.mxu0 %v7085_v24 }
 0x7d3   : > { %2640 = vmatmul.mubr.bf16.vlgmr.msra.gmra.mrb[20].mxu0 %v2593_v34 }
 0x7d4   : > { %2648 = vmatpush1.bf16.xpose.msra.mxu0 %v7083_v25  ;;  %2679 = vmatprep.mubr.bf16.mxu0 %v2602_v37 }
 0x7df   : > { %2680 = vmatmul.mubr.bf16.vlgmr.msra.gmra.mrb[20].mxu0 %v2600_v28 }
 0x7e0   : > { %3374 = vmatprep.mubr.bf16.mxu0 %v6632_v48 }
 0x89e   : > { %v2578_v38 = vpop.f32.mrb[16].mxu0 }
 0x89f   : > { %v2580_v40 = vpop.f32.mrb[17].mxu0  ;;  %v2738_v52 = vrot.slane %v2578_v38, %v6960_v59 }
 0x8a0   : > { %v2581_v41 = vpop.f32.mrb[18].mxu0 }
 0x8a1   : > { %v2582_v32 = vpop.f32.mrb[19].mxu0  ;;  %v2739_v53 = vcombine.high %v2738_v52, %v2738_v52  ;;  %v2746_v55 = vrot.slane %v2738_v52, %v6960_v59 }
 0x8a3   : > { %v2753_v56 = vrot.slane %v2739_v53, %v6960_v59  ;;  %v2754_v57 = vcombine.high %v2746_v55, %v2746_v55 }
 0x8a5   : > { %v2767_v13 = vrot.slane %v2754_v57, %v6949_v42  ;;  %v2755_v63 = vcombine.high %v2753_v56, %v2753_v56 }
 0x8a7   : > { %v2771_v16 = vrot.slane %v2755_v63, %v6949_v42 }
 0x8b2   : > { %v2681_v43 = vpop.f32.mrb[20].mxu0 }
 0x8b3   : > { %v2683_v44 = vpop.f32.mrb[21].mxu0  ;;  %v2701_v46 = vrot.slane %v2681_v43, %v6946_v39  ;;  %v2712_v49 = vrot.slane %v2681_v43, %v1663_v45  ;;  %v2690_v50 = vrot.slane %v2681_v43, %v6949_v42  ;;  %v2723_v51 = vrot.slane %v2681_v43, %v1674_v54 }
 0x8b4   : > { %v2684_v47 = vpop.f32.mrb[22].mxu0  ;;  %v2763_v45 = vrot.slane %v2753_v56, %v6949_v42  ;;  %v2759_v54 = vrot.slane %v2746_v55, %v6949_v42 }
 0x8b5   : > { %2707 = vbcast.lane.b32.xlu1 %v2701_v46, 264  ;;  %2703 = vbcast.lane.b32.xlu0 %v2701_v46, 256  ;;  %v2685_v14 = vpop.f32.mrb[23].mxu0 }
 0x8b9   : > { %2714 = vbcast.lane.b32.xlu0 %v2712_v49, 256  ;;  %2692 = vbcast.lane.b32.xlu1 %v2690_v50, 256 }
 0x8bd   : > { %2725 = vbcast.lane.b32.xlu0 %v2723_v51, 256  ;;  %2696 = vbcast.lane.b32.xlu1 %v2690_v50, 264 }
 0x8c1   : > { %2718 = vbcast.lane.b32.xlu1 %v2712_v49, 264 }
 0x8c5   : > { %2729 = vbcast.lane.b32.xlu1 %v2723_v51, 264 }
 0x927   : > { %v2708_v58 = vpop.permute.xlu1 %2707  ;;  %v2704_v60 = vpop.permute.xlu0 %2703 }
 0x928   : > { %v2779_v61 = vadd.f32 %v2763_v45, %v2708_v58  ;;  %v2778_v62 = vadd.f32 %v2763_v45, %v2704_v60 }
 0x92a   : > { %vm2787_vm12 = vcmp.gt.f32.partialorder %v2779_v61, 0.0  ;;  %v2795_v0 = vmul.f32 0.2, %v2779_v61  ;;  %vm2786_vm13 = vcmp.gt.f32.partialorder %v2778_v62, 0.0  ;;  %v2794_v1 = vmul.f32 0.2, %v2778_v62 }
 0x92b   : > { %v2715_v3 = vpop.permute.xlu0 %2714  ;;  %v2693_v4 = vpop.permute.xlu1 %2692 }
 0x92c   : > { %v2780_v5 = vadd.f32 %v2767_v13, %v2715_v3  ;;  %v2776_v7 = vadd.f32 %v2759_v54, %v2693_v4  ;;  %v2802_v8 = vsel %vm2786_vm13, %v2778_v62, %v2794_v1  ;;  %v2803_v10 = vsel %vm2787_vm12, %v2779_v61, %v2795_v0 }
 0x92d   : > { %v2810_v11 = vadd.f32 %v6969_v6, %v2802_v8  ;;  %v2811_v12 = vadd.f32 %v6971_v9, %v2803_v10 }
 0x92e   : > { %vm2784_vm14 = vcmp.gt.f32.partialorder %v2776_v7, 0.0  ;;  %v2792_v15 = vmul.f32 0.2, %v2776_v7  ;;  %v2796_v21 = vmul.f32 0.2, %v2780_v5  ;;  %vm2788_vm15 = vcmp.gt.f32.partialorder %v2780_v5, 0.0 }
 0x92f   : > { %v2726_v17 = vpop.permute.xlu0 %2725  ;;  %v2697_v18 = vpop.permute.xlu1 %2696  ;;  %v2822_v19 = vsel %vm1768_vm5, %v2810_v11, -inf  ;;  %v2825_v20 = vsel %vm1768_vm5, %v2811_v12, -inf }
 0x930   : > { %v2782_v26 = vadd.f32 %v2771_v16, %v2726_v17  ;;  %v2777_v29 = vadd.f32 %v2759_v54, %v2697_v18  ;;  %2823 = vmax.xlane.f32.xlu0 %v2822_v19  ;;  %2826 = vmax.xlane.f32.xlu1 %v2825_v20  ;;  %v2800_v30 = vsel %vm2784_vm14, %v2776_v7, %v2792_v15 }
 0x931   : > { %v2808_v23 = vadd.f32 %v6969_v6, %v2800_v30  ;;  %v2804_v28 = vsel %vm2788_vm15, %v2780_v5, %v2796_v21 }
 0x932   : > { %vm2785_vm3 = vcmp.gt.f32.partialorder %v2777_v29, 0.0  ;;  %v2793_v27 = vmul.f32 0.2, %v2777_v29  ;;  %v2798_v34 = vmul.f32 0.2, %v2782_v26  ;;  %vm2790_vm4 = vcmp.gt.f32.partialorder %v2782_v26, 0.0 }
 0x933   : > { %v2719_v31 = vpop.permute.xlu1 %2718  ;;  %v2816_v33 = vsel %vm1768_vm5, %v2808_v23, -inf  ;;  %v2812_v32 = vadd.f32 %v6969_v6, %v2804_v28 }
 0x934   : > { %v2781_v35 = vadd.f32 %v2767_v13, %v2719_v31  ;;  %2817 = vmax.xlane.f32.xlu0 %v2816_v33  ;;  %v2801_v36 = vsel %vm2785_vm3, %v2777_v29, %v2793_v27  ;;  %v2806_v46 = vsel %vm2790_vm4, %v2782_v26, %v2798_v34 }
 0x935   : > { %v2809_v37 = vadd.f32 %v6971_v9, %v2801_v36  ;;  %v2828_v49 = vsel %vm1768_vm5, %v2812_v32, -inf  ;;  %v2814_v51 = vadd.f32 %v6969_v6, %v2806_v46  ;;  %v6335_v46 = vld [vmem:[%s7613_s2 + $0x24] ss:$8 sps:$4 sm:$0xff]  }
 0x936   : > { %vm2789_vm6 = vcmp.gt.f32.partialorder %v2781_v35, 0.0  ;;  %v2797_v38 = vmul.f32 0.2, %v2781_v35 }
 0x937   : > { %v2730_v40 = vpop.permute.xlu1 %2729  ;;  %v2819_v41 = vsel %vm1768_vm5, %v2809_v37, -inf  ;;  %v2834_v55 = vsel %vm1768_vm5, %v2814_v51, -inf }
 0x938   : > { %v2783_v43 = vadd.f32 %v2771_v16, %v2730_v40  ;;  %2820 = vmax.xlane.f32.xlu0 %v2819_v41  ;;  %v2805_v44 = vsel %vm2789_vm6, %v2781_v35, %v2797_v38  ;;  %v6327_v41 = vld [vmem:[%s7613_s2] ss:$8 sps:$4 sm:$0xff]  }
 0x939   : > { %v2813_v47 = vadd.f32 %v6971_v9, %v2805_v44  ;;  %v6330_v44 = vld [vmem:[%s7613_s2 + $0x10] ss:$8 sps:$4 sm:$0xff]  }
 0x93a   : > { %vm2791_vm7 = vcmp.gt.f32.partialorder %v2783_v43, 0.0  ;;  %v2799_v14 = vmul.f32 0.2, %v2783_v43 }
 0x93b   : > { %v2831_v50 = vsel %vm1768_vm5, %v2813_v47, -inf }
 0x93c   : > { %2829 = vmax.xlane.f32.xlu0 %v2828_v49  ;;  %2832 = vmax.xlane.f32.xlu1 %v2831_v50  ;;  %v2807_v52 = vsel %vm2791_vm7, %v2783_v43, %v2799_v14  ;;  %v6332_v43 = vld [vmem:[%s7613_s2 + $0x14] ss:$8 sps:$4 sm:$0xff]   ;;  %v6336_v49 = vld [vmem:[%s7613_s2 + $0x30] ss:$8 sps:$4 sm:$0xff]   ;;  %v6341_v50 = vld [vmem:[%s7613_s2 + $0x44] ss:$8 sps:$4 sm:$0xff]  }
 0x93d   : > { %v2815_v53 = vadd.f32 %v6971_v9, %v2807_v52  ;;  %v6338_v14 = vld [vmem:[%s7613_s2 + $0x34] ss:$8 sps:$4 sm:$0xff]  }
 0x93e   : > { %v6344_v52 = vld [vmem:[%s7613_s2 + $0x54] ss:$8 sps:$4 sm:$0xff]  }
 0x93f   : > { %v2837_v56 = vsel %vm1768_vm5, %v2815_v53, -inf }
 0x940   : > { %2835 = vmax.xlane.f32.xlu0 %v2834_v55  ;;  %2838 = vmax.xlane.f32.xlu1 %v2837_v56 }
 0x9bd   : > { %v2824_v57 = vpop.xlane.xlu0 %2823  ;;  %v2827_v45 = vpop.xlane.xlu1 %2826 }
 0x9be   : > { %v2842_v58 = vsub.f32 %v2810_v11, %v2824_v57  ;;  %v2843_v60 = vsub.f32 %v2811_v12, %v2827_v45 }
 0x9c0   : > { %v2852_v61 = vmul.f32 1.442695, %v2842_v58  ;;  %v2854_v62 = vmul.f32 1.442695, %v2843_v60 }
 0x9c1   : > { %v2818_v13 = vpop.xlane.xlu0 %2817 }
 0x9c2   : > { %6487 = vpow2.f32 %v2852_v61  ;;  %v2840_v54 = vsub.f32 %v2808_v23, %v2818_v13 }
 0x9c3   : > { %6489 = vpow2.f32 %v2854_v62 }
 0x9c4   : > { %v2848_v63 = vmul.f32 1.442695, %v2840_v54 }
 0x9c5   : > { %v2821_v0 = vpop.xlane.xlu0 %2820 }
 0x9c6   : > { %6491 = vpow2.f32 %v2848_v63  ;;  %v2841_v1 = vsub.f32 %v2809_v37, %v2821_v0 }
 0x9c8   : > { %v2850_v3 = vmul.f32 1.442695, %v2841_v1 }
 0x9c9   : > { %v2830_v4 = vpop.xlane.xlu0 %2829  ;;  %v2833_v5 = vpop.xlane.xlu1 %2832 }
 0x9ca   : > { %6493 = vpow2.f32 %v2850_v3  ;;  %v2844_v7 = vsub.f32 %v2812_v32, %v2830_v4  ;;  %v2845_v8 = vsub.f32 %v2813_v47, %v2833_v5  ;;  %v6329_v32 = vld [vmem:[%s7613_s2 + $0x4] ss:$8 sps:$4 sm:$0xff]   ;;  %v6333_v47 = vld [vmem:[%s7613_s2 + $0x20] ss:$8 sps:$4 sm:$0xff]  }
 0x9cb   : > { %3342 = vmatprep.subr.bf16.mxu0 %v6329_v32 }
 0x9cc   : > { %v7128_v10 = vpop.eup %6487  ;;  %v2856_v11 = vmul.f32 1.442695, %v2844_v7  ;;  %v2858_v12 = vmul.f32 1.442695, %v2845_v8  ;;  %3343 = vmatpush1.bf16.msra.mxu0 %v6327_v41 }
 0x9cd   : > { %v7130_v15 = vpop.eup %6489  ;;  %v2836_v16 = vpop.xlane.xlu0 %2835  ;;  %v2870_v18 = vsel %vm1768_vm5, %v7128_v10, 0.0  ;;  %3344 = vmatprep.subr.bf16.mxu0 %v6332_v43  ;;  %v5597_v43 = vld.sshfl [vmem:[%s7616_s18] sm:$0x11 pattern:$0x75316420]  ;;  %s7619_s18 = sld [smem:[#allocation20_spill]] }
 0x9ce   : > { %v2839_v17 = vpop.xlane.xlu1 %2838  ;;  %6495 = vpow2.f32 %v2856_v11  ;;  %v2846_v19 = vsub.f32 %v2814_v51, %v2836_v16  ;;  %2871 = vadd.xlane.f32.xlu0 %v2870_v18  ;;  %v2873_v21 = vsel %vm1768_vm5, %v7130_v15, 0.0  ;;  %v6339_v51 = vld [vmem:[%s7613_s2 + $0x40] ss:$8 sps:$4 sm:$0xff]   ;;  %v6347_v16 = vld [vmem:[%s7613_s2 + $0x64] ss:$8 sps:$4 sm:$0xff]  }
 0x9cf   : > { %v2847_v20 = vsub.f32 %v2815_v53, %v2839_v17  ;;  %6497 = vpow2.f32 %v2858_v12  ;;  %2874 = vadd.xlane.f32.xlu1 %v2873_v21  ;;  %v6342_v53 = vld [vmem:[%s7613_s2 + $0x50] ss:$8 sps:$4 sm:$0xff]   ;;  %v6345_v17 = vld [vmem:[%s7613_s2 + $0x60] ss:$8 sps:$4 sm:$0xff]   ;;  %v6350_v18 = vld [vmem:[%s7613_s2 + $0x74] ss:$8 sps:$4 sm:$0xff]  }
 0x9d0   : > { %v7136_v26 = vpop.eup %6491  ;;  %v2860_v29 = vmul.f32 1.442695, %v2846_v19  ;;  %3345 = vmatpush1.bf16.msra.mxu0 %v6330_v44  ;;  %v6348_v19 = vld [vmem:[%s7613_s2 + $0x70] ss:$8 sps:$4 sm:$0xff]   ;;  %v5579_v21 = vld [vmem:[%s7614_s12] ss:$0 sm:$0xff]  ;;  %v3462_v44 = vcombine.high %v5597_v43, %v5597_v43 }
 0x9d1   : > { %v2862_v30 = vmul.f32 1.442695, %v2847_v20  ;;  %v2864_v23 = vsel %vm1768_vm5, %v7136_v26, 0.0  ;;  %3346 = vmatprep.subr.bf16.mxu0 %v6335_v46  ;;  %s7617_s12 = sld [smem:[#allocation19_spill]]  ;;  %s7621_s2 = sld [smem:[#allocation18_spill]] }
 0x9d2   : > { %6499 = vpow2.f32 %v2860_v29  ;;  %2865 = vadd.xlane.f32.xlu0 %v2864_v23 }
 0x9d3   : > { %6501 = vpow2.f32 %v2862_v30 }
 0x9d4   : > { %v7140_v27 = vpop.eup %6493  ;;  %3347 = vmatpush1.bf16.msra.mxu0 %v6333_v47  ;;  %v3476_v47 = vrot.slane %v3462_v44, %v6960_v59 }
 0x9d5   : > { %v2867_v31 = vsel %vm1768_vm5, %v7140_v27, 0.0  ;;  %3348 = vmatprep.subr.bf16.mxu0 %v6338_v14  ;;  %v3469_v14 = vrot.slane %v5597_v43, %v6960_v59 }
 0x9d6   : > { %2868 = vadd.xlane.f32.xlu1 %v2867_v31 }
 0x9d8   : > { %v7144_v33 = vpop.eup %6495  ;;  %3349 = vmatpush1.bf16.msra.mxu0 %v6336_v49 }
 0x9d9   : > { %v7146_v34 = vpop.eup %6497  ;;  %v2876_v35 = vsel %vm1768_vm5, %v7144_v33, 0.0  ;;  %3350 = vmatprep.subr.bf16.mxu0 %v6341_v50 }
 0x9da   : > { %2877 = vadd.xlane.f32.xlu0 %v2876_v35  ;;  %v2879_v36 = vsel %vm1768_vm5, %v7146_v34, 0.0 }
 0x9db   : > { %2880 = vadd.xlane.f32.xlu1 %v2879_v36 }
 0x9dc   : > { %v7152_v28 = vpop.eup %6499  ;;  %3351 = vmatpush1.bf16.msra.mxu0 %v6339_v51 }
 0x9dd   : > { %v7154_v37 = vpop.eup %6501  ;;  %v2882_v38 = vsel %vm1768_vm5, %v7152_v28, 0.0  ;;  %3352 = vmatprep.subr.bf16.mxu0 %v6344_v52 }
 0x9de   : > { %2883 = vadd.xlane.f32.xlu0 %v2882_v38  ;;  %v2885_v40 = vsel %vm1768_vm5, %v7154_v37, 0.0 }
 0x9df   : > { %2886 = vadd.xlane.f32.xlu1 %v2885_v40 }
 0x9e0   : > { %3353 = vmatpush1.bf16.msra.mxu0 %v6342_v53 }
 0x9e1   : > { %3354 = vmatprep.subr.bf16.mxu0 %v6347_v16 }
 0x9e4   : > { %3355 = vmatpush1.bf16.msra.mxu0 %v6345_v17 }
 0x9e5   : > { %3356 = vmatprep.subr.bf16.mxu0 %v6350_v18 }
 0x9e8   : > { %3357 = vmatpush1.bf16.msra.mxu0 %v6348_v19 }
 0xa5b   : > { %v2872_v55 = vpop.xlane.xlu0 %2871 }
 0xa5c   : > { %6503 = vrcp.f32 %v2872_v55  ;;  %v2875_v56 = vpop.xlane.xlu1 %2874 }
 0xa5d   : > { %6505 = vrcp.f32 %v2875_v56 }
 0xa5f   : > { %v2866_v57 = vpop.xlane.xlu0 %2865 }
 0xa60   : > { %6507 = vrcp.f32 %v2866_v57 }
 0xa63   : > { %v2869_v45 = vpop.xlane.xlu1 %2868 }
 0xa64   : > { %6509 = vrcp.f32 %v2869_v45 }
 0xa66   : > { %v6504_v58 = vpop.eup %6503 }
 0xa67   : > { %v6506_v60 = vpop.eup %6505  ;;  %v2878_v61 = vpop.xlane.xlu0 %2877  ;;  %v2893_v62 = vmul.f32 %v6504_v58, %v7128_v10 }
 0xa68   : > { %v2895_v13 = vmul.f32 %v6506_v60, %v7130_v15  ;;  %6511 = vrcp.f32 %v2878_v61  ;;  %v2881_v54 = vpop.xlane.xlu1 %2880 }
 0xa69   : > { %5899 = vmatprep.mubr.msk.f32.mxu1 %vm1768_vm5, %v2893_v62  ;;  %6513 = vrcp.f32 %v2881_v54 }
 0xa6a   : > { %v6508_v63 = vpop.eup %6507  ;;  %5900 = vmatmul.mubr.msk.f32.vlgmr.msra.gmra.mrb[10].mxu1 %vm1768_vm5, %v2895_v13 }
 0xa6b   : > { %6013 = vmatpush3.bf16.msra.mxu1 %v7081_v22  ;;  %v2884_v0 = vpop.xlane.xlu0 %2883  ;;  %v2889_v1 = vmul.f32 %v6508_v63, %v7136_v26 }
 0xa6c   : > { %6515 = vrcp.f32 %v2884_v0  ;;  %6015 = vmatprep.subr.bf16.mxu1 %v7083_v25  ;;  %v2887_v5 = vpop.xlane.xlu1 %2886 }
 0xa6d   : > { %5906 = vmatprep.mubr.msk.f32.mxu1 %vm1768_vm5, %v2889_v1  ;;  %6517 = vrcp.f32 %v2887_v5 }
 0xa6e   : > { %v6510_v3 = vpop.eup %6509 }
 0xa6f   : > { %v2891_v4 = vmul.f32 %v6510_v3, %v7140_v27 }
 0xa72   : > { %v6512_v7 = vpop.eup %6511  ;;  %5907 = vmatmul.mubr.msk.f32.vlgmr.msra.gmra.mrb[10].mxu1 %vm1768_vm5, %v2891_v4 }
 0xa73   : > { %6017 = vmatpush3.bf16.msra.mxu1 %v7083_v25  ;;  %v2897_v22 = vmul.f32 %v6512_v7, %v7144_v33  ;;  %v6514_v8 = vpop.eup %6513 }
 0xa74   : > { %6019 = vmatprep.subr.bf16.mxu1 %v7085_v24  ;;  %v2899_v11 = vmul.f32 %v6514_v8, %v7146_v34  ;;  %v5596_v34 = vld.sshfl [vmem:[%s7615_s15] sm:$0x11 pattern:$0x75316420]  ;;  %s7618_s15 = sld [smem:[#allocation17_spill]] }
 0xa75   : > { %5913 = vmatprep.mubr.msk.f32.mxu1 %vm1768_vm5, %v2897_v22  ;;  %v3396_v35 = vcombine.high %v5596_v34, %v5596_v34  ;;  %v3403_v46 = vrot.slane %v5596_v34, %v6960_v59 }
 0xa76   : > { %v6516_v10 = vpop.eup %6515 }
 0xa77   : > { %v2901_v12 = vmul.f32 %v6516_v10, %v7152_v28  ;;  %v6518_v25 = vpop.eup %6517  ;;  %v3410_v36 = vrot.slane %v3396_v35, %v6960_v59 }
 0xa78   : > { %v2903_v15 = vmul.f32 %v6518_v25, %v7154_v37 }
 0xa7a   : > { %5914 = vmatmul.mubr.msk.f32.vlgmr.msra.gmra.mrb[10].mxu1 %vm1768_vm5, %v2899_v11 }
 0xa7b   : > { %6021 = vmatpush3.bf16.msra.mxu1 %v7085_v24  ;;  %5920 = vmatprep.mubr.msk.f32.mxu1 %vm1768_vm5, %v2901_v12 }
 0xa82   : > { %5921 = vmatmul.mubr.msk.f32.vlgmr.msra.gmra.mrb[10].mxu1 %vm1768_vm5, %v2903_v15 }
 0xa83   : > { %3445 = vmatprep.mubr.bf16.mxu1 %v3410_v36 }
 0xb55   : > { %v5922_v20 = vpop.f32.mrb[10].mxu1 }
 0xb56   : > { %v3233_v26 = vmul.f32 0.25, %v5922_v20  ;;  %v3221_v24 = vpop.f32.mrb[11].mxu1 }
 0xb57   : > { %v3232_v29 = vmul.f32 0.25, %v3221_v24 }
 0xb58   : > { %v3242_v30 = vadd.f32 %v5579_v21, %v3233_v26 }
 0xb59   : > { %v3241_v23 = vadd.f32 %v5579_v21, %v3232_v29 }
 0xb5a   : > { %v3244_v27 = vmax.f32 %v3242_v30, 0.0 }
 0xb5b   : > { %v3243_v31 = vmax.f32 %v3241_v23, 0.0 }
 0xb5d   : > { %v3245_v33 = vpack.c.bf16 %v3244_v27, %v3243_v31 }
 0xb5f   : > { %3375 = vmatmul.mubr.bf16.vlgmr.msra.gmra.mrb[24].mxu0 %v3245_v33 }
 0xb60   : > { %4144 = vmatprep.mubr.bf16.mxu0 %v6632_v48 }
 0xc32   : > { %v3376_v28 = vpop.f32.mrb[24].mxu0 }
 0xc33   : > { %v3378_v37 = vpop.f32.mrb[25].mxu0 }
 0xc34   : > { %v3380_v38 = vpop.f32.mrb[26].mxu0 }
 0xc35   : > { %v7201_v40 = vpack.c.bf16 %v3380_v38, %v3376_v28  ;;  %v3382_v41 = vpop.f32.mrb[27].mxu0 }
 0xc36   : > { %v3386_v32 = vpack.c.bf16 %v3382_v41, %v3378_v37 }
 0xc38   : > { %3413 = vmatprep.subr.bf16.mxu1 %v3386_v32 }
 0xc39   : > { %3414 = vmatpush1.bf16.xpose.msra.mxu1 %v7201_v40 }
 0xc3a   : > { %3479 = vmatprep.subr.bf16.mxu1 %v3386_v32 }
 0xc40   : > { %3446 = vmatmul.mubr.bf16.vlgmr.msra.gmra.mrb[16].mxu1 %v3403_v46 }
 0xc41   : > { %3480 = vmatpush1.bf16.xpose.msra.mxu1 %v7201_v40  ;;  %3511 = vmatprep.mubr.bf16.mxu1 %v3476_v47 }
 0xc42   : > { %6023 = vmatprep.subr.bf16.mxu1 %v3386_v32 }
 0xc48   : > { %3512 = vmatmul.mubr.bf16.vlgmr.msra.gmra.mrb[20].mxu1 %v3469_v14 }
 0xc49   : > { %6025 = vmatpush3.bf16.msra.mxu1 %v3386_v32 }
 0xc4a   : > { %6027 = vmatprep.subr.bf16.mxu1 %v7201_v40 }
 0xd13   : > { %v3447_v49 = vpop.f32.mrb[16].mxu1 }
 0xd14   : > { %v3449_v50 = vpop.f32.mrb[17].mxu1  ;;  %v3548_v60 = vrot.slane %v3447_v49, %v6960_v59 }
 0xd15   : > { %v3450_v51 = vpop.f32.mrb[18].mxu1  ;;  %v6353_v50 = vld [vmem:[%s7617_s12] ss:$8 sps:$4 sm:$0xff]  }
 0xd16   : > { %v3451_v52 = vpop.f32.mrb[19].mxu1  ;;  %v3549_v61 = vcombine.high %v3548_v60, %v3548_v60  ;;  %v3556_v13 = vrot.slane %v3548_v60, %v6960_v59  ;;  %v6355_v51 = vld [vmem:[%s7617_s12 + $0x4] ss:$8 sps:$4 sm:$0xff]  }
 0xd17   : > { %v6361_v52 = vld [vmem:[%s7617_s12 + $0x14] ss:$8 sps:$4 sm:$0xff]   ;;  %4112 = vmatprep.subr.bf16.mxu0 %v6355_v51  ;;  %v6383_v60 = vld [vmem:[%s7617_s12 + $0x44] ss:$8 sps:$4 sm:$0xff]  }
 0xd18   : > { %v3563_v62 = vrot.slane %v3549_v61, %v6960_v59  ;;  %v3567_v4 = vrot.slane %v3556_v13, %v6949_v42  ;;  %4113 = vmatpush1.bf16.msra.mxu0 %v6353_v50  ;;  %v6389_v61 = vld [vmem:[%s7617_s12 + $0x54] ss:$8 sps:$4 sm:$0xff]  }
 0xd19   : > { %4114 = vmatprep.subr.bf16.mxu0 %v6361_v52 }
 0xd1a   : > { %v3571_v54 = vrot.slane %v3563_v62, %v6949_v42  ;;  %v6387_v62 = vld [vmem:[%s7617_s12 + $0x50] ss:$8 sps:$4 sm:$0xff]  }
 0xd1b   : > { %v3513_v53 = vpop.f32.mrb[20].mxu1 }
 0xd1c   : > { %v3515_v55 = vpop.f32.mrb[21].mxu1  ;;  %v3533_v56 = vrot.slane %v3513_v53, %v6946_v39  ;;  %v3522_v58 = vrot.slane %v3513_v53, %v6949_v42  ;;  %v6359_v53 = vld [vmem:[%s7617_s12 + $0x10] ss:$8 sps:$4 sm:$0xff]  }
 0xd1d   : > { %v3516_v57 = vpop.f32.mrb[22].mxu1  ;;  %4115 = vmatpush1.bf16.msra.mxu0 %v6359_v53  ;;  %v6367_v55 = vld [vmem:[%s7617_s12 + $0x20] ss:$8 sps:$4 sm:$0xff]  }
 0xd1e   : > { %3539 = vbcast.lane.b32.xlu1 %v3533_v56, 264  ;;  %3535 = vbcast.lane.b32.xlu0 %v3533_v56, 256  ;;  %v3517_v45 = vpop.f32.mrb[23].mxu1  ;;  %v6369_v56 = vld [vmem:[%s7617_s12 + $0x24] ss:$8 sps:$4 sm:$0xff]  }
 0xd1f   : > { %v6375_v57 = vld [vmem:[%s7617_s12 + $0x34] ss:$8 sps:$4 sm:$0xff]   ;;  %4116 = vmatprep.subr.bf16.mxu0 %v6369_v56  ;;  %v6373_v45 = vld [vmem:[%s7617_s12 + $0x30] ss:$8 sps:$4 sm:$0xff]  }
 0xd21   : > { %4117 = vmatpush1.bf16.msra.mxu0 %v6367_v55 }
 0xd22   : > { %3524 = vbcast.lane.b32.xlu1 %v3522_v58, 256  ;;  %4118 = vmatprep.subr.bf16.mxu0 %v6375_v57 }
 0xd25   : > { %4119 = vmatpush1.bf16.msra.mxu0 %v6373_v45 }
 0xd26   : > { %3528 = vbcast.lane.b32.xlu1 %v3522_v58, 264  ;;  %v6381_v58 = vld [vmem:[%s7617_s12 + $0x40] ss:$8 sps:$4 sm:$0xff]   ;;  %4120 = vmatprep.subr.bf16.mxu0 %v6383_v60 }
 0xd29   : > { %4121 = vmatpush1.bf16.msra.mxu0 %v6381_v58 }
 0xd2a   : > { %4122 = vmatprep.subr.bf16.mxu0 %v6389_v61 }
 0xd2d   : > { %4123 = vmatpush1.bf16.msra.mxu0 %v6387_v62 }
 0xd90   : > { %v3540_v63 = vpop.permute.xlu1 %3539  ;;  %v3536_v0 = vpop.permute.xlu0 %3535 }
 0xd91   : > { %v3577_v1 = vadd.f32 %v3571_v54, %v3540_v63  ;;  %v3576_v3 = vadd.f32 %v3571_v54, %v3536_v0 }
 0xd93   : > { %vm3581_vm8 = vcmp.gt.f32.partialorder %v3577_v1, 0.0  ;;  %v3585_v5 = vmul.f32 0.2, %v3577_v1  ;;  %vm3580_vm9 = vcmp.gt.f32.partialorder %v3576_v3, 0.0  ;;  %v3584_v7 = vmul.f32 0.2, %v3576_v3 }
 0xd94   : > { %v3525_v22 = vpop.permute.xlu1 %3524 }
 0xd95   : > { %v3574_v8 = vadd.f32 %v3567_v4, %v3525_v22  ;;  %v3588_v10 = vsel %vm3580_vm9, %v3576_v3, %v3584_v7  ;;  %v3589_v11 = vsel %vm3581_vm8, %v3577_v1, %v3585_v5  ;;  %v3827_v7 = vld [vmem:[%s7618_s15] sm:$0xf]  ;;  %s7620_s15 = sld [smem:[#allocation16_spill]] }
 0xd96   : > { %v3592_v12 = vadd.f32 %v6969_v6, %v3588_v10  ;;  %v3593_v59 = vadd.f32 %v6971_v9, %v3589_v11 }
 0xd97   : > { %vm3578_vm10 = vcmp.gt.f32.partialorder %v3574_v8, 0.0  ;;  %v3582_v25 = vmul.f32 0.2, %v3574_v8 }
 0xd98   : > { %v3529_v15 = vpop.permute.xlu1 %3528  ;;  %v3600_v16 = vsel %vm1768_vm5, %v3592_v12, -inf  ;;  %v3603_v17 = vsel %vm1768_vm5, %v3593_v59, -inf }
 0xd99   : > { %v3575_v18 = vadd.f32 %v3567_v4, %v3529_v15  ;;  %3601 = vmax.xlane.f32.xlu0 %v3600_v16  ;;  %3604 = vmax.xlane.f32.xlu1 %v3603_v17  ;;  %v3586_v19 = vsel %vm3578_vm10, %v3574_v8, %v3582_v25  ;;  %v6358_v25 = vld [vmem:[%s7619_s18 + $0x4] ss:$8 sps:$4 sm:$0xff]   ;;  %v6365_v16 = vld [vmem:[%s6864_s7 + $0x10] sm:$0xff]  }
 0xd9a   : > { %v3590_v20 = vadd.f32 %v6969_v6, %v3586_v19  ;;  %v6352_v15 = vld [vmem:[%s6864_s7 + $0x8] sm:$0xff]   ;;  %v6364_v17 = vld [vmem:[%s7619_s18 + $0x14] ss:$8 sps:$4 sm:$0xff]  }
 0xd9b   : > { %vm3579_vm11 = vcmp.gt.f32.partialorder %v3575_v18, 0.0  ;;  %v3583_v21 = vmul.f32 0.2, %v3575_v18  ;;  %v6372_v19 = vld [vmem:[%s7619_s18 + $0x24] ss:$8 sps:$4 sm:$0xff]  }
 0xd9c   : > { %v3594_v26 = vsel %vm1768_vm5, %v3590_v20, -inf }
 0xd9d   : > { %3595 = vmax.xlane.f32.xlu0 %v3594_v26  ;;  %v3587_v24 = vsel %vm3579_vm11, %v3575_v18, %v3583_v21  ;;  %v6362_v18 = vld [vmem:[%s7619_s18 + $0x10] ss:$8 sps:$4 sm:$0xff]   ;;  %v6370_v21 = vld [vmem:[%s7619_s18 + $0x20] ss:$8 sps:$4 sm:$0xff]  }
 0xd9e   : > { %v3591_v29 = vadd.f32 %v6971_v9, %v3587_v24  ;;  %v6379_v26 = vld [vmem:[%s6864_s7 + $0x20] sm:$0xff]   ;;  %v6378_v24 = vld [vmem:[%s7619_s18 + $0x34] ss:$8 sps:$4 sm:$0xff]  }
 0xda0   : > { %v3597_v30 = vsel %vm1768_vm5, %v3591_v29, -inf }
 0xda1   : > { %3598 = vmax.xlane.f32.xlu0 %v3597_v30  ;;  %v6386_v30 = vld [vmem:[%s7619_s18 + $0x44] ss:$8 sps:$4 sm:$0xff]  }
 0xe26   : > { %v3602_v23 = vpop.xlane.xlu0 %3601  ;;  %v3605_v27 = vpop.xlane.xlu1 %3604 }
 0xe27   : > { %v3608_v31 = vsub.f32 %v3592_v12, %v3602_v23  ;;  %v3609_v33 = vsub.f32 %v3593_v59, %v3605_v27  ;;  %v6351_v12 = vld [vmem:[%s6864_s7] sm:$0xff]   ;;  %v3900_v59 = vsel %vm1058_vm0, %v3827_v7, 0  ;;  %v6380_v23 = vld [vmem:[%s6864_s7 + $0x28] sm:$0xff]  }
 0xe28   : > { %v6384_v27 = vld [vmem:[%s7619_s18 + $0x40] ss:$8 sps:$4 sm:$0xff]  }
 0xe29   : > { %v3614_v34 = vmul.f32 1.442695, %v3608_v31  ;;  %v3616_v35 = vmul.f32 1.442695, %v3609_v33  ;;  %v6393_v31 = vld [vmem:[%s6864_s7 + $0x30] sm:$0xff]  }
 0xe2a   : > { %v3596_v36 = vpop.xlane.xlu0 %3595  ;;  %v6392_v33 = vld [vmem:[%s7619_s18 + $0x54] ss:$8 sps:$4 sm:$0xff]  }
 0xe2b   : > { %6519 = vpow2.f32 %v3614_v34  ;;  %v3606_v6 = vsub.f32 %v3590_v20, %v3596_v36  ;;  %v6366_v20 = vld [vmem:[%s6864_s7 + $0x18] sm:$0xff]   ;;  %v6397_v36 = vld [vmem:[%s7617_s12 + $0x64] ss:$8 sps:$4 sm:$0xff]  }
 0xe2c   : > { %6521 = vpow2.f32 %v3616_v35  ;;  %v6390_v34 = vld [vmem:[%s7619_s18 + $0x50] ss:$8 sps:$4 sm:$0xff]   ;;  %4124 = vmatprep.subr.bf16.mxu0 %v6397_v36 }
 0xe2d   : > { %v3610_v28 = vmul.f32 1.442695, %v3606_v6  ;;  %v6394_v35 = vld [vmem:[%s6864_s7 + $0x38] sm:$0xff]   ;;  %v6400_v6 = vld [vmem:[%s7619_s18 + $0x64] ss:$8 sps:$4 sm:$0xff]   ;;  %s7622_s7 = sld [smem:[#allocation21_spill]] }
 0xe2e   : > { %v3599_v37 = vpop.xlane.xlu0 %3598 }
 0xe2f   : > { %6523 = vpow2.f32 %v3610_v28  ;;  %v3607_v38 = vsub.f32 %v3591_v29, %v3599_v37  ;;  %v6376_v29 = vld [vmem:[%s7619_s18 + $0x30] ss:$8 sps:$4 sm:$0xff]   ;;  %v6395_v28 = vld [vmem:[%s7617_s12 + $0x60] ss:$8 sps:$4 sm:$0xff]  }
 0xe30   : > { %v6398_v37 = vld [vmem:[%s7619_s18 + $0x60] ss:$8 sps:$4 sm:$0xff]   ;;  %4125 = vmatpush1.bf16.msra.mxu0 %v6395_v28 }
 0xe31   : > { %v3612_v9 = vmul.f32 1.442695, %v3607_v38  ;;  %v6403_v38 = vld [vmem:[%s7617_s12 + $0x74] ss:$8 sps:$4 sm:$0xff]  }
 0xe32   : > { %4126 = vmatprep.subr.bf16.mxu0 %v6403_v38 }
 0xe33   : > { %6525 = vpow2.f32 %v3612_v9  ;;  %v6406_v9 = vld [vmem:[%s7619_s18 + $0x74] ss:$8 sps:$4 sm:$0xff]  }
 0xe35   : > { %v6520_v41 = vpop.eup %6519 }
 0xe36   : > { %v6522_v32 = vpop.eup %6521  ;;  %v3624_v43 = vsel %vm1768_vm5, %v6520_v41, 0.0 }
 0xe37   : > { %3625 = vadd.xlane.f32.xlu0 %v3624_v43  ;;  %v3627_v44 = vsel %vm1768_vm5, %v6522_v32, 0.0 }
 0xe38   : > { %3628 = vadd.xlane.f32.xlu1 %v3627_v44  ;;  %v5602_v44 = vld [vmem:[%s7620_s15] ss:$0 sm:$0xff]  ;;  %s5717_s15 = sshll.u32 %s6821_s0, 4  ;;  %s6636_s0 = smov [#allocation3]  }
 0xe39   : > { %v6524_v46 = vpop.eup %6523  ;;  %s7537_s3 = scalar_lea.hbm %s6798_s20, %s5717_s15  ;;  %s6539_s6 = sshll.u32 %s6636_s0, 4  ;;  %s6540_s6 = int_to_ptr.vmem [resolvable:$false] %s6539_s6 }
 0xe3a   : > { %v3618_v47 = vsel %vm1768_vm5, %v6524_v46, 0.0 }
 0xe3b   : > { %3619 = vadd.xlane.f32.xlu0 %v3618_v47 }
 0xe3d   : > { %v6526_v14 = vpop.eup %6525 }
 0xe3e   : > { %v3621_v49 = vsel %vm1768_vm5, %v6526_v14, 0.0 }
 0xe3f   : > { %3622 = vadd.xlane.f32.xlu1 %v3621_v49  ;;  %v5603_v49 = vld [vmem:[%s7621_s2] ss:$0 sm:$0xff]  ;;  %s7623_s2 = sld [smem:[#allocation23_spill]] }
 0xec4   : > { %v3626_v13 = vpop.xlane.xlu0 %3625 }
 0xec5   : > { %6527 = vrcp.f32 %v3626_v13  ;;  %v3629_v54 = vpop.xlane.xlu1 %3628 }
 0xec6   : > { %6529 = vrcp.f32 %v3629_v54 }
 0xec8   : > { %v3620_v63 = vpop.xlane.xlu0 %3619 }
 0xec9   : > { %6531 = vrcp.f32 %v3620_v63 }
 0xecc   : > { %v3623_v0 = vpop.xlane.xlu1 %3622 }
 0xecd   : > { %6533 = vrcp.f32 %v3623_v0 }
 0xecf   : > { %v6528_v1 = vpop.eup %6527 }
 0xed0   : > { %v6530_v3 = vpop.eup %6529  ;;  %v3635_v4 = vmul.f32 %v6528_v1, %v6520_v41  ;;  %v6401_v41 = vld [vmem:[%s7617_s12 + $0x70] ss:$8 sps:$4 sm:$0xff]  }
 0xed1   : > { %v3637_v5 = vmul.f32 %v6530_v3, %v6522_v32  ;;  %v6404_v32 = vld [vmem:[%s7619_s18 + $0x70] ss:$8 sps:$4 sm:$0xff]   ;;  %4127 = vmatpush1.bf16.msra.mxu0 %v6401_v41 }
 0xed2   : > { %5927 = vmatprep.mubr.msk.f32.mxu1 %vm1768_vm5, %v3635_v4 }
 0xed3   : > { %v6532_v22 = vpop.eup %6531  ;;  %5928 = vmatmul.mubr.msk.f32.vlgmr.msra.gmra.mrb[24].mxu1 %vm1768_vm5, %v3637_v5 }
 0xed4   : > { %6029 = vmatpush3.bf16.msra.mxu1 %v7201_v40  ;;  %v3631_v8 = vmul.f32 %v6532_v22, %v6524_v46  ;;  %v6356_v40 = vld [vmem:[%s7619_s18] ss:$8 sps:$4 sm:$0xff]  }
 0xed5   : > { %6148 = vmatprep.subr.msk.bf16.mxu1 %vm1058_vm0, %v3827_v7  ;;  %vm4740_vm0 = vcmask 523264  }
 0xed6   : > { %5934 = vmatprep.mubr.msk.f32.mxu1 %vm1768_vm5, %v3631_v8 }
 0xed7   : > { %v6534_v10 = vpop.eup %6533 }
 0xed8   : > { %v3633_v11 = vmul.f32 %v6534_v10, %v6526_v14 }
 0xedb   : > { %5935 = vmatmul.mubr.msk.f32.vlgmr.msra.gmra.mrb[24].mxu1 %vm1768_vm5, %v3633_v11 }
 0xedc   : > { %5938 = vmatpush3.bf16.msra.mxu1 %v3900_v59  ;;  %5939 = vmatprep.mubr.msk.bf16.mxu1 %vm1054_vm2, %v6351_v12 }
 0xedd   : > { %4253 = vmatprep.subr.bf16.mxu1 %v6358_v25 }
 0xedf   : > { %5940 = vmatmul.mubr.msk.bf16.vlgmr.msra.gmra.mrb[28].mxu1 %vm1054_vm2, %v6352_v15 }
 0xee0   : > { %4254 = vmatpush1.bf16.msra.mxu1 %v6356_v40  ;;  %5943 = vmatprep.mubr.msk.bf16.mxu1 %vm1054_vm2, %v6365_v16 }
 0xee1   : > { %4255 = vmatprep.subr.bf16.mxu1 %v6364_v17 }
 0xee4   : > { %4256 = vmatpush1.bf16.msra.mxu1 %v6362_v18 }
 0xee5   : > { %4257 = vmatprep.subr.bf16.mxu1 %v6372_v19 }
 0xee7   : > { %5944 = vmatmul.mubr.msk.bf16.gmra.mrb[32].mxu1 %vm1054_vm2, %v6366_v20 }
 0xee8   : > { %4258 = vmatpush1.bf16.msra.mxu1 %v6370_v21  ;;  %5947 = vmatprep.mubr.msk.bf16.mxu1 %vm1054_vm2, %v6379_v26 }
 0xee9   : > { %4259 = vmatprep.subr.bf16.mxu1 %v6378_v24 }
 0xeec   : > { %4260 = vmatpush1.bf16.msra.mxu1 %v6376_v29 }
 0xeed   : > { %4261 = vmatprep.subr.bf16.mxu1 %v6386_v30 }
 0xeef   : > { %5948 = vmatmul.mubr.msk.bf16.gmra.mrb[36].mxu1 %vm1054_vm2, %v6380_v23 }
 0xef0   : > { %4262 = vmatpush1.bf16.msra.mxu1 %v6384_v27  ;;  %5951 = vmatprep.mubr.msk.bf16.mxu1 %vm1054_vm2, %v6393_v31 }
 0xef1   : > { %4263 = vmatprep.subr.bf16.mxu1 %v6392_v33 }
 0xef4   : > { %4264 = vmatpush1.bf16.msra.mxu1 %v6390_v34 }
 0xef5   : > { %4265 = vmatprep.subr.bf16.mxu1 %v6400_v6 }
 0xef7   : > { %5952 = vmatmul.mubr.msk.bf16.gmra.mrb[40].mxu1 %vm1054_vm2, %v6394_v35 }
 0xef8   : > { %4266 = vmatpush1.bf16.msra.mxu1 %v6398_v37  ;;  %4285 = vmatprep.mubr.bf16.mxu1 %v6632_v48 }
 0xef9   : > { %4267 = vmatprep.subr.bf16.mxu1 %v6406_v9 }
 0xefc   : > { %4268 = vmatpush1.bf16.msra.mxu1 %v6404_v32 }
 0xfae   : > { %v5936_v43 = vpop.f32.mrb[24].mxu1 }
 0xfaf   : > { %v3801_v46 = vmul.f32 0.5, %v5936_v43  ;;  %v3791_v47 = vpop.f32.mrb[25].mxu1 }
 0xfb0   : > { %v3800_v14 = vmul.f32 0.5, %v3791_v47 }
 0xfb1   : > { %v3810_v50 = vadd.f32 %v5602_v44, %v3801_v46 }
 0xfb2   : > { %v3809_v51 = vadd.f32 %v5602_v44, %v3800_v14  ;;  %v5941_v52 = vpop.f32.mrb[28].mxu1 }
 0xfb3   : > { %v3945_v53 = vadd.f32 %v5941_v52, %v5603_v49  ;;  %v3936_v55 = vpop.f32.mrb[29].mxu1 }
 0xfb4   : > { %v4015_v56 = vpack.c.bf16 %v3810_v50, %v3809_v51  ;;  %v3937_v57 = vadd.f32 %v5603_v49, %v3936_v55  ;;  %v5942_v45 = vpop.f32.mrb[30].mxu1 }
 0xfb5   : > { %v4001_v58 = vmax.f32 %v3945_v53, 0.0  ;;  %v3948_v60 = vadd.f32 %v5942_v45, %v5603_v49  ;;  %v3939_v61 = vpop.f32.mrb[31].mxu1 }
 0xfb6   : > { %4145 = vmatmul.mubr.bf16.vlgmr.msra.gmra.mrb[28].mxu0 %v4015_v56  ;;  %4286 = vmatmul.mubr.bf16.vlgmr.msra.gmra.mrb[44].mxu1 %v4015_v56  ;;  %v3999_v62 = vmax.f32 %v3937_v57, 0.0  ;;  %v3940_v13 = vadd.f32 %v5603_v49, %v3939_v61 }
 0xfb7   : > { %v4002_v54 = vmax.f32 %v3948_v60, 0.0  ;;  %4603 = vmatprep.mubr.bf16.mxu0 %v6632_v48  ;;  %4426 = vmatprep.mubr.bf16.mxu1 %v6632_v48 }
 0xfb8   : > { %v4000_v63 = vmax.f32 %v3940_v13, 0.0  ;;  %v6435_v13 = vld [vmem:[%s7623_s2 + $0x40] sm:$0xff]  }
 0xfb9   : > { %v7290_v0 = vpack.c.bf16 %v4002_v54, %v4001_v58  ;;  %v6407_v54 = vld [vmem:[%s6867_s25] sm:$0xff]  }
 0xfba   : > { %v7292_v1 = vpack.c.bf16 %v4000_v63, %v3999_v62  ;;  %v5945_v3 = vpop.f32.mrb[32].mxu1  ;;  %v6410_v62 = vld [vmem:[%s7622_s7 + $0x4] ss:$8 sps:$4 sm:$0xff]  }
 0xfbb   : > { %v3961_v4 = vadd.f32 %v5945_v3, %v5603_v49  ;;  %v3952_v5 = vpop.f32.mrb[33].mxu1  ;;  %v6427_v63 = vld [vmem:[%s6870_s10] sm:$0xff]  }
 0xfbc   : > { %v3953_v7 = vadd.f32 %v5603_v49, %v3952_v5  ;;  %v5946_v22 = vpop.f32.mrb[34].mxu1  ;;  %v6408_v3 = vld [vmem:[%s7622_s7] ss:$8 sps:$4 sm:$0xff]  }
 0xfbd   : > { %v4005_v8 = vmax.f32 %v3961_v4, 0.0  ;;  %v3964_v10 = vadd.f32 %v5946_v22, %v5603_v49  ;;  %v3955_v11 = vpop.f32.mrb[35].mxu1  ;;  %v6415_v4 = vld [vmem:[%s7622_s7 + $0x14] ss:$8 sps:$4 sm:$0xff]   ;;  %v6436_v5 = vld [vmem:[%s7623_s2] sm:$0xff]  }
 0xfbe   : > { %v4003_v12 = vmax.f32 %v3953_v7, 0.0  ;;  %v3956_v59 = vadd.f32 %v5603_v49, %v3955_v11  ;;  %v6437_v7 = vld [vmem:[%s7623_s2 + $0x48] sm:$0xff]   ;;  %v6413_v22 = vld [vmem:[%s7622_s7 + $0x10] ss:$8 sps:$4 sm:$0xff]  }
 0xfbf   : > { %v4006_v25 = vmax.f32 %v3964_v10, 0.0  ;;  %v6438_v10 = vld [vmem:[%s7623_s2 + $0x8] sm:$0xff]  }
 0xfc0   : > { %v4004_v15 = vmax.f32 %v3956_v59, 0.0  ;;  %v6411_v11 = vld [vmem:[%s6867_s25 + $0x8] sm:$0xff]  }
 0xfc1   : > { %v7294_v40 = vpack.c.bf16 %v4006_v25, %v4005_v8  ;;  %v6420_v8 = vld [vmem:[%s7622_s7 + $0x24] ss:$8 sps:$4 sm:$0xff]   ;;  %v6418_v59 = vld [vmem:[%s7622_s7 + $0x20] ss:$8 sps:$4 sm:$0xff]   ;;  %v6425_v25 = vld [vmem:[%s7622_s7 + $0x34] ss:$8 sps:$4 sm:$0xff]  }
 0xfc2   : > { %v7296_v16 = vpack.c.bf16 %v4004_v15, %v4003_v12  ;;  %v5949_v17 = vpop.f32.mrb[36].mxu1  ;;  %v6428_v12 = vld [vmem:[%s6870_s10 + $0x8] sm:$0xff]   ;;  %v6439_v15 = vld [vmem:[%s7623_s2 + $0x50] sm:$0xff]  }
 0xfc3   : > { %v3977_v18 = vadd.f32 %v5949_v17, %v5603_v49  ;;  %v3968_v19 = vpop.f32.mrb[37].mxu1  ;;  %v6440_v17 = vld [vmem:[%s7623_s2 + $0x10] sm:$0xff]  }
 0xfc4   : > { %v3969_v20 = vadd.f32 %v5603_v49, %v3968_v19  ;;  %v5950_v21 = vpop.f32.mrb[38].mxu1  ;;  %v6441_v19 = vld [vmem:[%s7623_s2 + $0x58] sm:$0xff]  }
 0xfc5   : > { %v4009_v26 = vmax.f32 %v3977_v18, 0.0  ;;  %v3980_v24 = vadd.f32 %v5950_v21, %v5603_v49  ;;  %v3971_v29 = vpop.f32.mrb[39].mxu1  ;;  %v6423_v18 = vld [vmem:[%s7622_s7 + $0x30] ss:$8 sps:$4 sm:$0xff]   ;;  %s6541_s7 = scalar_lea.vmem %s6540_s6, 32 }
 0xfc6   : > { %v4007_v30 = vmax.f32 %v3969_v20, 0.0  ;;  %v3972_v23 = vadd.f32 %v5603_v49, %v3971_v29  ;;  %v6412_v20 = vld [vmem:[%s6867_s25 + $0x10] sm:$0xff]   ;;  %v6444_v29 = vld [vmem:[%s7623_s2 + $0x20] sm:$0xff]  }
 0xfc7   : > { %v4010_v27 = vmax.f32 %v3980_v24, 0.0  ;;  %v6429_v21 = vld [vmem:[%s6870_s10 + $0x10] sm:$0xff]   ;;  %v6443_v24 = vld [vmem:[%s7623_s2 + $0x60] sm:$0xff]  }
 0xfc8   : > { %v4008_v31 = vmax.f32 %v3972_v23, 0.0  ;;  %v6416_v23 = vld [vmem:[%s6867_s25 + $0x18] sm:$0xff]  }
 0xfc9   : > { %v7298_v33 = vpack.c.bf16 %v4010_v27, %v4009_v26  ;;  %v6442_v26 = vld [vmem:[%s7623_s2 + $0x18] sm:$0xff]  }
 0xfca   : > { %v7300_v34 = vpack.c.bf16 %v4008_v31, %v4007_v30  ;;  %v5953_v35 = vpop.f32.mrb[40].mxu1  ;;  %v6445_v30 = vld [vmem:[%s7623_s2 + $0x68] sm:$0xff]   ;;  %v6430_v27 = vld [vmem:[%s6870_s10 + $0x18] sm:$0xff]  }
 0xfcb   : > { %v3993_v36 = vadd.f32 %v5953_v35, %v5603_v49  ;;  %v3984_v6 = vpop.f32.mrb[41].mxu1  ;;  %v6446_v31 = vld [vmem:[%s7623_s2 + $0x28] sm:$0xff]   ;;  %v6417_v35 = vld [vmem:[%s6867_s25 + $0x20] sm:$0xff]  }
 0xfcc   : > { %v3985_v28 = vadd.f32 %v5603_v49, %v3984_v6  ;;  %v5954_v37 = vpop.f32.mrb[42].mxu1  ;;  %v6421_v6 = vld [vmem:[%s6867_s25 + $0x28] sm:$0xff]  }
 0xfcd   : > { %v4013_v38 = vmax.f32 %v3993_v36, 0.0  ;;  %v3996_v9 = vadd.f32 %v5954_v37, %v5603_v49  ;;  %v3987_v41 = vpop.f32.mrb[43].mxu1  ;;  %v6431_v36 = vld [vmem:[%s6870_s10 + $0x20] sm:$0xff]   ;;  %v6422_v37 = vld [vmem:[%s6867_s25 + $0x30] sm:$0xff]  }
 0xfce   : > { %v4011_v32 = vmax.f32 %v3985_v28, 0.0  ;;  %v3988_v43 = vadd.f32 %v5603_v49, %v3987_v41  ;;  %v6432_v28 = vld [vmem:[%s6870_s10 + $0x28] sm:$0xff]   ;;  %v6434_v41 = vld [vmem:[%s6870_s10 + $0x38] sm:$0xff]  }
 0xfcf   : > { %v4014_v44 = vmax.f32 %v3996_v9, 0.0  ;;  %v6426_v9 = vld [vmem:[%s6867_s25 + $0x38] sm:$0xff]   ;;  %s7624_s25 = sld [smem:[#allocation22_spill]] }
 0xfd0   : > { %v4012_v46 = vmax.f32 %v3988_v43, 0.0 }
 0xfd1   : > { %v7302_v47 = vpack.c.bf16 %v4014_v44, %v4013_v38  ;;  %v6433_v38 = vld [vmem:[%s6870_s10 + $0x30] sm:$0xff]   ;;  %s1011_s10 = sand.u32 1, %s6589_s23  }
 0xfd2   : > { %v7304_v14 = vpack.c.bf16 %v4012_v46, %v4011_v32 }
0x1089   : > { %v4146_v50 = vpop.f32.mrb[28].mxu0  ;;  %v4287_v51 = vpop.f32.mrb[44].mxu1 }
0x108a   : > { %v4148_v52 = vpop.f32.mrb[29].mxu0  ;;  %v4289_v53 = vpop.f32.mrb[45].mxu1 }
0x108b   : > { %v4150_v55 = vpop.f32.mrb[30].mxu0  ;;  %v4291_v56 = vpop.f32.mrb[46].mxu1 }
0x108c   : > { %v4155_v57 = vpack.c.bf16 %v4150_v55, %v4146_v50  ;;  %v4296_v49 = vpack.c.bf16 %v4291_v56, %v4287_v51  ;;  %v4152_v45 = vpop.f32.mrb[31].mxu0  ;;  %v4293_v58 = vpop.f32.mrb[47].mxu1 }
0x108d   : > { %v4156_v60 = vpack.c.bf16 %v4152_v45, %v4148_v52  ;;  %v4297_v61 = vpack.c.bf16 %v4293_v58, %v4289_v53 }
0x108f   : > { %4394 = vmatprep.subr.bf16.mxu1 %v4297_v61  ;;  %4571 = vmatprep.subr.bf16.mxu0 %v4156_v60 }
0x1090   : > { %4395 = vmatpush1.bf16.msra.mxu1 %v4296_v49  ;;  %4572 = vmatpush1.bf16.msra.mxu0 %v4155_v57 }
0x1091   : > { %4765 = vmatprep.subr.bf16.mxu0 %v6410_v62  ;;  %5780 = vmatprep.subr.bf16.mxu1 %v6435_v13 }
0x1093   : > { %5676 = vmatmul.mubr.msk.bf16.vlgmr.msra.gmra.mrb[32].mxu0 %vm1768_vm5, %v6407_v54  ;;  %5660 = vmatmul.mubr.msk.bf16.vlgmr.msra.gmra.mrb[48].mxu1 %vm1768_vm5, %v6427_v63 }
0x1094   : > { %4766 = vmatpush1.bf16.msra.mxu0 %v6408_v3  ;;  %4613 = vmatprep.mubr.bf16.mxu0 %v6632_v48 }
0x1095   : > { %4767 = vmatprep.subr.bf16.mxu0 %v6415_v4  ;;  %4436 = vmatprep.mubr.bf16.mxu1 %v6632_v48 }
0x1096   : > { %5781 = vmatpush3.bf16.msra.mxu1 %v6436_v5 }
0x1097   : > { %5782 = vmatprep.subr.bf16.mxu1 %v6437_v7 }
0x1098   : > { %4768 = vmatpush1.bf16.msra.mxu0 %v6413_v22 }
0x1099   : > { %4769 = vmatprep.subr.bf16.mxu0 %v6420_v8 }
0x109a   : > { %5783 = vmatpush3.bf16.msra.mxu1 %v6438_v10  ;;  %v4910_v10 = vld [vmem:[%s7624_s25] sm:$0x3]  ;;  %s1012_s25 = scalar_lea.vmem [#allocation3], %s1011_s10 }
0x109b   : > { %5677 = vmatmul.mubr.msk.bf16.gmra.mrb[36].mxu0 %vm1768_vm5, %v6411_v11  ;;  %5661 = vmatmul.mubr.msk.bf16.gmra.mrb[52].mxu1 %vm1768_vm5, %v6428_v12  ;;  %v7444_v11 = vrot.slane %v4910_v10, %v6949_v42  ;;  %v7447_v12 = vrot.slane %v4910_v10, %v6946_v39 }
0x109c   : > { %4623 = vmatprep.mubr.bf16.mxu0 %v6632_v48  ;;  %4770 = vmatpush1.bf16.msra.mxu0 %v6418_v59 }
0x109d   : > { %4771 = vmatprep.subr.bf16.mxu0 %v6425_v25  ;;  %4446 = vmatprep.mubr.bf16.mxu1 %v6632_v48 }
0x109e   : > { %5784 = vmatprep.subr.bf16.mxu1 %v6439_v15 }
0x109f   : > { %5785 = vmatpush3.bf16.msra.mxu1 %v6440_v17 }
0x10a0   : > { %4772 = vmatpush1.bf16.msra.mxu0 %v6423_v18  ;;  %5786 = vmatprep.subr.bf16.mxu1 %v6441_v19 }
0x10a3   : > { %5678 = vmatmul.mubr.msk.bf16.gmra.mrb[40].mxu0 %vm1768_vm5, %v6412_v20  ;;  %5662 = vmatmul.mubr.msk.bf16.gmra.mrb[56].mxu1 %vm1768_vm5, %v6429_v21 }
0x10a4   : > { %4633 = vmatprep.mubr.bf16.mxu0 %v6632_v48  ;;  %4456 = vmatprep.mubr.bf16.mxu1 %v6632_v48 }
0x10a5   : > { %5787 = vmatpush3.bf16.msra.mxu1 %v6442_v26 }
0x10a6   : > { %5788 = vmatprep.subr.bf16.mxu1 %v6443_v24 }
0x10a9   : > { %5789 = vmatpush3.bf16.msra.mxu1 %v6444_v29 }
0x10aa   : > { %5790 = vmatprep.subr.bf16.mxu1 %v6445_v30 }
0x10ab   : > { %5679 = vmatmul.mubr.msk.bf16.gmra.mrb[44].mxu0 %vm1768_vm5, %v6416_v23  ;;  %5663 = vmatmul.mubr.msk.bf16.gmra.mrb[60].mxu1 %vm1768_vm5, %v6430_v27 }
0x10ac   : > { %4643 = vmatprep.mubr.bf16.mxu0 %v6632_v48  ;;  %4466 = vmatprep.mubr.bf16.mxu1 %v6632_v48 }
0x10ad   : > { %5791 = vmatpush3.bf16.msra.mxu1 %v6446_v31 }
0x10b3   : > { %5680 = vmatmul.mubr.msk.bf16.gmra.mrb[48].mxu0 %vm1768_vm5, %v6417_v35  ;;  %5664 = vmatmul.mubr.msk.bf16.gmra.mrb[64].mxu1 %vm1768_vm5, %v6431_v36 }
0x10b4   : > { %4653 = vmatprep.mubr.bf16.mxu0 %v6632_v48  ;;  %4476 = vmatprep.mubr.bf16.mxu1 %v6632_v48 }
0x10bb   : > { %5681 = vmatmul.mubr.msk.bf16.gmra.mrb[52].mxu0 %vm1768_vm5, %v6421_v6  ;;  %5665 = vmatmul.mubr.msk.bf16.gmra.mrb[68].mxu1 %vm1768_vm5, %v6432_v28 }
0x10bc   : > { %4663 = vmatprep.mubr.bf16.mxu0 %v6632_v48  ;;  %4486 = vmatprep.mubr.bf16.mxu1 %v6632_v48 }
0x10c3   : > { %5682 = vmatmul.mubr.msk.bf16.gmra.mrb[56].mxu0 %vm1768_vm5, %v6422_v37  ;;  %5666 = vmatmul.mubr.msk.bf16.gmra.mrb[72].mxu1 %vm1768_vm5, %v6433_v38 }
0x10c4   : > { %4673 = vmatprep.mubr.bf16.mxu0 %v6632_v48  ;;  %4496 = vmatprep.mubr.bf16.mxu1 %v6632_v48 }
0x10cb   : > { %5683 = vmatmul.mubr.msk.bf16.gmra.mrb[60].mxu0 %vm1768_vm5, %v6426_v9  ;;  %5667 = vmatmul.mubr.msk.bf16.gmra.mrb[76].mxu1 %vm1768_vm5, %v6434_v41 }
0x10cc   : > { %4797 = vmatprep.mubr.bf16.mxu0 %v6632_v48 }
0x10d3   : > { %5692 = vmatmul.mubr.msk.bf16.vlgmr.msra.gmra.mrb[32].mxu0 %vm4740_vm0, %v7292_v1  ;;  %v6448_v1 = vld [vmem:[%s7623_s2 + $0x30] sm:$0xff]  }
0x10d4   : > { %4807 = vmatprep.mubr.bf16.mxu0 %v6632_v48 }
0x10db   : > { %5693 = vmatmul.mubr.msk.bf16.gmra.mrb[36].mxu0 %vm4740_vm0, %v7290_v0  ;;  %v6447_v0 = vld [vmem:[%s7623_s2 + $0x70] sm:$0xff]  }
0x10dc   : > { %4817 = vmatprep.mubr.bf16.mxu0 %v6632_v48  ;;  %5792 = vmatprep.subr.bf16.mxu1 %v6447_v0 }
0x10dd   : > { %5793 = vmatpush3.bf16.msra.mxu1 %v6448_v1 }
0x10e3   : > { %5694 = vmatmul.mubr.msk.bf16.gmra.mrb[40].mxu0 %vm4740_vm0, %v7296_v16  ;;  %v6450_v16 = vld [vmem:[%s7623_s2 + $0x38] sm:$0xff]  }
0x10e4   : > { %4827 = vmatprep.mubr.bf16.mxu0 %v6632_v48 }
0x10eb   : > { %5695 = vmatmul.mubr.msk.bf16.gmra.mrb[44].mxu0 %vm4740_vm0, %v7294_v40  ;;  %v6449_v40 = vld [vmem:[%s7623_s2 + $0x78] sm:$0xff]   ;;  %s5345_s2 = sshll.u32 %s1012_s25, 4  ;;  %s7539_s2 = int_to_ptr.vmem [resolvable:$true] %s5345_s2 }
0x10ec   : > { %4837 = vmatprep.mubr.bf16.mxu0 %v6632_v48  ;;  %5794 = vmatprep.subr.bf16.mxu1 %v6449_v40  ;;  %s6535_s5 = scalar_lea.vmem %s7539_s2, 16  ;;  %p6542_p0 = scmp.lt.s32.totalorder %s7539_s2, %s6540_s6 }
0x10ed   : > { %5795 = vmatpush3.bf16.msra.mxu1 %v6450_v16  ;;  %p6536_p11 = scmp.ne.s32.totalorder %s7539_s2, %s6535_s5  ;;  %p6543_p1 = scmp.lt.s32.totalorder %s6541_s7, %s6535_s5 }
0x10ef   : > { %p6537_p12 = pnand %p6536_p11, %p6838_p5  ;;  %p6544_p2 = por %p6543_p1, %p6542_p0 }
0x10f1   : > { %p6538_p13 = pneg %p6537_p12 }
0x10f3   : > { %5696 = vmatmul.mubr.msk.bf16.gmra.mrb[48].mxu0 %vm4740_vm0, %v7300_v34  ;;  %p6545_p3 = pnand %p6544_p2, %p6538_p13 }
0x10f4   : > { %4847 = vmatprep.mubr.bf16.mxu0 %v6632_v48 }
0x10fb   : > { %5697 = vmatmul.mubr.msk.bf16.gmra.mrb[52].mxu0 %vm4740_vm0, %v7298_v33 }
0x10fc   : > { %4857 = vmatprep.mubr.bf16.mxu0 %v6632_v48 }
0x1103   : > { %5698 = vmatmul.mubr.msk.bf16.gmra.mrb[56].mxu0 %vm4740_vm0, %v7304_v14 }
0x1104   : > { %4867 = vmatprep.mubr.bf16.mxu0 %v6632_v48 }
0x110b   : > { %5699 = vmatmul.mubr.msk.bf16.gmra.mrb[60].mxu0 %vm4740_vm0, %v7302_v47 }
0x110c   : > { %5987 = vmatprep.mubr.msk.f32.mxu0 %vm6631_vm1, %v6630_v2 }
0x1166   : > { %v4428_v33 = vpop.f32.mrb[48].mxu1 }
0x1167   : > { %v4430_v34 = vpop.f32.mrb[49].mxu1 }
0x1168   : > { %v4432_v32 = vpop.f32.mrb[50].mxu1 }
0x1169   : > { %v4434_v43 = vpop.f32.mrb[51].mxu1 }
0x116e   : > { %v4438_v44 = vpop.f32.mrb[52].mxu1 }
0x116f   : > { %v4440_v46 = vpop.f32.mrb[53].mxu1 }
0x1170   : > { %v4442_v48 = vpop.f32.mrb[54].mxu1 }
0x1171   : > { %v4444_v14 = vpop.f32.mrb[55].mxu1 }
0x1176   : > { %v7394_v47 = vpop.f32.mrb[56].mxu1 }
0x1177   : > { %v7396_v50 = vpop.f32.mrb[57].mxu1 }
0x1178   : > { %v7398_v2 = vpop.f32.mrb[58].mxu1 }
0x1179   : > { %v7400_v51 = vpop.f32.mrb[59].mxu1 }
0x117e   : > { %v7402_v52 = vpop.f32.mrb[60].mxu1 }
0x117f   : > { %v7404_v53 = vpop.f32.mrb[61].mxu1 }
0x1180   : > { %v7406_v55 = vpop.f32.mrb[62].mxu1 }
0x1181   : > { %v7408_v56 = vpop.f32.mrb[63].mxu1 }
0x1186   : > { %v7410_v57 = vpop.f32.mrb[64].mxu1 }
0x1187   : > { %v7412_v49 = vpop.f32.mrb[65].mxu1 }
0x1188   : > { %v7414_v45 = vpop.f32.mrb[66].mxu1 }
0x1189   : > { %v7416_v58 = vpop.f32.mrb[67].mxu1 }
0x118e   : > { %v7418_v60 = vpop.f32.mrb[68].mxu1 }
0x118f   : > { %v7420_v61 = vpop.f32.mrb[69].mxu1 }
0x1190   : > { %v7422_v62 = vpop.f32.mrb[70].mxu1 }
0x1191   : > { %v7424_v13 = vpop.f32.mrb[71].mxu1 }
0x1196   : > { %v7426_v54 = vpop.f32.mrb[72].mxu1 }
0x1197   : > { %v7428_v63 = vpop.f32.mrb[73].mxu1 }
0x1198   : > { %v7430_v3 = vpop.f32.mrb[74].mxu1 }
0x1199   : > { %v7432_v4 = vpop.f32.mrb[75].mxu1 }
0x119e   : > { %v7434_v5 = vpop.f32.mrb[76].mxu1 }
0x119f   : > { %v7436_v7 = vpop.f32.mrb[77].mxu1 }
0x11a0   : > { %v7438_v22 = vpop.f32.mrb[78].mxu1 }
0x11a1   : > { %v7440_v8 = vpop.f32.mrb[79].mxu1 }
0x11a6   : > { %v4799_v59 = vpop.f32.mrb[32].mxu0 }
0x11a7   : > { %v6054_v25 = vadd.f32 %v4799_v59, %v4428_v33  ;;  %v4801_v15 = vpop.f32.mrb[33].mxu0 }
0x11a8   : > { %v6055_v17 = vadd.f32 %v4801_v15, %v4430_v34  ;;  %v4803_v18 = vpop.f32.mrb[34].mxu0 }
0x11a9   : > { %v4922_v19 = vadd.f32 %v6054_v25, %v7444_v11  ;;  %v6056_v20 = vadd.f32 %v4803_v18, %v4432_v32  ;;  %v4805_v21 = vpop.f32.mrb[35].mxu0 }
0x11aa   : > { %v4923_v26 = vadd.f32 %v6055_v17, %v7447_v12  ;;  %v6057_v24 = vadd.f32 %v4805_v21, %v4434_v43 }
0x11ab   : > { %v4924_v29 = vadd.f32 %v6056_v20, %v7444_v11  ;;  %v4954_v23 = vmax.f32 %v4922_v19, 0.0 }
0x11ac   : > { %v4925_v30 = vadd.f32 %v6057_v24, %v7447_v12  ;;  %v4955_v39 = vmax.f32 %v4923_v26, 0.0 }
0x11ad   : > { %v4956_v27 = vmax.f32 %v4924_v29, 0.0 }
0x11ae   : > { %v4957_v31 = vmax.f32 %v4925_v30, 0.0  ;;  %v4809_v35 = vpop.f32.mrb[36].mxu0 }
0x11af   : > { %v4986_v36 = vpack.c.bf16 %v4956_v27, %v4954_v23  ;;  %v6058_v6 = vadd.f32 %v4809_v35, %v4438_v44  ;;  %v4811_v28 = vpop.f32.mrb[37].mxu0 }
0x11b0   : > { %v6059_v37 = vadd.f32 %v4811_v28, %v4440_v46  ;;  %v4813_v38 = vpop.f32.mrb[38].mxu0  ;;  %v4987_v9 = vpack.c.bf16 %v4957_v31, %v4955_v39 }
0x11b1   : > { %v4926_v41 = vadd.f32 %v6058_v6, %v7444_v11  ;;  %v6060_v0 = vadd.f32 %v4813_v38, %v4442_v48  ;;  %v4815_v1 = vpop.f32.mrb[39].mxu0 }
0x11b2   : > { %v4927_v40 = vadd.f32 %v6059_v37, %v7447_v12  ;;  %v6061_v16 = vadd.f32 %v4815_v1, %v4444_v14  ;;  %5169 = vmatprep.mubr.bf16.mxu1 %v4987_v9 }
0x11b3   : > { %v4928_v33 = vadd.f32 %v6060_v0, %v7444_v11  ;;  %5170 = vmatmul.mubr.bf16.vlgmr.msra.gmra.mrb[80].mxu1 %v4986_v36  ;;  %v4958_v32 = vmax.f32 %v4926_v41, 0.0 }
0x11b4   : > { %v4929_v34 = vadd.f32 %v6061_v16, %v7447_v12  ;;  %v4959_v44 = vmax.f32 %v4927_v40, 0.0 }
0x11b5   : > { %v4960_v43 = vmax.f32 %v4928_v33, 0.0 }
0x11b6   : > { %v4961_v10 = vmax.f32 %v4929_v34, 0.0  ;;  %v4819_v46 = vpop.f32.mrb[40].mxu0 }
0x11b7   : > { %v6062_v59 = vadd.f32 %v4819_v46, %v7394_v47  ;;  %v4821_v25 = vpop.f32.mrb[41].mxu0  ;;  %v4988_v15 = vpack.c.bf16 %v4960_v43, %v4958_v32 }
0x11b8   : > { %v6063_v48 = vadd.f32 %v4821_v25, %v7396_v50  ;;  %v4823_v17 = vpop.f32.mrb[42].mxu0  ;;  %v4989_v18 = vpack.c.bf16 %v4961_v10, %v4959_v44 }
0x11b9   : > { %v4930_v14 = vadd.f32 %v6062_v59, %v7444_v11  ;;  %v6064_v19 = vadd.f32 %v4823_v17, %v7398_v2  ;;  %v4825_v20 = vpop.f32.mrb[43].mxu0 }
0x11ba   : > { %v4931_v21 = vadd.f32 %v6063_v48, %v7447_v12  ;;  %v6065_v26 = vadd.f32 %v4825_v20, %v7400_v51  ;;  %5177 = vmatprep.mubr.bf16.mxu1 %v4989_v18 }
0x11bb   : > { %v4932_v24 = vadd.f32 %v6064_v19, %v7444_v11  ;;  %5178 = vmatmul.mubr.bf16.gmra.mrb[84].mxu1 %v4988_v15  ;;  %v4962_v29 = vmax.f32 %v4930_v14, 0.0 }
0x11bc   : > { %v4933_v47 = vadd.f32 %v6065_v26, %v7447_v12  ;;  %v4963_v50 = vmax.f32 %v4931_v21, 0.0 }
0x11bd   : > { %v4964_v30 = vmax.f32 %v4932_v24, 0.0 }
0x11be   : > { %v4965_v23 = vmax.f32 %v4933_v47, 0.0  ;;  %v4829_v27 = vpop.f32.mrb[44].mxu0 }
0x11bf   : > { %v6066_v39 = vadd.f32 %v4829_v27, %v7402_v52  ;;  %v4831_v31 = vpop.f32.mrb[45].mxu0  ;;  %v4990_v2 = vpack.c.bf16 %v4964_v30, %v4962_v29 }
0x11c0   : > { %v6067_v35 = vadd.f32 %v4831_v31, %v7404_v53  ;;  %v4833_v36 = vpop.f32.mrb[46].mxu0  ;;  %v4991_v6 = vpack.c.bf16 %v4965_v23, %v4963_v50 }
0x11c1   : > { %v4934_v51 = vadd.f32 %v6066_v39, %v7444_v11  ;;  %v6068_v28 = vadd.f32 %v4833_v36, %v7406_v55  ;;  %v4835_v37 = vpop.f32.mrb[47].mxu0 }
0x11c2   : > { %v4935_v38 = vadd.f32 %v6067_v35, %v7447_v12  ;;  %v6069_v9 = vadd.f32 %v4835_v37, %v7408_v56  ;;  %5185 = vmatprep.mubr.bf16.mxu1 %v4991_v6 }
0x11c3   : > { %v4936_v41 = vadd.f32 %v6068_v28, %v7444_v11  ;;  %5186 = vmatmul.mubr.bf16.gmra.mrb[88].mxu1 %v4990_v2  ;;  %v4966_v0 = vmax.f32 %v4934_v51, 0.0 }
0x11c4   : > { %v4937_v52 = vadd.f32 %v6069_v9, %v7447_v12  ;;  %v4967_v53 = vmax.f32 %v4935_v38, 0.0 }
0x11c5   : > { %v4968_v1 = vmax.f32 %v4936_v41, 0.0 }
0x11c6   : > { %v4969_v40 = vmax.f32 %v4937_v52, 0.0  ;;  %v4839_v16 = vpop.f32.mrb[48].mxu0 }
0x11c7   : > { %v6070_v33 = vadd.f32 %v4839_v16, %v7410_v57  ;;  %v4841_v34 = vpop.f32.mrb[49].mxu0  ;;  %v4992_v55 = vpack.c.bf16 %v4968_v1, %v4966_v0 }
0x11c8   : > { %v6071_v32 = vadd.f32 %v4841_v34, %v7412_v49  ;;  %v4843_v43 = vpop.f32.mrb[50].mxu0  ;;  %v4993_v44 = vpack.c.bf16 %v4969_v40, %v4967_v53 }
0x11c9   : > { %v4938_v56 = vadd.f32 %v6070_v33, %v7444_v11  ;;  %v6072_v10 = vadd.f32 %v4843_v43, %v7414_v45  ;;  %v4845_v46 = vpop.f32.mrb[51].mxu0 }
0x11ca   : > { %v4939_v59 = vadd.f32 %v6071_v32, %v7447_v12  ;;  %v6073_v25 = vadd.f32 %v4845_v46, %v7416_v58  ;;  %5193 = vmatprep.mubr.bf16.mxu1 %v4993_v44 }
0x11cb   : > { %v4940_v15 = vadd.f32 %v6072_v10, %v7444_v11  ;;  %5194 = vmatmul.mubr.bf16.gmra.mrb[92].mxu1 %v4992_v55  ;;  %v4970_v48 = vmax.f32 %v4938_v56, 0.0 }
0x11cc   : > { %v4941_v57 = vadd.f32 %v6073_v25, %v7447_v12  ;;  %v4971_v49 = vmax.f32 %v4939_v59, 0.0 }
0x11cd   : > { %v4972_v17 = vmax.f32 %v4940_v15, 0.0 }
0x11ce   : > { %v4973_v18 = vmax.f32 %v4941_v57, 0.0  ;;  %v4849_v14 = vpop.f32.mrb[52].mxu0 }
0x11cf   : > { %v6074_v19 = vadd.f32 %v4849_v14, %v7418_v60  ;;  %v4851_v20 = vpop.f32.mrb[53].mxu0  ;;  %v4994_v45 = vpack.c.bf16 %v4972_v17, %v4970_v48  ;;  %v5251_v17 = vld [vmem:[#allocation2] sm:$0x1] }
0x11d0   : > { %v6075_v21 = vadd.f32 %v4851_v20, %v7420_v61  ;;  %v4853_v26 = vpop.f32.mrb[54].mxu0  ;;  %v4995_v24 = vpack.c.bf16 %v4973_v18, %v4971_v49  ;;  %5254 = vperm.xlu0 %6225, %v5251_v17   ;;  %v7507_v49 = vld [vmem:[%s6785_s27] ss:$0 sm:$0xff] }
0x11d1   : > { %v4942_v58 = vadd.f32 %v6074_v19, %v7444_v11  ;;  %v6076_v47 = vadd.f32 %v4853_v26, %v7422_v62  ;;  %v4855_v29 = vpop.f32.mrb[55].mxu0 }
0x11d2   : > { %v4943_v30 = vadd.f32 %v6075_v21, %v7447_v12  ;;  %v6077_v50 = vadd.f32 %v4855_v29, %v7424_v13  ;;  %5201 = vmatprep.mubr.bf16.mxu1 %v4995_v24 }
0x11d3   : > { %v4944_v23 = vadd.f32 %v6076_v47, %v7444_v11  ;;  %5202 = vmatmul.mubr.bf16.gmra.mrb[96].mxu1 %v4994_v45  ;;  %v4974_v27 = vmax.f32 %v4942_v58, 0.0 }
0x11d4   : > { %v4945_v60 = vadd.f32 %v6077_v50, %v7447_v12  ;;  %v4975_v61 = vmax.f32 %v4943_v30, 0.0 }
0x11d5   : > { %v4976_v39 = vmax.f32 %v4944_v23, 0.0 }
0x11d6   : > { %v4977_v31 = vmax.f32 %v4945_v60, 0.0  ;;  %v4859_v2 = vpop.f32.mrb[56].mxu0 }
0x11d7   : > { %v6078_v35 = vadd.f32 %v4859_v2, %v7426_v54  ;;  %v4861_v36 = vpop.f32.mrb[57].mxu0  ;;  %v4996_v62 = vpack.c.bf16 %v4976_v39, %v4974_v27 }
0x11d8   : > { %v6079_v6 = vadd.f32 %v4861_v36, %v7428_v63  ;;  %v4863_v51 = vpop.f32.mrb[58].mxu0  ;;  %v4997_v28 = vpack.c.bf16 %v4977_v31, %v4975_v61 }
0x11d9   : > { %v4946_v13 = vadd.f32 %v6078_v35, %v7444_v11  ;;  %v6080_v37 = vadd.f32 %v4863_v51, %v7430_v3  ;;  %v4865_v38 = vpop.f32.mrb[59].mxu0 }
0x11da   : > { %v4947_v9 = vadd.f32 %v6079_v6, %v7447_v12  ;;  %v6081_v41 = vadd.f32 %v4865_v38, %v7432_v4  ;;  %5209 = vmatprep.mubr.bf16.mxu1 %v4997_v28 }
0x11db   : > { %v4948_v52 = vadd.f32 %v6080_v37, %v7444_v11  ;;  %5210 = vmatmul.mubr.bf16.gmra.mrb[100].mxu1 %v4996_v62  ;;  %v4978_v0 = vmax.f32 %v4946_v13, 0.0 }
0x11dc   : > { %v4949_v54 = vadd.f32 %v6081_v41, %v7447_v12  ;;  %v4979_v63 = vmax.f32 %v4947_v9, 0.0 }
0x11dd   : > { %v4980_v1 = vmax.f32 %v4948_v52, 0.0 }
0x11de   : > { %v4981_v53 = vmax.f32 %v4949_v54, 0.0  ;;  %v4869_v40 = vpop.f32.mrb[60].mxu0 }
0x11df   : > { %v6082_v16 = vadd.f32 %v4869_v40, %v7434_v5  ;;  %v4871_v33 = vpop.f32.mrb[61].mxu0  ;;  %v4998_v3 = vpack.c.bf16 %v4980_v1, %v4978_v0 }
0x11e0   : > { %v6083_v34 = vadd.f32 %v4871_v33, %v7436_v7  ;;  %v4873_v55 = vpop.f32.mrb[62].mxu0  ;;  %v4999_v32 = vpack.c.bf16 %v4981_v53, %v4979_v63 }
0x11e1   : > { %v4950_v4 = vadd.f32 %v6082_v16, %v7444_v11  ;;  %v6084_v43 = vadd.f32 %v4873_v55, %v7438_v22  ;;  %v4875_v44 = vpop.f32.mrb[63].mxu0  ;;  %v6635_v22 = vmov 0.0|0.0  }
0x11e2   : > { %v4951_v56 = vadd.f32 %v6083_v34, %v7447_v12  ;;  %v6085_v10 = vadd.f32 %v4875_v44, %v7440_v8  ;;  %5217 = vmatprep.mubr.bf16.mxu1 %v4999_v32  ;;  %6030 = vmatprep.subr.bf16.mxu0 %v6635_v22 }
0x11e3   : > { %v4952_v46 = vadd.f32 %v6084_v43, %v7444_v11  ;;  %5218 = vmatmul.mubr.bf16.gmra.mrb[104].mxu1 %v4998_v3  ;;  %v4982_v59 = vmax.f32 %v4950_v4, 0.0 }
0x11e4   : > { %v4953_v5 = vadd.f32 %v6085_v10, %v7447_v12  ;;  %v4983_v25 = vmax.f32 %v4951_v56, 0.0 }
0x11e5   : > { %v4984_v7 = vmax.f32 %v4952_v46, 0.0 }
0x11e6   : > { %v4985_v15 = vmax.f32 %v4953_v5, 0.0 }
0x11e7   : > { %v5000_v57 = vpack.c.bf16 %v4984_v7, %v4982_v59 }
0x11e8   : > { %v5001_v48 = vpack.c.bf16 %v4985_v15, %v4983_v25 }
0x11ea   : > { %5225 = vmatprep.mubr.bf16.mxu1 %v5001_v48 }
0x11eb   : > { %5226 = vmatmul.mubr.bf16.gmra.mrb[108].mxu1 %v5000_v57 }
0x1286   : > { %v5796_v8 = vpop.f32.mrb[80].mxu1 }
0x1287   : > { %v5797_v11 = vpop.f32.mrb[81].mxu1 }
0x1288   : > { %v5798_v18 = vadd.f32 %v5797_v11, %v5796_v8  ;;  %v5799_v14 = vpop.f32.mrb[82].mxu1 }
0x1289   : > { %v5800_v12 = vpop.f32.mrb[83].mxu1 }
0x128a   : > { %v5172_v19 = vadd.f32 %v5798_v18, %v7507_v49  ;;  %v5801_v20 = vadd.f32 %v5800_v12, %v5799_v14 }
0x128c   : > { %v5175_v45 = vadd.f32 %v5801_v20, %v7507_v49  ;;  %v5234_v21 = vmax.f32 %v5172_v19, 0.0 }
0x128e   : > { %v5235_v26 = vmax.f32 %v5175_v45, 0.0  ;;  %v5802_v24 = vpop.f32.mrb[84].mxu1 }
0x128f   : > { %v5803_v58 = vpop.f32.mrb[85].mxu1 }
0x1290   : > { %v6031_v47 = vpack.c.bf16 %v5235_v26, %v5234_v21  ;;  %v5804_v29 = vadd.f32 %v5803_v58, %v5802_v24  ;;  %v5805_v30 = vpop.f32.mrb[86].mxu1 }
0x1291   : > { %v5806_v50 = vpop.f32.mrb[87].mxu1 }
0x1292   : > { %v5180_v23 = vadd.f32 %v5804_v29, %v7507_v49  ;;  %v5807_v60 = vadd.f32 %v5806_v50, %v5805_v30  ;;  %6032 = vmatpush3.bf16.xpose.msra.mxu0 %v6031_v47 }
0x1293   : > { %6033 = vmatprep.subr.bf16.mxu0 %v6635_v22 }
0x1294   : > { %v5183_v27 = vadd.f32 %v5807_v60, %v7507_v49  ;;  %v5236_v39 = vmax.f32 %v5180_v23, 0.0 }
0x1296   : > { %v5237_v61 = vmax.f32 %v5183_v27, 0.0  ;;  %v5808_v31 = vpop.f32.mrb[88].mxu1 }
0x1297   : > { %v5809_v2 = vpop.f32.mrb[89].mxu1 }
0x1298   : > { %v6034_v35 = vpack.c.bf16 %v5237_v61, %v5236_v39  ;;  %v5810_v36 = vadd.f32 %v5809_v2, %v5808_v31  ;;  %v5811_v62 = vpop.f32.mrb[90].mxu1 }
0x1299   : > { %v5812_v6 = vpop.f32.mrb[91].mxu1 }
0x129a   : > { %v5188_v51 = vadd.f32 %v5810_v36, %v7507_v49  ;;  %v5813_v28 = vadd.f32 %v5812_v6, %v5811_v62  ;;  %6035 = vmatpush3.bf16.xpose.msra.mxu0 %v6034_v35 }
0x129b   : > { %6036 = vmatprep.subr.bf16.mxu0 %v6635_v22 }
0x129c   : > { %v5191_v13 = vadd.f32 %v5813_v28, %v7507_v49  ;;  %v5238_v37 = vmax.f32 %v5188_v51, 0.0  ;;  %v5250_v51 = vld [vmem:[%s7625_s4] sm:$0x1]  ;;  %v5255_v28 = vpop.permute.xlu0 %5254  ;;  %s5333_s4 = scalar_lea.sflag [#allocation4], %s1011_s10 }
0x129e   : > { %v5239_v38 = vmax.f32 %v5191_v13, 0.0  ;;  %v5814_v9 = vpop.f32.mrb[92].mxu1  ;;  %v5260_v13 = vrot.slane %v5255_v28, %v6949_v42 }
0x129f   : > { %v5815_v41 = vpop.f32.mrb[93].mxu1 }
0x12a0   : > { %v6037_v52 = vpack.c.bf16 %v5239_v38, %v5238_v37  ;;  %v5816_v54 = vadd.f32 %v5815_v41, %v5814_v9  ;;  %v5817_v0 = vpop.f32.mrb[94].mxu1 }
0x12a1   : > { %v5818_v1 = vpop.f32.mrb[95].mxu1 }
0x12a2   : > { %v5196_v63 = vadd.f32 %v5816_v54, %v7507_v49  ;;  %v5819_v53 = vadd.f32 %v5818_v1, %v5817_v0  ;;  %6038 = vmatpush3.bf16.xpose.msra.mxu0 %v6037_v52 }
0x12a3   : > { %6039 = vmatprep.subr.bf16.mxu0 %v6635_v22 }
0x12a4   : > { %v5199_v40 = vadd.f32 %v5819_v53, %v7507_v49  ;;  %v5240_v16 = vmax.f32 %v5196_v63, 0.0 }
0x12a6   : > { %v5241_v33 = vmax.f32 %v5199_v40, 0.0  ;;  %v5820_v3 = vpop.f32.mrb[96].mxu1 }
0x12a7   : > { %v5821_v34 = vpop.f32.mrb[97].mxu1 }
0x12a8   : > { %v6040_v55 = vpack.c.bf16 %v5241_v33, %v5240_v16  ;;  %v5822_v32 = vadd.f32 %v5821_v34, %v5820_v3  ;;  %v5823_v4 = vpop.f32.mrb[98].mxu1 }
0x12a9   : > { %v5824_v43 = vpop.f32.mrb[99].mxu1 }
0x12aa   : > { %v5204_v44 = vadd.f32 %v5822_v32, %v7507_v49  ;;  %v5825_v56 = vadd.f32 %v5824_v43, %v5823_v4  ;;  %6041 = vmatpush3.bf16.xpose.msra.mxu0 %v6040_v55 }
0x12ab   : > { %6042 = vmatprep.subr.bf16.mxu0 %v6635_v22 }
0x12ac   : > { %v5207_v10 = vadd.f32 %v5825_v56, %v7507_v49  ;;  %v5242_v46 = vmax.f32 %v5204_v44, 0.0 }
0x12ae   : > { %v5243_v5 = vmax.f32 %v5207_v10, 0.0  ;;  %v5826_v59 = vpop.f32.mrb[100].mxu1 }
0x12af   : > { %v5827_v7 = vpop.f32.mrb[101].mxu1 }
0x12b0   : > { %v6043_v25 = vpack.c.bf16 %v5243_v5, %v5242_v46  ;;  %v5828_v15 = vadd.f32 %v5827_v7, %v5826_v59  ;;  %v5829_v57 = vpop.f32.mrb[102].mxu1 }
0x12b1   : > { %v5830_v48 = vpop.f32.mrb[103].mxu1 }
0x12b2   : > { %v5212_v17 = vadd.f32 %v5828_v15, %v7507_v49  ;;  %v5831_v8 = vadd.f32 %v5830_v48, %v5829_v57  ;;  %6044 = vmatpush3.bf16.xpose.msra.mxu0 %v6043_v25 }
0x12b3   : > { %6045 = vmatprep.subr.bf16.mxu0 %v6635_v22 }
0x12b4   : > { %v5215_v11 = vadd.f32 %v5831_v8, %v7507_v49  ;;  %v5244_v18 = vmax.f32 %v5212_v17, 0.0 }
0x12b6   : > { %v5245_v14 = vmax.f32 %v5215_v11, 0.0  ;;  %v5832_v12 = vpop.f32.mrb[104].mxu1 }
0x12b7   : > { %v5833_v19 = vpop.f32.mrb[105].mxu1 }
0x12b8   : > { %v6046_v20 = vpack.c.bf16 %v5245_v14, %v5244_v18  ;;  %v5834_v45 = vadd.f32 %v5833_v19, %v5832_v12  ;;  %v5835_v21 = vpop.f32.mrb[106].mxu1 }
0x12b9   : > { %v5836_v26 = vpop.f32.mrb[107].mxu1 }
0x12ba   : > { %v5220_v24 = vadd.f32 %v5834_v45, %v7507_v49  ;;  %v5837_v58 = vadd.f32 %v5836_v26, %v5835_v21  ;;  %6047 = vmatpush3.bf16.xpose.msra.mxu0 %v6046_v20 }
0x12bb   : > { %6048 = vmatprep.subr.bf16.mxu0 %v6635_v22 }
0x12bc   : > { %v5223_v47 = vadd.f32 %v5837_v58, %v7507_v49  ;;  %v5246_v29 = vmax.f32 %v5220_v24, 0.0 }
0x12be   : > { %v5247_v30 = vmax.f32 %v5223_v47, 0.0  ;;  %v5838_v50 = vpop.f32.mrb[108].mxu1 }
0x12bf   : > { %v5839_v23 = vpop.f32.mrb[109].mxu1 }
0x12c0   : > { %v6049_v60 = vpack.c.bf16 %v5247_v30, %v5246_v29  ;;  %v5840_v27 = vadd.f32 %v5839_v23, %v5838_v50  ;;  %v5841_v39 = vpop.f32.mrb[110].mxu1 }
0x12c1   : > { %v5842_v61 = vpop.f32.mrb[111].mxu1 }
0x12c2   : > { %v5228_v31 = vadd.f32 %v5840_v27, %v7507_v49  ;;  %v5843_v2 = vadd.f32 %v5842_v61, %v5841_v39  ;;  %6050 = vmatpush3.bf16.xpose.msra.mxu0 %v6049_v60 }
0x12c3   : > { %6051 = vmatprep.subr.bf16.mxu0 %v6635_v22 }
0x12c4   : > { %v5231_v35 = vadd.f32 %v5843_v2, %v7507_v49  ;;  %v5248_v36 = vmax.f32 %v5228_v31, 0.0 }
0x12c6   : > { %v5249_v62 = vmax.f32 %v5231_v35, 0.0 }
0x12c8   : > { %v6052_v6 = vpack.c.bf16 %v5249_v62, %v5248_v36 }
0x12ca   : > { %6053 = vmatpush3.bf16.xpose.msra.mxu0 %v6052_v6 }
0x12d1   : > { %5988 = vmatmul.mubr.f32.vlgmr.msra.gmra.mrb[64].mxu0 %v5250_v51 }
0x13a4   : > { %v5327_v37 = vpop.f32.mrb[64].mxu0 }
0x13a5   : > { %v5328_v38 = vadd.f32 %v5327_v37, %v5260_v13  ;;  %v5989_v22 = vpop.f32.mrb[65].mxu0 }
0x13a7   : > { %5331 = vst [vmem:[%s1012_s25] sm:$0x1] %v5328_v38 }
0x13a8   : > { %6548 = shalt.err (!%p6545_p3)
}
0x13a9   : > { %s6549_s10 = scalar_lea.hbm %s7537_s3, 16  ;;  %s6553_s15 = scalar_lea.hbm %s6798_s20, 128 }
0x13aa   : > { %p6550_p4 = scmp.ne.s32.totalorder %s7537_s3, %s6549_s10  ;;  %p6554_p9 = scmp.lt.u32.totalorder %s7537_s3, %s6798_s20 }
0x13ab   : > { %p6555_p10 = scmp.lt.u32.totalorder %s6553_s15, %s6549_s10  ;;  %p6557_p12 = scmp.lt.u32.totalorder %s6549_s10, %s7537_s3 }
0x13ac   : > { %p6551_p7 = pnand %p6550_p4, %p6838_p5 }
0x13ad   : > { %p6556_p11 = por %p6555_p10, %p6554_p9 }
0x13ae   : > { %p6552_p8 = pneg %p6551_p7 }
0x13af   : > { %p6558_p0 = por %p6557_p12, %p6556_p11 }
0x13b1   : > { %p6559_p13 = pnand %p6558_p0, %p6552_p8 }
0x13b3   : > { %6562 = shalt.err (!%p6559_p13)
}
0x13b4   : > { %6149 = dma.vmem_to_hbm [thread:$0]  (%p6838_p5), %s7539_s2, 16, %s7537_s3, %s5333_s4  }
0x13b5 PF: > { %p6155_p1 = scmp.ge.s32.totalorder %s6597_s28, 2  ;;  %s5357_s5 = sand.u32 1, %s6585_s22  }
0x13b6   : > { %s5358_s6 = scalar_lea.sflag [#allocation4], %s5357_s5 }
0x13b7   : > { %p6152_p2 = pnand %p6155_p1, %p6842_p6 }
0x13b9   : > { %6580 = dma.done.wait (!%p6152_p2), %s5358_s6, 16  }
0x13ba   : > { %6582 = vsyncadd (!%p6152_p2), %s5358_s6, 4294967280  ;;  %s7626_s7 = sld [smem:[#allocation25_spill]]  ;;  %p75_p3 = scmp.ge.s32.totalorder %s6825_s1, 10  }
0x13bb   : > { %s7627_s22 = smov %s6589_s23  ;;  %s7628_s23 = smov %s6593_s26 }
0x13bc   : > { %s7630_s28 = smov %s6825_s1  ;;  %77 = sbr.rel (!%p75_p3) target bundleno = 67 (0x43), region = 222 }
0x13c0   : > { %s7629_s26 = smov %s7626_s7 }
0x13c3   :  { %5362 = vsyncpa [#allocation4], 1 }
0x13c4   :  { %5364 = vsyncpa [#allocation4 + $0x1], 1 }

</bundles_post_ra>
